<compile_context>
chip_gen: v6e
topology: v6e:2x2x1
jax: 0.10.0
libtpu: 0.0.40
codegen_flags: <defaults>
</compile_context>

<pallas_src>
import functools
import math

import jax
import jax.numpy as jnp
from jax import lax
from jax.experimental import pallas as pl
from jax.experimental.pallas import tpu as pltpu


def _round_up(x, m):
    return (x + m - 1) // m * m


# ---------------------------------------------------------------------------
# Pallas kernel
# ---------------------------------------------------------------------------
def _deconv_gelu_kernel(w_ref, xd_ref, o_ref, *, width, out_len):
    # w_ref : (4, Cout, CK)     VMEM  per-tap dense weights (+ bias column)
    # xd_ref: (1, CK, Wext)     VMEM  dilated input (values at base + 4W*h + 2w)
    # o_ref : (1, Cout, 4*H*W)  VMEM  flattened NCHW output for one image
    base = 2 * width + 1
    f32 = jnp.float32

    acc = None
    for kh in range(2):
        for kw in range(2):
            t = kh * 2 + kw
            # Static lane-offset view: xt[ci, q] == x[ci, h, w] exactly when
            # q == 4*W*h + 2*w + (2*W*kh + kw), i.e. the output positions
            # belonging to tap (kh, kw); zero elsewhere.  The indicator row
            # (ci == Cin) is 1 at those same positions, so the bias column of
            # w_ref adds bias exactly once per output position across taps.
            off = base - (2 * width * kh + kw)
            xt = xd_ref[0, :, off:off + out_len]            # (CK, 4*H*W)
            yt = jnp.dot(w_ref[t], xt,                      # MXU: (Cout, 4*H*W)
                         precision=lax.Precision.HIGHEST,
                         preferred_element_type=f32)
            acc = yt if acc is None else acc + yt

    # Fused tanh-GELU epilogue on the dense output slab (EUP tanh + VPU co-issue).
    v1 = acc
    v2 = v1 * 0.5
    v5 = v1 + (v1 * v1 * v1) * 0.044715
    v7 = jnp.tanh(v5 * 0.7978845608028654)
    o_ref[0, :, :] = (v2 * (v7 + 1.0)).astype(o_ref.dtype)


# ---------------------------------------------------------------------------
# Wrapper
# ---------------------------------------------------------------------------
def deconv_gelu(x_nchw, weight, bias, *, groups):
    """x_nchw: (N, Cin, H, W); weight: (Cin, Cout/G, 2, 2); bias: (Cout,)."""
    n, cin, h, w = x_nchw.shape
    _, coutg, kh_, kw_ = weight.shape
    assert (kh_, kw_) == (2, 2), "kernel assumes kernel_size == stride == 2"
    assert cin % groups == 0
    cing = cin // groups
    cout = coutg * groups

    f32 = jnp.float32
    p4 = 4 * h * w                       # flattened output length per channel
    base = 2 * w + 1                     # left pad >= max tap offset (2W + 1)
    wext = _round_up(base + p4, 128)     # lane-dense dilated-input width
    ck = _round_up(cin + 1, 8)           # Cin + bias row, sublane-aligned

    # --- per-tap dense weights (Cout, CK): block-diagonal across groups,
    #     bias folded in as column `cin`, zero padding to CK. -----------------
    wg = weight.astype(f32).reshape(groups, cing, coutg, 2, 2)
    dense = jnp.zeros((2, 2, cout, cin), f32)
    for g in range(groups):
        blk = jnp.transpose(wg[g], (2, 3, 1, 0))            # (2, 2, Coutg, Cing)
        dense = dense.at[:, :, g * coutg:(g + 1) * coutg,
                         g * cing:(g + 1) * cing].set(blk)
    cols = [dense.reshape(4, cout, cin),
            jnp.broadcast_to(bias.astype(f32)[None, :, None], (4, cout, 1))]
    if ck > cin + 1:
        cols.append(jnp.zeros((4, cout, ck - cin - 1), f32))
    wts = jnp.concatenate(cols, axis=2)                      # (4, Cout, CK)

    # --- dilated, flattened, left-padded input (layout plumbing, tiny). ------
    rows = [x_nchw.astype(f32), jnp.ones((n, 1, h, w), f32)]
    if ck > cin + 1:
        rows.append(jnp.zeros((n, ck - cin - 1, h, w), f32))
    vals = jnp.concatenate(rows, axis=1)                     # (N, CK, H, W)
    dil = jnp.zeros((n, ck, h, 2, w, 2), f32)
    dil = dil.at[:, :, :, 0, :, 0].set(vals)                 # stride-2 dilation
    dil = dil.reshape(n, ck, p4)
    xd = jnp.pad(dil, ((0, 0), (0, 0), (base, wext - base - p4)))  # (N, CK, Wext)

    kernel = functools.partial(_deconv_gelu_kernel, width=w, out_len=p4)
    cost = pl.CostEstimate(
        flops=2 * n * cout * p4 * ck + 8 * n * cout * p4,
        transcendentals=n * cout * p4,
        bytes_accessed=int(xd.size) * 4 + int(wts.size) * 4 + n * cout * p4 * 4)

    out_flat = pl.pallas_call(
        kernel,
        out_shape=jax.ShapeDtypeStruct((n, cout, p4), f32),
        grid=(n,),
        in_specs=[
            pl.BlockSpec((4, cout, ck), lambda i: (0, 0, 0)),      # weights
            pl.BlockSpec((1, ck, wext), lambda i: (i, 0, 0)),      # dilated x
        ],
        out_specs=pl.BlockSpec((1, cout, p4), lambda i: (i, 0, 0)),
        compiler_params=pltpu.CompilerParams(
            dimension_semantics=("parallel",)),
        cost_estimate=cost,
    )(wts, xd)

    # Free row-major reshape back to NCHW: q = (2h+kh)*2W + (2w+kw).
    return out_flat.reshape(n, cout, 2 * h, 2 * w)


# ---------------------------------------------------------------------------
# Pure-JAX reference (correctness oracle; exact f32, no matmuls)
# ---------------------------------------------------------------------------
def reference(x, weight, bias, *, groups):
    n, cin, h, w = x.shape
    _, coutg, kh, kw = weight.shape
    cing = cin // groups
    cout = coutg * groups
    xg = x.reshape(n, groups, cing, h, w)
    wg = weight.reshape(groups, cing, coutg, kh, kw)
    prod = (xg[:, :, :, None, :, :, None, None] *
            wg[None, :, :, :, None, None, :, :])   # (N,G,Cing,Coutg,H,W,kh,kw)
    y = prod.sum(axis=2)                            # (N,G,Coutg,H,W,kh,kw)
    y = jnp.transpose(y, (0, 1, 2, 3, 5, 4, 6))     # (N,G,Coutg,H,kh,W,kw)
    y = y.reshape(n, cout, h * kh, w * kw) + bias[None, :, None, None]
    v2 = y * 0.5
    v5 = y + 0.044715 * (y * y * y)
    return v2 * (jnp.tanh(0.7978845608028654 * v5) + 1.0)


if __name__ == "__main__":
    # Small shapes consistent with the module: groups=4, out_channels=32, k=2.
    N, Cin, H, W = 2, 4, 16, 16
    G, Cout, kH, kW = 4, 32, 2, 2
    Coutg = Cout // G

    key = jax.random.PRNGKey(0)
    kx, kwt, kb = jax.random.split(key, 3)
    x = jax.random.normal(kx, (N, Cin, H, W), dtype=jnp.float32)

    # PyTorch-style uniform init bound.
    fan = (Cin // G) * kH * kW
    bound = 1.0 / math.sqrt(fan)
    weight = jax.random.uniform(kwt, (Cin, Coutg, kH, kW),
                                minval=-bound, maxval=bound, dtype=jnp.float32)
    bias = jax.random.uniform(kb, (Cout,),
                              minval=-bound, maxval=bound, dtype=jnp.float32)

    out = deconv_gelu(x, weight, bias, groups=G)
    out = jax.block_until_ready(out)

    ref = reference(x, weight, bias, groups=G)
    assert out.shape == (N, Cout, 2 * H, 2 * W), out.shape
    err = float(jnp.max(jnp.abs(out - ref)))
    assert jnp.allclose(out, ref, atol=1e-4, rtol=1e-4), f"mismatch, max abs err={err}"

    print("KERNEL_OK")
</pallas_src>

<mosaic_0001>
module attributes {stable_mosaic.version = 11 : i64} {
  func.func @_deconv_gelu_kernel(%arg0: i32, %arg1: memref<4x32x8xf32, #tpu.memory_space<vmem>>, %arg2: memref<1x8x1152xf32, #tpu.memory_space<vmem>>, %arg3: memref<1x32x1024xf32, #tpu.memory_space<vmem>>) attributes {dimension_semantics = [#tpu.dimension_semantics<parallel>], iteration_bounds = array<i64: 2>, scalar_prefetch = 0 : i64, scratch_operands = 0 : i64, tpu.core_type = #tpu.core_type<tc>, window_params = [{pipeline_mode = #tpu.pipeline_mode<synchronous>, transform_indices = @transform_0, window_bounds = array<i64: 4, 32, 8>}, {transform_indices = @transform_1, window_bounds = array<i64: 1, 8, 1152>}, {transform_indices = @transform_2, window_bounds = array<i64: 1, 32, 1024>}]} {
    %c0 = arith.constant 0 : index
    %c0_0 = arith.constant 0 : index
    %c33 = arith.constant 33 : index
    %0 = vector.load %arg2[%c0, %c0_0, %c33] : memref<1x8x1152xf32, #tpu.memory_space<vmem>>, vector<1x8x1024xf32>
    %1 = vector.shape_cast %0 : vector<1x8x1024xf32> to vector<8x1024xf32>
    %c0_1 = arith.constant 0 : index
    %c0_2 = arith.constant 0 : index
    %c0_3 = arith.constant 0 : index
    %2 = vector.load %arg1[%c0_1, %c0_2, %c0_3] : memref<4x32x8xf32, #tpu.memory_space<vmem>>, vector<1x32x8xf32>
    %3 = vector.shape_cast %2 : vector<1x32x8xf32> to vector<32x8xf32>
    %cst = arith.constant dense<0.000000e+00> : vector<32x1024xf32>
    %4 = tpu.matmul %3, %1, %cst {dimension_numbers = #tpu.dot_dimension_numbers<[1], [0], [0], [1], [0, 0, 1, 1], [], []>, precision = #tpu.contract_precision<fp32>} : vector<32x8xf32>, vector<8x1024xf32>, vector<32x1024xf32> -> vector<32x1024xf32>
    %c0_4 = arith.constant 0 : index
    %c0_5 = arith.constant 0 : index
    %c32 = arith.constant 32 : index
    %5 = vector.load %arg2[%c0_4, %c0_5, %c32] : memref<1x8x1152xf32, #tpu.memory_space<vmem>>, vector<1x8x1024xf32>
    %6 = vector.shape_cast %5 : vector<1x8x1024xf32> to vector<8x1024xf32>
    %c1 = arith.constant 1 : index
    %c0_6 = arith.constant 0 : index
    %c0_7 = arith.constant 0 : index
    %7 = vector.load %arg1[%c1, %c0_6, %c0_7] : memref<4x32x8xf32, #tpu.memory_space<vmem>>, vector<1x32x8xf32>
    %8 = vector.shape_cast %7 : vector<1x32x8xf32> to vector<32x8xf32>
    %cst_8 = arith.constant dense<0.000000e+00> : vector<32x1024xf32>
    %9 = tpu.matmul %8, %6, %cst_8 {dimension_numbers = #tpu.dot_dimension_numbers<[1], [0], [0], [1], [0, 0, 1, 1], [], []>, precision = #tpu.contract_precision<fp32>} : vector<32x8xf32>, vector<8x1024xf32>, vector<32x1024xf32> -> vector<32x1024xf32>
    %10 = arith.addf %4, %9 : vector<32x1024xf32>
    %c0_9 = arith.constant 0 : index
    %c0_10 = arith.constant 0 : index
    %c1_11 = arith.constant 1 : index
    %11 = vector.load %arg2[%c0_9, %c0_10, %c1_11] : memref<1x8x1152xf32, #tpu.memory_space<vmem>>, vector<1x8x1024xf32>
    %12 = vector.shape_cast %11 : vector<1x8x1024xf32> to vector<8x1024xf32>
    %c2 = arith.constant 2 : index
    %c0_12 = arith.constant 0 : index
    %c0_13 = arith.constant 0 : index
    %13 = vector.load %arg1[%c2, %c0_12, %c0_13] : memref<4x32x8xf32, #tpu.memory_space<vmem>>, vector<1x32x8xf32>
    %14 = vector.shape_cast %13 : vector<1x32x8xf32> to vector<32x8xf32>
    %cst_14 = arith.constant dense<0.000000e+00> : vector<32x1024xf32>
    %15 = tpu.matmul %14, %12, %cst_14 {dimension_numbers = #tpu.dot_dimension_numbers<[1], [0], [0], [1], [0, 0, 1, 1], [], []>, precision = #tpu.contract_precision<fp32>} : vector<32x8xf32>, vector<8x1024xf32>, vector<32x1024xf32> -> vector<32x1024xf32>
    %16 = arith.addf %10, %15 : vector<32x1024xf32>
    %c0_15 = arith.constant 0 : index
    %c0_16 = arith.constant 0 : index
    %c0_17 = arith.constant 0 : index
    %17 = vector.load %arg2[%c0_15, %c0_16, %c0_17] : memref<1x8x1152xf32, #tpu.memory_space<vmem>>, vector<1x8x1024xf32>
    %18 = vector.shape_cast %17 : vector<1x8x1024xf32> to vector<8x1024xf32>
    %c3 = arith.constant 3 : index
    %c0_18 = arith.constant 0 : index
    %c0_19 = arith.constant 0 : index
    %19 = vector.load %arg1[%c3, %c0_18, %c0_19] : memref<4x32x8xf32, #tpu.memory_space<vmem>>, vector<1x32x8xf32>
    %20 = vector.shape_cast %19 : vector<1x32x8xf32> to vector<32x8xf32>
    %cst_20 = arith.constant dense<0.000000e+00> : vector<32x1024xf32>
    %21 = tpu.matmul %20, %18, %cst_20 {dimension_numbers = #tpu.dot_dimension_numbers<[1], [0], [0], [1], [0, 0, 1, 1], [], []>, precision = #tpu.contract_precision<fp32>} : vector<32x8xf32>, vector<8x1024xf32>, vector<32x1024xf32> -> vector<32x1024xf32>
    %22 = arith.addf %16, %21 : vector<32x1024xf32>
    %cst_21 = arith.constant 5.000000e-01 : f32
    %23 = vector.broadcast %cst_21 : f32 to vector<32x1024xf32>
    %24 = arith.mulf %22, %23 : vector<32x1024xf32>
    %25 = arith.mulf %22, %22 : vector<32x1024xf32>
    %26 = arith.mulf %25, %22 : vector<32x1024xf32>
    %cst_22 = arith.constant 4.471500e-02 : f32
    %27 = vector.broadcast %cst_22 : f32 to vector<32x1024xf32>
    %28 = arith.mulf %26, %27 : vector<32x1024xf32>
    %29 = arith.addf %22, %28 : vector<32x1024xf32>
    %cst_23 = arith.constant 0.797884583 : f32
    %30 = vector.broadcast %cst_23 : f32 to vector<32x1024xf32>
    %31 = arith.mulf %29, %30 : vector<32x1024xf32>
    %32 = math.tanh %31 : vector<32x1024xf32>
    %cst_24 = arith.constant 1.000000e+00 : f32
    %33 = vector.broadcast %cst_24 : f32 to vector<32x1024xf32>
    %34 = arith.addf %32, %33 : vector<32x1024xf32>
    %35 = arith.mulf %24, %34 : vector<32x1024xf32>
    %c0_25 = arith.constant 0 : index
    %c0_26 = arith.constant 0 : index
    %c0_27 = arith.constant 0 : index
    %36 = vector.load %arg3[%c0_25, %c0_26, %c0_27] : memref<1x32x1024xf32, #tpu.memory_space<vmem>>, vector<1x32x1024xf32>
    %37 = vector.shape_cast %36 : vector<1x32x1024xf32> to vector<32x1024xf32>
    %38 = vector.shape_cast %35 : vector<32x1024xf32> to vector<1x32x1024xf32>
    tpu.vector_store %arg3[%c0_25, %c0_26, %c0_27], %38 {strides = array<i32>} : memref<1x32x1024xf32, #tpu.memory_space<vmem>>, vector<1x32x1024xf32>,
    return
  }
  func.func @transform_0(%arg0: i32) -> (i32, i32, i32) {
    %c0_i32 = arith.constant 0 : i32
    %c0_i32_0 = arith.constant 0 : i32
    %c0_i32_1 = arith.constant 0 : i32
    %c0_i32_2 = arith.constant 0 : i32
    return %c0_i32, %c0_i32_0, %c0_i32_1 : i32, i32, i32
  }
  func.func @transform_1(%arg0: i32) -> (i32, i32, i32) {
    %c0_i32 = arith.constant 0 : i32
    %c0_i32_0 = arith.constant 0 : i32
    %c0_i32_1 = arith.constant 0 : i32
    return %arg0, %c0_i32, %c0_i32_0 : i32, i32, i32
  }
  func.func @transform_2(%arg0: i32) -> (i32, i32, i32) {
    %c0_i32 = arith.constant 0 : i32
    %c0_i32_0 = arith.constant 0 : i32
    %c0_i32_1 = arith.constant 0 : i32
    return %arg0, %c0_i32, %c0_i32_0 : i32, i32, i32
  }
}

</mosaic_0001>

<bundles_post_ra>
// kernel: tpu_custom_call.1
= control target key start
LH: loop header
LB: loop body
LE: loop exit
PB: predicated region body
PF: predicated region fallthrough
CT: control target
= control target key end

     0   :  { %7 = vsyncpa [#allocation3], 0  ;;  %s13241_s0 = inlined_call_operand.vmem [shape: f32[4,32,8], index: 0, kind: input, shape index: {}]   ;;  %s13242_s1 = inlined_call_operand.vmem [shape: f32[2,8,1152], index: 1, kind: input, shape index: {}]   ;;  %s13243_s2 = inlined_call_operand.hbm [shape: f32[2,32,1024], index: 2, kind: output, shape index: {}]  }
   0x1   :  { %9 = vsyncpa [#allocation3 + $0x1], 0  ;;  %s10811_s9 = smov 0   ;;  %s10813_s10 = smov 0  }
   0x2   :  { %s10815_s11 = smov 0   ;;  %s10817_s12 = smov 0  }
   0x3 LB: > { %s10832_s13 = sadd.s32 4294967295, %s10787_s12   ;;  %s10593_s14 = sadd.s32 4294967294, %s10787_s12   ;;  %s10787_s12 = sphi %s10817_s12, %s13347_s12   ;;  %s10783_s11 = sphi %s10815_s11, %s13346_s11   ;;  %s10779_s10 = sphi %s10813_s10, %s13345_s10   ;;  %s10775_s9 = sphi %s10811_s9, %s13344_s9  }
   0x4   : > { %s10836_s15 = sadd.s32 1, %s10787_s12   ;;  %s69_s16 = sadd.s32 1, %s10783_s11 }
   0x5   : > { %s66_s17 = ssub.s32 %s10787_s12, %s10836_s15  ;;  %p79_p0 = scmp.ne.s32.totalorder %s10783_s11, %s10779_s10 }
   0x6   : > { %p67_p1 = scmp.eq.s32.totalorder %s66_s17, 0  ;;  %p80_p2 = scmp.eq.s32.totalorder %s10832_s13, 1 }
   0x7   : > { %p85_p3 = scmp.ne.s32.totalorder %s10779_s10, %s10775_s9  ;;  %p86_p4 = scmp.eq.s32.totalorder %s10593_s14, 1 }
   0x8   : > { %s10847_s18 = scalar_select %p67_p1, %s10783_s11, %s69_s16  }
   0x9   : > { %p10849_p5 = por %p80_p2, %p79_p0  ;;  %p10853_p6 = por %p86_p4, %p85_p3 }
   0xa   : > { %p10596_p7 = scmp.ge.s32.totalorder %s10787_s12, 1  ;;  %p115_p8 = scmp.lt.s32.totalorder %s10787_s12, 3 }
   0xc   : > { %p116_p9 = pnand %p10596_p7, %p115_p8 }
   0xe   : > { %119 = sbr.rel (%p116_p9) target bundleno = 1164 (0x48c), region = 28 }
  0x13   : > { %p137_p10 = scmp.lt.s32.totalorder %s10832_s13, 1  ;;  %v10789_v0 = vmov 0.0   ;;  %s10790_s26 = smov 96   ;;  %v10599_v10 = vld [vmem:[%s13241_s0 + $0x20] sm:$0xff]  ;;  %vm204_vm0 = vcmask 64512   ;;  %v10600_v12 = vld [vmem:[%s13241_s0 + $0x28] sm:$0xff] }
  0x14   : > { %283 = vmatprep.mubr.f32.mxu0 %v10789_v0  ;;  %402 = vmatprep.mubr.f32.mxu1 %v10789_v0  ;;  %s10791_s27 = smov 95   ;;  %v206_v11 = vsel %vm204_vm0, %v10599_v10, 0  ;;  %v209_v14 = vsel %vm204_vm0, %v10600_v12, 0  ;;  %v10601_v15 = vld [vmem:[%s13241_s0 + $0x30] sm:$0xff]  ;;  %v10602_v19 = vld [vmem:[%s13241_s0 + $0x38] sm:$0xff]  ;;  %vm187_vm1 = vcmask 785408  }
  0x15   : > { %s138_s21 = scalar_select %p137_p10, %s10832_s13, 1  ;;  %v10920_v13 = vand.u32 4294901760, %v206_v11  ;;  %v10929_v17 = vand.u32 4294901760, %v209_v14  ;;  %v212_v18 = vsel %vm204_vm0, %v10601_v15, 0  ;;  %v215_v23 = vsel %vm204_vm0, %v10602_v19, 0 }
  0x16   : > { %v10935_v20 = vand.u32 4294901760, %v212_v18  ;;  %v10955_v31 = vand.u32 4294901760, %v215_v23  ;;  %s10792_s8 = smov 127   ;;  %vm2683_vm2 = vcmask 777216   ;;  %vm5183_vm3 = vcmask 1039360   ;;  %s10793_s5 = smov [#allocation2]  }
  0x17   : > { %s10617_s22 = smul.u32 72, %s138_s21  ;;  %v10927_v16 = vsub.f32 %v206_v11, %v10920_v13  ;;  %v10941_v22 = vsub.f32 %v209_v14, %v10929_v17  ;;  %s10731_s6 = sshll.u32 %s10793_s5, 4  ;;  %s10732_s6 = int_to_ptr.vmem [resolvable:$false] %s10731_s6 }
  0x18   : > { %v10946_v27 = vsub.f32 %v212_v18, %v10935_v20  ;;  %v10967_v39 = vsub.f32 %v215_v23, %v10955_v31  ;;  %s10733_s7 = scalar_lea.vmem %s10732_s6, 8192 }
  0x19   : > { %s10866_s25 = scalar_lea.vmem %s13242_s1, %s10617_s22  ;;  %v10938_v21 = vand.u32 4294901760, %v10927_v16  ;;  %v10953_v30 = vand.u32 4294901760, %v10941_v22 }
  0x1a   : > { %v10869_v1 = vld [vmem:[%s10866_s25 + $0x8] sm:$0xff]  ;;  %v10872_v2 = vld [vmem:[%s10866_s25] sm:$0xff]  ;;  %v10877_v3 = vld [vmem:[%s10866_s25 + $0x10] sm:$0xff]  ;;  %v10960_v35 = vand.u32 4294901760, %v10946_v27  ;;  %v10976_v45 = vand.u32 4294901760, %v10967_v39 }
  0x1b   : > { %171 = vrot.lane.b32.xlu0 %v10869_v1, %s10790_s26  ;;  %169 = vrot.lane.b32.xlu1 %v10872_v2, %s10790_s26  ;;  %v10880_v4 = vld [vmem:[%s10866_s25 + $0x18] sm:$0xff]  ;;  %v10885_v5 = vld [vmem:[%s10866_s25 + $0x20] sm:$0xff]  ;;  %v287_v29 = vsub.f32 %v10927_v16, %v10938_v21  ;;  %v298_v38 = vsub.f32 %v10941_v22, %v10953_v30 }
  0x1c   : > { %v10888_v6 = vld [vmem:[%s10866_s25 + $0x28] sm:$0xff]  ;;  %v10893_v7 = vld [vmem:[%s10866_s25 + $0x30] sm:$0xff]  ;;  %v10896_v8 = vld [vmem:[%s10866_s25 + $0x38] sm:$0xff]  ;;  %v309_v44 = vsub.f32 %v10946_v27, %v10960_v35  ;;  %v320_v53 = vsub.f32 %v10967_v39, %v10976_v45 }
  0x1d   : > { %v10901_v9 = vld [vmem:[%s10866_s25 + $0x40] sm:$0xff]  ;;  %v10962_v37 = vand.u32 4294901760, %v287_v29  ;;  %v10971_v43 = vand.u32 4294901760, %v298_v38 }
  0x1e   : > { %v10984_v52 = vand.u32 4294901760, %v309_v44  ;;  %v10993_v56 = vand.u32 4294901760, %v320_v53 }
  0x1f   : > { %173 = vrot.lane.b32.xlu0 %v10877_v3, %s10790_s26  ;;  %175 = vrot.lane.b32.xlu1 %v10880_v4, %s10790_s26 }
  0x23   : > { %177 = vrot.lane.b32.xlu0 %v10885_v5, %s10790_s26  ;;  %179 = vrot.lane.b32.xlu1 %v10888_v6, %s10790_s26 }
  0x27   : > { %181 = vrot.lane.b32.xlu0 %v10893_v7, %s10790_s26  ;;  %183 = vrot.lane.b32.xlu1 %v10896_v8, %s10790_s26 }
  0x2b   : > { %185 = vrot.lane.b32.xlu0 %v10901_v9, %s10790_s26  ;;  %2667 = vrot.lane.b32.xlu1 %v10869_v1, %s10791_s27 }
  0x2f   : > { %2669 = vrot.lane.b32.xlu0 %v10877_v3, %s10791_s27  ;;  %2665 = vrot.lane.b32.xlu1 %v10872_v2, %s10791_s27 }
  0x33   : > { %2671 = vrot.lane.b32.xlu0 %v10880_v4, %s10791_s27  ;;  %2673 = vrot.lane.b32.xlu1 %v10885_v5, %s10791_s27 }
  0x37   : > { %2675 = vrot.lane.b32.xlu0 %v10888_v6, %s10791_s27  ;;  %2677 = vrot.lane.b32.xlu1 %v10893_v7, %s10791_s27 }
  0x3b   : > { %2679 = vrot.lane.b32.xlu0 %v10896_v8, %s10791_s27  ;;  %2681 = vrot.lane.b32.xlu1 %v10901_v9, %s10791_s27  ;;  %s10616_s27 = sshll.u32 %s10832_s13, 12 }
  0x3c   : > { %s13193_s3 = scalar_lea.hbm %s13243_s2, %s10616_s27 }
  0x3f   : > { %5167 = vrot.lane.b32.xlu0 %v10869_v1, %s10792_s8  ;;  %5169 = vrot.lane.b32.xlu1 %v10877_v3, %s10792_s8 }
  0x43   : > { %5165 = vrot.lane.b32.xlu0 %v10872_v2, %s10792_s8  ;;  %5171 = vrot.lane.b32.xlu1 %v10880_v4, %s10792_s8 }
  0x47   : > { %5173 = vrot.lane.b32.xlu0 %v10885_v5, %s10792_s8  ;;  %5175 = vrot.lane.b32.xlu1 %v10888_v6, %s10792_s8 }
  0x4b   : > { %5177 = vrot.lane.b32.xlu0 %v10893_v7, %s10792_s8  ;;  %5179 = vrot.lane.b32.xlu1 %v10896_v8, %s10792_s8 }
  0x4f   : > { %5181 = vrot.lane.b32.xlu0 %v10901_v9, %s10792_s8 }
  0x8d   : > { %v172_v24 = vpop.permute.xlu0 %171  ;;  %v170_v25 = vpop.permute.xlu1 %169 }
  0x8e   : > { %v188_v26 = vsel %vm187_vm1, %v170_v25, %v172_v24 }
  0x8f   : > { %v10948_v28 = vand.u32 4294901760, %v188_v26 }
  0x91   : > { %v365_v32 = vsub.f32 %v188_v26, %v10948_v28  ;;  %v174_v33 = vpop.permute.xlu0 %173  ;;  %v176_v48 = vpop.permute.xlu1 %175 }
  0x92   : > { %v189_v34 = vsel %vm187_vm1, %v172_v24, %v174_v33  ;;  %v190_v60 = vsel %vm187_vm1, %v174_v33, %v176_v48 }
  0x93   : > { %v247_v36 = vand.u32 4294901760, %v189_v34  ;;  %v366_v40 = vand.u32 4294901760, %v365_v32  ;;  %v11013_v62 = vand.u32 4294901760, %v190_v60 }
  0x95   : > { %v359_v41 = vsub.f32 %v189_v34, %v247_v36  ;;  %248 = vmatprep.subr.mxu0 %v247_v36  ;;  %v10978_v46 = vpop.permute.xlu0 %177  ;;  %v367_v47 = vsub.f32 %v365_v32, %v366_v40  ;;  %v977_v63 = vsub.f32 %v190_v60, %v11013_v62  ;;  %v180_v15 = vpop.permute.xlu1 %179 }
  0x96   : > { %250 = vmatpush1.msra.mxu0 %v10948_v28  ;;  %v191_v50 = vsel %vm187_vm1, %v176_v48, %v10978_v46  ;;  %v192_v26 = vsel %vm187_vm1, %v10978_v46, %v180_v15 }
  0x97   : > { %289 = vmatmul.mubr.f32.vlgmr.msra.gmra.mxu0 %v10962_v37  ;;  %463 = vmatprep.subr.mxu0 %v359_v41  ;;  %v360_v42 = vand.u32 4294901760, %v359_v41  ;;  %v368_v54 = vand.u32 4294901760, %v367_v47  ;;  %v10989_v55 = vand.u32 4294901760, %v191_v50  ;;  %v978_v10 = vand.u32 4294901760, %v977_v63 }
  0x98   : > { %466 = vmatpush1.msra.mxu0 %v365_v32  ;;  %294 = vmatprep.mubr.f32.mxu0 %v10789_v0  ;;  %v11079_v29 = vand.u32 4294901760, %v192_v26 }
  0x99   : > { %668 = vmatprep.subr.mxu0 %v360_v42  ;;  %v361_v49 = vsub.f32 %v359_v41, %v360_v42  ;;  %v971_v57 = vsub.f32 %v191_v50, %v10989_v55  ;;  %v979_v11 = vsub.f32 %v977_v63, %v978_v10  ;;  %v11045_v14 = vpop.permute.xlu0 %181 }
  0x9a   : > { %v193_v18 = vsel %vm187_vm1, %v180_v15, %v11045_v14  ;;  %v1589_v32 = vsub.f32 %v192_v26, %v11079_v29 }
  0x9b   : > { %300 = vmatmul.mubr.f32.gmra.mxu0 %v10971_v43  ;;  %v362_v51 = vand.u32 4294901760, %v361_v49  ;;  %v972_v58 = vand.u32 4294901760, %v971_v57  ;;  %v980_v12 = vand.u32 4294901760, %v979_v11  ;;  %v11055_v19 = vand.u32 4294901760, %v193_v18 }
  0x9c   : > { %305 = vmatprep.mubr.f32.mxu0 %v10789_v0  ;;  %v1590_v33 = vand.u32 4294901760, %v1589_v32 }
  0x9d   : > { %363 = vmatprep.subr.mxu1 %v362_v51  ;;  %v973_v59 = vsub.f32 %v971_v57, %v972_v58  ;;  %v1583_v23 = vsub.f32 %v193_v18, %v11055_v19  ;;  %v186_v38 = vpop.permute.xlu0 %185 }
  0x9e   : > { %369 = vmatpush1.msra.mxu1 %v368_v54  ;;  %v1591_v34 = vsub.f32 %v1589_v32, %v1590_v33  ;;  %v151_v54 = vld [vmem:[%s13241_s0] sm:$0xff] }
  0x9f   : > { %311 = vmatmul.mubr.f32.gmra.mxu0 %v10984_v52  ;;  %404 = vmatmul.mubr.f32.vlgmr.msra.gmra.mxu1 %v10920_v13  ;;  %v974_v61 = vand.u32 4294901760, %v973_v59  ;;  %v1584_v24 = vand.u32 4294901760, %v1583_v23 }
  0xa0   : > { %563 = vmatprep.subr.mxu1 %v247_v36  ;;  %316 = vmatprep.mubr.f32.mxu0 %v10789_v0 }
  0xa1   : > { %565 = vmatpush1.msra.mxu1 %v10948_v28  ;;  %409 = vmatprep.mubr.f32.mxu1 %v10789_v0  ;;  %v1585_v25 = vsub.f32 %v1583_v23, %v1584_v24  ;;  %v11203_v5 = vpop.permute.xlu0 %2669 }
  0xa2   : > { %765 = vmatprep.subr.mxu1 %v247_v36  ;;  %v1592_v36 = vand.u32 4294901760, %v1591_v34 }
  0xa3   : > { %322 = vmatmul.mubr.f32.gmra.mxu0 %v10993_v56  ;;  %411 = vmatmul.mubr.f32.gmra.mxu1 %v10929_v17 }
  0xa4   : > { %416 = vmatprep.mubr.f32.mxu1 %v10789_v0  ;;  %499 = vmatprep.mubr.f32.mxu0 %v10789_v0 }
  0xa7   : > { %418 = vmatmul.mubr.f32.gmra.mxu1 %v10935_v20  ;;  %502 = vmatmul.mubr.f32.vlgmr.msra.gmra.mxu0 %v10927_v16 }
  0xa8   : > { %672 = vmatpush1.msra.mxu0 %v366_v40  ;;  %423 = vmatprep.mubr.f32.mxu1 %v10789_v0  ;;  %v184_v40 = vpop.permute.xlu1 %183 }
  0xa9   : > { %507 = vmatprep.mubr.f32.mxu0 %v10789_v0  ;;  %860 = vmatprep.subr.mxu0 %v10989_v55  ;;  %v195_v41 = vsel %vm187_vm1, %v184_v40, %v186_v38  ;;  %v194_v48 = vsel %vm187_vm1, %v11045_v14, %v184_v40 }
  0xaa   : > { %v11118_v42 = vand.u32 4294901760, %v195_v41  ;;  %v11152_v50 = vand.u32 4294901760, %v194_v48 }
  0xab   : > { %425 = vmatmul.mubr.f32.gmra.mxu1 %v10955_v31  ;;  %510 = vmatmul.mubr.f32.gmra.mxu0 %v10941_v22 }
  0xac   : > { %515 = vmatprep.mubr.f32.mxu0 %v10789_v0  ;;  %598 = vmatprep.mubr.f32.mxu1 %v10789_v0  ;;  %v11127_v44 = vsub.f32 %v195_v41, %v11118_v42  ;;  %v11164_v1 = vsub.f32 %v194_v48, %v11152_v50  ;;  %v2668_v6 = vpop.permute.xlu1 %2667 }
  0xad   : > { %v2685_v7 = vsel %vm2683_vm2, %v2668_v6, %v11203_v5 }
  0xae   : > { %v2196_v46 = vand.u32 4294901760, %v11127_v44  ;;  %v2202_v2 = vand.u32 4294901760, %v11164_v1  ;;  %v11216_v8 = vand.u32 4294901760, %v2685_v7 }
  0xaf   : > { %518 = vmatmul.mubr.f32.gmra.mxu0 %v10946_v27  ;;  %602 = vmatmul.mubr.f32.vlgmr.msra.gmra.mxu1 %v10938_v21 }
  0xb0   : > { %767 = vmatpush1.msra.mxu1 %v10948_v28  ;;  %523 = vmatprep.mubr.f32.mxu0 %v10789_v0  ;;  %v1586_v28 = vand.u32 4294901760, %v1585_v25  ;;  %v2197_v47 = vsub.f32 %v11127_v44, %v2196_v46  ;;  %v2203_v3 = vsub.f32 %v11164_v1, %v2202_v2  ;;  %v11225_v9 = vsub.f32 %v2685_v7, %v11216_v8 }
  0xb1   : > { %607 = vmatprep.mubr.f32.mxu1 %v10789_v0  ;;  %975 = vmatprep.subr.mxu1 %v974_v61 }
  0xb2   : > { %v2198_v49 = vand.u32 4294901760, %v2197_v47  ;;  %v2204_v4 = vand.u32 4294901760, %v2203_v3 }
  0xb3   : > { %526 = vmatmul.mubr.f32.gmra.mxu0 %v10967_v39  ;;  %611 = vmatmul.mubr.f32.gmra.mxu1 %v10953_v30 }
  0xb4   : > { %616 = vmatprep.mubr.f32.mxu1 %v10789_v0  ;;  %705 = vmatprep.mubr.f32.mxu0 %v10789_v0 }
  0xb7   : > { %620 = vmatmul.mubr.f32.gmra.mxu1 %v10960_v35  ;;  %707 = vmatmul.mubr.f32.vlgmr.msra.gmra.mxu0 %v10920_v13 }
  0xb8   : > { %862 = vmatpush1.msra.mxu0 %v11013_v62  ;;  %625 = vmatprep.mubr.f32.mxu1 %v10789_v0 }
  0xb9   : > { %1075 = vmatprep.subr.mxu0 %v971_v57  ;;  %712 = vmatprep.mubr.f32.mxu0 %v10789_v0 }
  0xbb   : > { %629 = vmatmul.mubr.f32.gmra.mxu1 %v10976_v45  ;;  %714 = vmatmul.mubr.f32.gmra.mxu0 %v10929_v17 }
  0xbc   : > { %719 = vmatprep.mubr.f32.mxu0 %v10789_v0  ;;  %800 = vmatprep.mubr.f32.mxu1 %v10789_v0 }
  0xbf   : > { %721 = vmatmul.mubr.f32.gmra.mxu0 %v10935_v20  ;;  %802 = vmatmul.mubr.f32.vlgmr.msra.gmra.mxu1 %v10920_v13 }
  0xc0   : > { %981 = vmatpush1.msra.mxu1 %v980_v12  ;;  %726 = vmatprep.mubr.f32.mxu0 %v10789_v0 }
  0xc1   : > { %1175 = vmatprep.subr.mxu1 %v10989_v55  ;;  %807 = vmatprep.mubr.f32.mxu1 %v10789_v0 }
  0xc3   : > { %728 = vmatmul.mubr.f32.gmra.mxu0 %v10955_v31  ;;  %809 = vmatmul.mubr.f32.gmra.mxu1 %v10929_v17 }
  0xc4   : > { %814 = vmatprep.mubr.f32.mxu1 %v10789_v0  ;;  %895 = vmatprep.mubr.f32.mxu0 %v10789_v0 }
  0xc7   : > { %816 = vmatmul.mubr.f32.gmra.mxu1 %v10935_v20  ;;  %901 = vmatmul.mubr.f32.vlgmr.msra.gmra.mxu0 %v10962_v37 }
  0xc8   : > { %1078 = vmatpush1.msra.mxu0 %v977_v63  ;;  %821 = vmatprep.mubr.f32.mxu1 %v10789_v0 }
  0xc9   : > { %1280 = vmatprep.subr.mxu0 %v972_v58  ;;  %906 = vmatprep.mubr.f32.mxu0 %v10789_v0  ;;  %v153_v58 = vld [vmem:[%s13241_s0 + $0x10] sm:$0xff] }
  0xca   : > { %v2707_v60 = vsel %vm204_vm0, %v153_v58, 0 }
  0xcb   : > { %823 = vmatmul.mubr.f32.gmra.mxu1 %v10955_v31  ;;  %912 = vmatmul.mubr.f32.gmra.mxu0 %v10971_v43  ;;  %v11299_v63 = vand.u32 4294901760, %v2707_v60 }
  0xcc   : > { %917 = vmatprep.mubr.f32.mxu0 %v10789_v0  ;;  %1014 = vmatprep.mubr.f32.mxu1 %v10789_v0 }
  0xcd   : > { %v11312_v14 = vsub.f32 %v2707_v60, %v11299_v63 }
  0xcf   : > { %923 = vmatmul.mubr.f32.gmra.mxu0 %v10984_v52  ;;  %1016 = vmatmul.mubr.f32.vlgmr.msra.gmra.mxu1 %v10920_v13 }
  0xd0   : > { %1177 = vmatpush1.msra.mxu1 %v11013_v62  ;;  %928 = vmatprep.mubr.f32.mxu0 %v10789_v0 }
  0xd1   : > { %1377 = vmatprep.subr.mxu1 %v10989_v55  ;;  %1021 = vmatprep.mubr.f32.mxu1 %v10789_v0 }
  0xd3   : > { %934 = vmatmul.mubr.f32.gmra.mxu0 %v10993_v56  ;;  %1023 = vmatmul.mubr.f32.gmra.mxu1 %v10929_v17 }
  0xd4   : > { %1028 = vmatprep.mubr.f32.mxu1 %v10789_v0  ;;  %1111 = vmatprep.mubr.f32.mxu0 %v10789_v0 }
  0xd7   : > { %1030 = vmatmul.mubr.f32.gmra.mxu1 %v10935_v20  ;;  %1114 = vmatmul.mubr.f32.vlgmr.msra.gmra.mxu0 %v10927_v16 }
  0xd8   : > { %1284 = vmatpush1.msra.mxu0 %v978_v10  ;;  %1035 = vmatprep.mubr.f32.mxu1 %v10789_v0 }
  0xd9   : > { %1119 = vmatprep.mubr.f32.mxu0 %v10789_v0  ;;  %1472 = vmatprep.subr.mxu0 %v11055_v19 }
  0xdb   : > { %1037 = vmatmul.mubr.f32.gmra.mxu1 %v10955_v31  ;;  %1122 = vmatmul.mubr.f32.gmra.mxu0 %v10941_v22 }
  0xdc   : > { %1127 = vmatprep.mubr.f32.mxu0 %v10789_v0  ;;  %1210 = vmatprep.mubr.f32.mxu1 %v10789_v0 }
  0xdf   : > { %1130 = vmatmul.mubr.f32.gmra.mxu0 %v10946_v27  ;;  %1214 = vmatmul.mubr.f32.vlgmr.msra.gmra.mxu1 %v10938_v21 }
  0xe0   : > { %1379 = vmatpush1.msra.mxu1 %v11013_v62  ;;  %1135 = vmatprep.mubr.f32.mxu0 %v10789_v0 }
  0xe1   : > { %1219 = vmatprep.mubr.f32.mxu1 %v10789_v0  ;;  %1587 = vmatprep.subr.mxu1 %v1586_v28 }
  0xe3   : > { %1138 = vmatmul.mubr.f32.gmra.mxu0 %v10967_v39  ;;  %1223 = vmatmul.mubr.f32.gmra.mxu1 %v10953_v30 }
  0xe4   : > { %1228 = vmatprep.mubr.f32.mxu1 %v10789_v0  ;;  %1317 = vmatprep.mubr.f32.mxu0 %v10789_v0 }
  0xe7   : > { %1232 = vmatmul.mubr.f32.gmra.mxu1 %v10960_v35  ;;  %1319 = vmatmul.mubr.f32.vlgmr.msra.gmra.mxu0 %v10920_v13 }
  0xe8   : > { %1474 = vmatpush1.msra.mxu0 %v11079_v29  ;;  %1237 = vmatprep.mubr.f32.mxu1 %v10789_v0 }
  0xe9   : > { %1687 = vmatprep.subr.mxu0 %v1583_v23  ;;  %1324 = vmatprep.mubr.f32.mxu0 %v10789_v0 }
  0xeb   : > { %1241 = vmatmul.mubr.f32.gmra.mxu1 %v10976_v45  ;;  %1326 = vmatmul.mubr.f32.gmra.mxu0 %v10929_v17 }
  0xec   : > { %1331 = vmatprep.mubr.f32.mxu0 %v10789_v0  ;;  %1412 = vmatprep.mubr.f32.mxu1 %v10789_v0 }
  0xef   : > { %1333 = vmatmul.mubr.f32.gmra.mxu0 %v10935_v20  ;;  %1414 = vmatmul.mubr.f32.vlgmr.msra.gmra.mxu1 %v10920_v13 }
  0xf0   : > { %1593 = vmatpush1.msra.mxu1 %v1592_v36  ;;  %1338 = vmatprep.mubr.f32.mxu0 %v10789_v0 }
  0xf1   : > { %1787 = vmatprep.subr.mxu1 %v11055_v19  ;;  %1419 = vmatprep.mubr.f32.mxu1 %v10789_v0 }
  0xf3   : > { %1340 = vmatmul.mubr.f32.gmra.mxu0 %v10955_v31  ;;  %1421 = vmatmul.mubr.f32.gmra.mxu1 %v10929_v17 }
  0xf4   : > { %1426 = vmatprep.mubr.f32.mxu1 %v10789_v0  ;;  %1507 = vmatprep.mubr.f32.mxu0 %v10789_v0 }
  0xf7   : > { %1428 = vmatmul.mubr.f32.gmra.mxu1 %v10935_v20  ;;  %1513 = vmatmul.mubr.f32.vlgmr.msra.gmra.mxu0 %v10962_v37 }
  0xf8   : > { %1690 = vmatpush1.msra.mxu0 %v1589_v32  ;;  %1433 = vmatprep.mubr.f32.mxu1 %v10789_v0 }
  0xf9   : > { %1892 = vmatprep.subr.mxu0 %v1584_v24  ;;  %1518 = vmatprep.mubr.f32.mxu0 %v10789_v0 }
  0xfb   : > { %1435 = vmatmul.mubr.f32.gmra.mxu1 %v10955_v31  ;;  %1524 = vmatmul.mubr.f32.gmra.mxu0 %v10971_v43 }
  0xfc   : > { %1529 = vmatprep.mubr.f32.mxu0 %v10789_v0  ;;  %1626 = vmatprep.mubr.f32.mxu1 %v10789_v0 }
  0xff   : > { %1535 = vmatmul.mubr.f32.gmra.mxu0 %v10984_v52  ;;  %1628 = vmatmul.mubr.f32.vlgmr.msra.gmra.mxu1 %v10920_v13 }
 0x100   : > { %1789 = vmatpush1.msra.mxu1 %v11079_v29  ;;  %1540 = vmatprep.mubr.f32.mxu0 %v10789_v0 }
 0x101   : > { %1989 = vmatprep.subr.mxu1 %v11055_v19  ;;  %1633 = vmatprep.mubr.f32.mxu1 %v10789_v0  ;;  %v11326_v19 = vand.u32 4294901760, %v11312_v14 }
 0x103   : > { %1546 = vmatmul.mubr.f32.gmra.mxu0 %v10993_v56  ;;  %1635 = vmatmul.mubr.f32.gmra.mxu1 %v10929_v17  ;;  %v2804_v25 = vsub.f32 %v11312_v14, %v11326_v19 }
 0x104   : > { %1640 = vmatprep.mubr.f32.mxu1 %v10789_v0  ;;  %1723 = vmatprep.mubr.f32.mxu0 %v10789_v0 }
 0x105   : > { %v11353_v34 = vand.u32 4294901760, %v2804_v25 }
 0x107   : > { %1642 = vmatmul.mubr.f32.gmra.mxu1 %v10935_v20  ;;  %1726 = vmatmul.mubr.f32.vlgmr.msra.gmra.mxu0 %v10927_v16 }
 0x108   : > { %1896 = vmatpush1.msra.mxu0 %v1590_v33  ;;  %1647 = vmatprep.mubr.f32.mxu1 %v10789_v0 }
 0x109   : > { %1731 = vmatprep.mubr.f32.mxu0 %v10789_v0  ;;  %2084 = vmatprep.subr.mxu0 %v11118_v42 }
 0x10b   : > { %1649 = vmatmul.mubr.f32.gmra.mxu1 %v10955_v31  ;;  %1734 = vmatmul.mubr.f32.gmra.mxu0 %v10941_v22 }
 0x10c   : > { %1739 = vmatprep.mubr.f32.mxu0 %v10789_v0  ;;  %1822 = vmatprep.mubr.f32.mxu1 %v10789_v0 }
 0x10f   : > { %1742 = vmatmul.mubr.f32.gmra.mxu0 %v10946_v27  ;;  %1826 = vmatmul.mubr.f32.vlgmr.msra.gmra.mxu1 %v10938_v21 }
 0x110   : > { %1991 = vmatpush1.msra.mxu1 %v11079_v29  ;;  %1747 = vmatprep.mubr.f32.mxu0 %v10789_v0  ;;  %v2672_v29 = vpop.permute.xlu0 %2671 }
 0x111   : > { %1831 = vmatprep.mubr.f32.mxu1 %v10789_v0  ;;  %2199 = vmatprep.subr.mxu1 %v2198_v49 }
 0x113   : > { %1750 = vmatmul.mubr.f32.gmra.mxu0 %v10967_v39  ;;  %1835 = vmatmul.mubr.f32.gmra.mxu1 %v10953_v30 }
 0x114   : > { %1840 = vmatprep.mubr.f32.mxu1 %v10789_v0  ;;  %1929 = vmatprep.mubr.f32.mxu0 %v10789_v0 }
 0x117   : > { %1844 = vmatmul.mubr.f32.gmra.mxu1 %v10960_v35  ;;  %1931 = vmatmul.mubr.f32.vlgmr.msra.gmra.mxu0 %v10920_v13 }
 0x118   : > { %2086 = vmatpush1.msra.mxu0 %v11152_v50  ;;  %1849 = vmatprep.mubr.f32.mxu1 %v10789_v0 }
 0x119   : > { %2299 = vmatprep.subr.mxu0 %v11127_v44  ;;  %1936 = vmatprep.mubr.f32.mxu0 %v10789_v0 }
 0x11b   : > { %1853 = vmatmul.mubr.f32.gmra.mxu1 %v10976_v45  ;;  %1938 = vmatmul.mubr.f32.gmra.mxu0 %v10929_v17 }
 0x11c   : > { %1943 = vmatprep.mubr.f32.mxu0 %v10789_v0  ;;  %2024 = vmatprep.mubr.f32.mxu1 %v10789_v0 }
 0x11f   : > { %1945 = vmatmul.mubr.f32.gmra.mxu0 %v10935_v20  ;;  %2026 = vmatmul.mubr.f32.vlgmr.msra.gmra.mxu1 %v10920_v13 }
 0x120   : > { %2205 = vmatpush1.msra.mxu1 %v2204_v4  ;;  %1950 = vmatprep.mubr.f32.mxu0 %v10789_v0 }
 0x121   : > { %2399 = vmatprep.subr.mxu1 %v11118_v42  ;;  %2031 = vmatprep.mubr.f32.mxu1 %v10789_v0 }
 0x123   : > { %1952 = vmatmul.mubr.f32.gmra.mxu0 %v10955_v31  ;;  %2033 = vmatmul.mubr.f32.gmra.mxu1 %v10929_v17 }
 0x124   : > { %2038 = vmatprep.mubr.f32.mxu1 %v10789_v0  ;;  %2119 = vmatprep.mubr.f32.mxu0 %v10789_v0 }
 0x127   : > { %2040 = vmatmul.mubr.f32.gmra.mxu1 %v10935_v20  ;;  %2125 = vmatmul.mubr.f32.vlgmr.msra.gmra.mxu0 %v10962_v37  ;;  %v2855_v37 = vand.u32 4294901760, %v11225_v9 }
 0x128   : > { %2302 = vmatpush1.msra.mxu0 %v11164_v1  ;;  %2045 = vmatprep.mubr.f32.mxu1 %v10789_v0 }
 0x129   : > { %2504 = vmatprep.subr.mxu0 %v2196_v46  ;;  %2130 = vmatprep.mubr.f32.mxu0 %v10789_v0 }
 0x12b   : > { %2047 = vmatmul.mubr.f32.gmra.mxu1 %v10955_v31  ;;  %2136 = vmatmul.mubr.f32.gmra.mxu0 %v10971_v43  ;;  %v2666_v43 = vpop.permute.xlu1 %2665 }
 0x12c   : > { %2141 = vmatprep.mubr.f32.mxu0 %v10789_v0  ;;  %2238 = vmatprep.mubr.f32.mxu1 %v10789_v0  ;;  %v2684_v51 = vsel %vm2683_vm2, %v2666_v43, %v2668_v6 }
 0x12d   : > { %v11243_v53 = vand.u32 4294901760, %v2684_v51 }
 0x12f   : > { %2147 = vmatmul.mubr.f32.gmra.mxu0 %v10984_v52  ;;  %2240 = vmatmul.mubr.f32.vlgmr.msra.gmra.mxu1 %v10920_v13  ;;  %v2856_v52 = vsub.f32 %v11225_v9, %v2855_v37  ;;  %v11253_v55 = vsub.f32 %v2684_v51, %v11243_v53  ;;  %v11342_v28 = vpop.permute.xlu1 %2673 }
 0x130   : > { %2401 = vmatpush1.msra.mxu1 %v11152_v50  ;;  %2152 = vmatprep.mubr.f32.mxu0 %v10789_v0  ;;  %v2687_v32 = vsel %vm2683_vm2, %v2672_v29, %v11342_v28 }
 0x131   : > { %2601 = vmatprep.subr.mxu1 %v11118_v42  ;;  %2245 = vmatprep.mubr.f32.mxu1 %v10789_v0  ;;  %v11359_v40 = vand.u32 4294901760, %v2687_v32 }
 0x133   : > { %2158 = vmatmul.mubr.f32.gmra.mxu0 %v10993_v56  ;;  %2247 = vmatmul.mubr.f32.gmra.mxu1 %v10929_v17  ;;  %v152_v56 = vld [vmem:[%s13241_s0 + $0x8] sm:$0xff]  ;;  %v11370_v48 = vsub.f32 %v2687_v32, %v11359_v40 }
 0x134   : > { %2252 = vmatprep.mubr.f32.mxu1 %v10789_v0  ;;  %2335 = vmatprep.mubr.f32.mxu0 %v10789_v0  ;;  %v2704_v57 = vsel %vm204_vm0, %v152_v56, 0  ;;  %v2686_v56 = vsel %vm2683_vm2, %v11203_v5, %v2672_v29 }
 0x135   : > { %v3467_v6 = vand.u32 4294901760, %v11370_v48 }
 0x137   : > { %2254 = vmatmul.mubr.f32.gmra.mxu1 %v10935_v20  ;;  %2338 = vmatmul.mubr.f32.vlgmr.msra.gmra.mxu0 %v10927_v16  ;;  %v2857_v16 = vand.u32 4294901760, %v2856_v52 }
 0x138   : > { %2508 = vmatpush1.msra.mxu0 %v2202_v2  ;;  %2259 = vmatprep.mubr.f32.mxu1 %v10789_v0 }
 0x139   : > { %2343 = vmatprep.mubr.f32.mxu0 %v10789_v0  ;;  %2743 = vmatprep.subr.mxu0 %v11216_v8 }
 0x13b   : > { %2261 = vmatmul.mubr.f32.gmra.mxu1 %v10955_v31  ;;  %2346 = vmatmul.mubr.f32.gmra.mxu0 %v10941_v22  ;;  %v2701_v22 = vsel %vm204_vm0, %v151_v54, 0 }
 0x13c   : > { %2351 = vmatprep.mubr.f32.mxu0 %v10789_v0  ;;  %2434 = vmatprep.mubr.f32.mxu1 %v10789_v0 }
 0x13f   : > { %2354 = vmatmul.mubr.f32.gmra.mxu0 %v10946_v27  ;;  %2438 = vmatmul.mubr.f32.vlgmr.msra.gmra.mxu1 %v10938_v21  ;;  %v11264_v21 = vand.u32 4294901760, %v2701_v22  ;;  %v2861_v27 = vand.u32 4294901760, %v11253_v55 }
 0x140   : > { %2603 = vmatpush1.msra.mxu1 %v11152_v50  ;;  %2359 = vmatprep.mubr.f32.mxu0 %v10789_v0 }
 0x141   : > { %2443 = vmatprep.mubr.f32.mxu1 %v10789_v0  ;;  %2858 = vmatprep.subr.mxu1 %v2857_v16  ;;  %v2862_v59 = vsub.f32 %v11253_v55, %v2861_v27  ;;  %v3468_v16 = vsub.f32 %v11370_v48, %v3467_v6 }
 0x143   : > { %2362 = vmatmul.mubr.f32.gmra.mxu0 %v10967_v39  ;;  %2447 = vmatmul.mubr.f32.gmra.mxu1 %v10953_v30  ;;  %v11276_v30 = vsub.f32 %v2701_v22, %v11264_v21  ;;  %v11278_v39 = vand.u32 4294901760, %v2704_v57  ;;  %v2863_v10 = vand.u32 4294901760, %v2862_v59 }
 0x144   : > { %2452 = vmatprep.mubr.f32.mxu1 %v10789_v0  ;;  %2541 = vmatprep.mubr.f32.mxu0 %v10789_v0 }
 0x145   : > { %v11294_v61 = vand.u32 4294901760, %v11276_v30  ;;  %v11297_v62 = vsub.f32 %v2704_v57, %v11278_v39 }
 0x147   : > { %2456 = vmatmul.mubr.f32.gmra.mxu1 %v10960_v35  ;;  %2543 = vmatmul.mubr.f32.vlgmr.msra.gmra.mxu0 %v10920_v13  ;;  %v154_v35 = vld [vmem:[%s13241_s0 + $0x18] sm:$0xff]  ;;  %v11309_v12 = vand.u32 4294901760, %v11297_v62 }
 0x148   : > { %2745 = vmatpush1.msra.mxu0 %v11243_v53  ;;  %2461 = vmatprep.mubr.f32.mxu1 %v10789_v0  ;;  %v2710_v11 = vsel %vm204_vm0, %v154_v35, 0  ;;  %v3469_v35 = vand.u32 4294901760, %v3468_v16 }
 0x149   : > { %2958 = vmatprep.subr.mxu0 %v11225_v9  ;;  %2548 = vmatprep.mubr.f32.mxu0 %v10789_v0  ;;  %v11314_v15 = vand.u32 4294901760, %v2710_v11  ;;  %v2793_v18 = vsub.f32 %v11297_v62, %v11309_v12 }
 0x14b   : > { %2465 = vmatmul.mubr.f32.gmra.mxu1 %v10976_v45  ;;  %2550 = vmatmul.mubr.f32.gmra.mxu0 %v10929_v17  ;;  %v2782_v45 = vsub.f32 %v11276_v30, %v11294_v61  ;;  %v11329_v23 = vsub.f32 %v2710_v11, %v11314_v15 }
 0x14c   : > { %2555 = vmatprep.mubr.f32.mxu0 %v10789_v0  ;;  %2636 = vmatprep.mubr.f32.mxu1 %v10789_v0 }
 0x14d   : > { %v11340_v26 = vand.u32 4294901760, %v11329_v23 }
 0x14f   : > { %2557 = vmatmul.mubr.f32.gmra.mxu0 %v10935_v20  ;;  %2638 = vmatmul.mubr.f32.vlgmr.msra.gmra.mxu1 %v10920_v13  ;;  %v11321_v13 = vand.u32 4294901760, %v2782_v45  ;;  %v2815_v36 = vsub.f32 %v11329_v23, %v11340_v26 }
 0x150   : > { %2864 = vmatpush1.msra.mxu1 %v2863_v10  ;;  %2562 = vmatprep.mubr.f32.mxu0 %v10789_v0  ;;  %v11393_v10 = vand.u32 4294901760, %v2686_v56 }
 0x151   : > { %3058 = vmatprep.subr.mxu1 %v11216_v8  ;;  %2643 = vmatprep.mubr.f32.mxu1 %v10789_v0 }
 0x152   : > { %v11401_v32 = vsub.f32 %v2686_v56, %v11393_v10 }
 0x153   : > { %2564 = vmatmul.mubr.f32.gmra.mxu0 %v10955_v31  ;;  %2645 = vmatmul.mubr.f32.gmra.mxu1 %v10929_v17  ;;  %v11335_v17 = vand.u32 4294901760, %v2793_v18 }
 0x154   : > { %2650 = vmatprep.mubr.f32.mxu1 %v10789_v0  ;;  %2778 = vmatprep.mubr.f32.mxu0 %v10789_v0 }
 0x157   : > { %v290_v24 = vpop.f32.mrf.mxu0  ;;  %2652 = vmatmul.mubr.f32.gmra.mxu1 %v10935_v20  ;;  %2784 = vmatmul.mubr.f32.vlgmr.msra.gmra.mxu0 %v11321_v13 }
 0x158   : > { %2961 = vmatpush1.msra.mxu0 %v11253_v55  ;;  %2657 = vmatprep.mubr.f32.mxu1 %v10789_v0 }
 0x159   : > { %3163 = vmatprep.subr.mxu0 %v2855_v37  ;;  %v292_v20 = vpop.f32.mrf.mxu0  ;;  %2789 = vmatprep.mubr.f32.mxu0 %v10789_v0 }
 0x15b   : > { %v301_v33 = vpop.f32.mrf.mxu0  ;;  %2659 = vmatmul.mubr.f32.gmra.mxu1 %v10955_v31  ;;  %2795 = vmatmul.mubr.f32.gmra.mxu0 %v11335_v17  ;;  %v11363_v31 = vand.u32 4294901760, %v2815_v36 }
 0x15c   : > { %2800 = vmatprep.mubr.f32.mxu0 %v10789_v0  ;;  %2897 = vmatprep.mubr.f32.mxu1 %v10789_v0 }
 0x15d   : > { %v303_v38 = vpop.f32.mrf.mxu0 }
 0x15f   : > { %v312_v41 = vpop.f32.mrf.mxu0  ;;  %v405_v42 = vpop.f32.mrf.mxu1  ;;  %2806 = vmatmul.mubr.f32.gmra.mxu0 %v11353_v34  ;;  %2899 = vmatmul.mubr.f32.vlgmr.msra.gmra.mxu1 %v11264_v21 }
 0x160   : > { %v406_v44 = vadd.f32 %v405_v42, %v290_v24  ;;  %3060 = vmatpush1.msra.mxu1 %v11243_v53  ;;  %2811 = vmatprep.mubr.f32.mxu0 %v10789_v0 }
 0x161   : > { %3260 = vmatprep.subr.mxu1 %v11216_v8  ;;  %v314_v46 = vpop.f32.mrf.mxu0  ;;  %v407_v47 = vpop.f32.mrf.mxu1  ;;  %2904 = vmatprep.mubr.f32.mxu1 %v10789_v0 }
 0x162   : > { %v408_v49 = vadd.f32 %v407_v47, %v292_v20  ;;  %v3473_v47 = vand.u32 4294901760, %v11401_v32 }
 0x163   : > { %v323_v50 = vpop.f32.mrf.mxu0  ;;  %v412_v1 = vpop.f32.mrf.mxu1  ;;  %2817 = vmatmul.mubr.f32.gmra.mxu0 %v11363_v31  ;;  %2906 = vmatmul.mubr.f32.gmra.mxu1 %v11278_v39 }
 0x164   : > { %v413_v2 = vadd.f32 %v412_v1, %v301_v33  ;;  %2911 = vmatprep.mubr.f32.mxu1 %v10789_v0  ;;  %2994 = vmatprep.mubr.f32.mxu0 %v10789_v0 }
 0x165   : > { %v325_v3 = vpop.f32.mrf.mxu0  ;;  %v414_v4 = vpop.f32.mrf.mxu1 }
 0x166   : > { %v415_v7 = vadd.f32 %v414_v4, %v303_v38 }
 0x167   : > { %v419_v8 = vpop.f32.mrf.mxu1  ;;  %v503_v9 = vpop.f32.mrf.mxu0  ;;  %2913 = vmatmul.mubr.f32.gmra.mxu1 %v11299_v63  ;;  %2997 = vmatmul.mubr.f32.vlgmr.msra.gmra.mxu0 %v11276_v30 }
 0x168   : > { %v420_v37 = vadd.f32 %v419_v8, %v312_v41  ;;  %v504_v43 = vadd.f32 %v503_v9, %v406_v44  ;;  %3167 = vmatpush1.msra.mxu0 %v2861_v27  ;;  %2918 = vmatprep.mubr.f32.mxu1 %v10789_v0  ;;  %v3474_v9 = vsub.f32 %v11401_v32, %v3473_v47 }
 0x169   : > { %v421_v51 = vpop.f32.mrf.mxu1  ;;  %v505_v52 = vpop.f32.mrf.mxu0  ;;  %3002 = vmatprep.mubr.f32.mxu0 %v10789_v0  ;;  %3355 = vmatprep.subr.mxu0 %v11359_v40 }
 0x16a   : > { %v422_v54 = vadd.f32 %v421_v51, %v314_v46  ;;  %v506_v22 = vadd.f32 %v505_v52, %v408_v49 }
 0x16b   : > { %v426_v57 = vpop.f32.mrf.mxu1  ;;  %v511_v55 = vpop.f32.mrf.mxu0  ;;  %2920 = vmatmul.mubr.f32.gmra.mxu1 %v11314_v15  ;;  %3005 = vmatmul.mubr.f32.gmra.mxu0 %v11297_v62 }
 0x16c   : > { %v427_v27 = vadd.f32 %v426_v57, %v323_v50  ;;  %v512_v58 = vadd.f32 %v511_v55, %v413_v2  ;;  %3010 = vmatprep.mubr.f32.mxu0 %v10789_v0  ;;  %3093 = vmatprep.mubr.f32.mxu1 %v10789_v0 }
 0x16d   : > { %v428_v59 = vpop.f32.mrf.mxu1  ;;  %v513_v60 = vpop.f32.mrf.mxu0 }
 0x16e   : > { %v429_v11 = vadd.f32 %v428_v59, %v325_v3  ;;  %v514_v45 = vadd.f32 %v513_v60, %v415_v7 }
 0x16f   : > { %v519_v5 = vpop.f32.mrf.mxu0  ;;  %v603_v18 = vpop.f32.mrf.mxu1  ;;  %3013 = vmatmul.mubr.f32.gmra.mxu0 %v11312_v14  ;;  %3097 = vmatmul.mubr.f32.vlgmr.msra.gmra.mxu1 %v11294_v61 }
 0x170   : > { %v520_v24 = vadd.f32 %v519_v5, %v420_v37  ;;  %v604_v25 = vadd.f32 %v603_v18, %v504_v43  ;;  %3262 = vmatpush1.msra.mxu1 %v11243_v53  ;;  %3018 = vmatprep.mubr.f32.mxu0 %v10789_v0 }
 0x171   : > { %v521_v29 = vpop.f32.mrf.mxu0  ;;  %v605_v20 = vpop.f32.mrf.mxu1  ;;  %3102 = vmatprep.mubr.f32.mxu1 %v10789_v0  ;;  %3470 = vmatprep.subr.mxu1 %v3469_v35 }
 0x172   : > { %v522_v33 = vadd.f32 %v521_v29, %v422_v54  ;;  %v606_v36 = vadd.f32 %v605_v20, %v506_v22 }
 0x173   : > { %v527_v38 = vpop.f32.mrf.mxu0  ;;  %v612_v41 = vpop.f32.mrf.mxu1  ;;  %3021 = vmatmul.mubr.f32.gmra.mxu0 %v11329_v23  ;;  %3106 = vmatmul.mubr.f32.gmra.mxu1 %v11309_v12 }
 0x174   : > { %v528_v42 = vadd.f32 %v527_v38, %v427_v27  ;;  %v613_v53 = vadd.f32 %v612_v41, %v512_v58  ;;  %3111 = vmatprep.mubr.f32.mxu1 %v10789_v0  ;;  %3200 = vmatprep.mubr.f32.mxu0 %v10789_v0  ;;  %v3475_v27 = vand.u32 4294901760, %v3474_v9 }
 0x175   : > { %v529_v44 = vpop.f32.mrf.mxu0  ;;  %v614_v46 = vpop.f32.mrf.mxu1 }
 0x176   : > { %v530_v49 = vadd.f32 %v529_v44, %v429_v11  ;;  %v615_v50 = vadd.f32 %v614_v46, %v514_v45  ;;  %v2676_v46 = vpop.permute.xlu0 %2675 }
 0x177   : > { %v621_v1 = vpop.f32.mrf.mxu1  ;;  %v708_v2 = vpop.f32.mrf.mxu0  ;;  %3115 = vmatmul.mubr.f32.gmra.mxu1 %v11326_v19  ;;  %3202 = vmatmul.mubr.f32.vlgmr.msra.gmra.mxu0 %v11264_v21 }
 0x178   : > { %v622_v3 = vadd.f32 %v621_v1, %v520_v24  ;;  %v709_v4 = vadd.f32 %v708_v2, %v604_v25  ;;  %3357 = vmatpush1.msra.mxu0 %v11393_v10  ;;  %3120 = vmatprep.mubr.f32.mxu1 %v10789_v0 }
 0x179   : > { %3570 = vmatprep.subr.mxu0 %v11370_v48  ;;  %v623_v7 = vpop.f32.mrf.mxu1  ;;  %v710_v8 = vpop.f32.mrf.mxu0  ;;  %3207 = vmatprep.mubr.f32.mxu0 %v10789_v0 }
 0x17a   : > { %v624_v37 = vadd.f32 %v623_v7, %v522_v33  ;;  %v711_v43 = vadd.f32 %v710_v8, %v606_v36 }
 0x17b   : > { %v630_v51 = vpop.f32.mrf.mxu1  ;;  %v715_v52 = vpop.f32.mrf.mxu0  ;;  %3124 = vmatmul.mubr.f32.gmra.mxu1 %v11340_v26  ;;  %3209 = vmatmul.mubr.f32.gmra.mxu0 %v11278_v39 }
 0x17c   : > { %v631_v16 = vadd.f32 %v630_v51, %v528_v42  ;;  %v716_v54 = vadd.f32 %v715_v52, %v613_v53  ;;  %3214 = vmatprep.mubr.f32.mxu0 %v10789_v0  ;;  %3295 = vmatprep.mubr.f32.mxu1 %v10789_v0  ;;  %v11438_v42 = vpop.permute.xlu1 %2677 }
 0x17d   : > { %v632_v22 = vpop.f32.mrf.mxu1  ;;  %v717_v56 = vpop.f32.mrf.mxu0 }
 0x17e   : > { %v633_v57 = vadd.f32 %v632_v22, %v530_v49  ;;  %v718_v55 = vadd.f32 %v717_v56, %v615_v50 }
 0x17f   : > { %v722_v58 = vpop.f32.mrf.mxu0  ;;  %v803_v59 = vpop.f32.mrf.mxu1  ;;  %3216 = vmatmul.mubr.f32.gmra.mxu0 %v11299_v63  ;;  %3297 = vmatmul.mubr.f32.vlgmr.msra.gmra.mxu1 %v11264_v21 }
 0x180   : > { %v723_v60 = vadd.f32 %v722_v58, %v622_v3  ;;  %v11423_v35 = vadd.f32 %v803_v59, %v709_v4  ;;  %3476 = vmatpush1.msra.mxu1 %v3475_v27  ;;  %3221 = vmatprep.mubr.f32.mxu0 %v10789_v0  ;;  %v2689_v3 = vsel %vm2683_vm2, %v2676_v46, %v11438_v42 }
 0x181   : > { %3670 = vmatprep.subr.mxu1 %v11359_v40  ;;  %v724_v11 = vpop.f32.mrf.mxu0  ;;  %v805_v45 = vpop.f32.mrf.mxu1  ;;  %3302 = vmatprep.mubr.f32.mxu1 %v10789_v0  ;;  %v11459_v9 = vand.u32 4294901760, %v2689_v3 }
 0x182   : > { %v725_v5 = vadd.f32 %v724_v11, %v624_v37  ;;  %v11428_v18 = vadd.f32 %v805_v45, %v711_v43 }
 0x183   : > { %v729_v24 = vpop.f32.mrf.mxu0  ;;  %v810_v25 = vpop.f32.mrf.mxu1  ;;  %3223 = vmatmul.mubr.f32.gmra.mxu0 %v11314_v15  ;;  %3304 = vmatmul.mubr.f32.gmra.mxu1 %v11278_v39  ;;  %v11470_v22 = vsub.f32 %v2689_v3, %v11459_v9 }
 0x184   : > { %v730_v29 = vadd.f32 %v729_v24, %v631_v16  ;;  %v11432_v20 = vadd.f32 %v810_v25, %v716_v54  ;;  %3309 = vmatprep.mubr.f32.mxu1 %v10789_v0  ;;  %3390 = vmatprep.mubr.f32.mxu0 %v10789_v0 }
 0x185   : > { %v731_v33 = vpop.f32.mrf.mxu0  ;;  %v812_v36 = vpop.f32.mrf.mxu1  ;;  %v4079_v59 = vand.u32 4294901760, %v11470_v22 }
 0x186   : > { %v732_v38 = vadd.f32 %v731_v33, %v633_v57  ;;  %v11436_v41 = vadd.f32 %v812_v36, %v718_v55 }
 0x187   : > { %v817_v53 = vpop.f32.mrf.mxu1  ;;  %v902_v44 = vpop.f32.mrf.mxu0  ;;  %3311 = vmatmul.mubr.f32.gmra.mxu1 %v11299_v63  ;;  %3396 = vmatmul.mubr.f32.vlgmr.msra.gmra.mxu0 %v11321_v13  ;;  %v4080_v33 = vsub.f32 %v11470_v22, %v4079_v59 }
 0x188   : > { %v11442_v49 = vadd.f32 %v817_v53, %v723_v60  ;;  %3573 = vmatpush1.msra.mxu0 %v11401_v32  ;;  %3316 = vmatprep.mubr.f32.mxu1 %v10789_v0  ;;  %v2688_v53 = vsel %vm2683_vm2, %v11342_v28, %v2676_v46 }
 0x189   : > { %3775 = vmatprep.subr.mxu0 %v3467_v6  ;;  %v819_v50 = vpop.f32.mrf.mxu1  ;;  %v904_v1 = vpop.f32.mrf.mxu0  ;;  %3401 = vmatprep.mubr.f32.mxu0 %v10789_v0 }
 0x18a   : > { %v11449_v2 = vadd.f32 %v819_v50, %v725_v5 }
 0x18b   : > { %v824_v4 = vpop.f32.mrf.mxu1  ;;  %v913_v7 = vpop.f32.mrf.mxu0  ;;  %3318 = vmatmul.mubr.f32.gmra.mxu1 %v11314_v15  ;;  %3407 = vmatmul.mubr.f32.gmra.mxu0 %v11335_v17 }
 0x18c   : > { %v11455_v8 = vadd.f32 %v824_v4, %v730_v29  ;;  %3412 = vmatprep.mubr.f32.mxu0 %v10789_v0  ;;  %3509 = vmatprep.mubr.f32.mxu1 %v10789_v0  ;;  %v4081_v4 = vand.u32 4294901760, %v4080_v33 }
 0x18d   : > { %v826_v48 = vpop.f32.mrf.mxu1  ;;  %v915_v6 = vpop.f32.mrf.mxu0 }
 0x18e   : > { %v11461_v37 = vadd.f32 %v826_v48, %v732_v38 }
 0x18f   : > { %v924_v43 = vpop.f32.mrf.mxu0  ;;  %v1017_v51 = vpop.f32.mrf.mxu1  ;;  %3418 = vmatmul.mubr.f32.gmra.mxu0 %v11353_v34  ;;  %3511 = vmatmul.mubr.f32.vlgmr.msra.gmra.mxu1 %v11264_v21 }
 0x190   : > { %v1018_v52 = vadd.f32 %v1017_v51, %v902_v44  ;;  %3672 = vmatpush1.msra.mxu1 %v11393_v10  ;;  %3423 = vmatprep.mubr.f32.mxu0 %v10789_v0 }
 0x191   : > { %3872 = vmatprep.subr.mxu1 %v11359_v40  ;;  %v926_v16 = vpop.f32.mrf.mxu0  ;;  %v1019_v54 = vpop.f32.mrf.mxu1  ;;  %3516 = vmatprep.mubr.f32.mxu1 %v10789_v0 }
 0x192   : > { %v1020_v56 = vadd.f32 %v1019_v54, %v904_v1 }
 0x193   : > { %v935_v57 = vpop.f32.mrf.mxu0  ;;  %v1024_v55 = vpop.f32.mrf.mxu1  ;;  %3429 = vmatmul.mubr.f32.gmra.mxu0 %v11363_v31  ;;  %3518 = vmatmul.mubr.f32.gmra.mxu1 %v11278_v39 }
 0x194   : > { %v1025_v27 = vadd.f32 %v1024_v55, %v913_v7  ;;  %3523 = vmatprep.mubr.f32.mxu1 %v10789_v0  ;;  %3606 = vmatprep.mubr.f32.mxu0 %v10789_v0  ;;  %v11493_v7 = vand.u32 4294901760, %v2688_v53 }
 0x195   : > { %v937_v40 = vpop.f32.mrf.mxu0  ;;  %v1026_v58 = vpop.f32.mrf.mxu1 }
 0x196   : > { %v1027_v60 = vadd.f32 %v1026_v58, %v915_v6  ;;  %v11501_v54 = vsub.f32 %v2688_v53, %v11493_v7 }
 0x197   : > { %v1031_v11 = vpop.f32.mrf.mxu1  ;;  %v1115_v45 = vpop.f32.mrf.mxu0  ;;  %3525 = vmatmul.mubr.f32.gmra.mxu1 %v11299_v63  ;;  %3609 = vmatmul.mubr.f32.vlgmr.msra.gmra.mxu0 %v11276_v30 }
 0x198   : > { %v1032_v5 = vadd.f32 %v1031_v11, %v924_v43  ;;  %v1116_v24 = vadd.f32 %v1115_v45, %v1018_v52  ;;  %3779 = vmatpush1.msra.mxu0 %v3473_v47  ;;  %3530 = vmatprep.mubr.f32.mxu1 %v10789_v0  ;;  %v4085_v11 = vand.u32 4294901760, %v11501_v54 }
 0x199   : > { %v1033_v25 = vpop.f32.mrf.mxu1  ;;  %v1117_v29 = vpop.f32.mrf.mxu0  ;;  %3614 = vmatprep.mubr.f32.mxu0 %v10789_v0  ;;  %3967 = vmatprep.subr.mxu0 %v11459_v9 }
 0x19a   : > { %v1034_v36 = vadd.f32 %v1033_v25, %v926_v16  ;;  %v1118_v38 = vadd.f32 %v1117_v29, %v1020_v56  ;;  %v4086_v53 = vsub.f32 %v11501_v54, %v4085_v11 }
 0x19b   : > { %v1038_v44 = vpop.f32.mrf.mxu1  ;;  %v1123_v32 = vpop.f32.mrf.mxu0  ;;  %3532 = vmatmul.mubr.f32.gmra.mxu1 %v11314_v15  ;;  %3617 = vmatmul.mubr.f32.gmra.mxu0 %v11297_v62 }
 0x19c   : > { %v1039_v47 = vadd.f32 %v1038_v44, %v935_v57  ;;  %v1124_v50 = vadd.f32 %v1123_v32, %v1025_v27  ;;  %3622 = vmatprep.mubr.f32.mxu0 %v10789_v0  ;;  %3705 = vmatprep.mubr.f32.mxu1 %v10789_v0 }
 0x19d   : > { %v1040_v1 = vpop.f32.mrf.mxu1  ;;  %v1125_v3 = vpop.f32.mrf.mxu0 }
 0x19e   : > { %v1041_v48 = vadd.f32 %v1040_v1, %v937_v40  ;;  %v1126_v6 = vadd.f32 %v1125_v3, %v1027_v60 }
 0x19f   : > { %v1131_v28 = vpop.f32.mrf.mxu0  ;;  %v1215_v46 = vpop.f32.mrf.mxu1  ;;  %3625 = vmatmul.mubr.f32.gmra.mxu0 %v11312_v14  ;;  %3709 = vmatmul.mubr.f32.vlgmr.msra.gmra.mxu1 %v11294_v61 }
 0x1a0   : > { %v1132_v43 = vadd.f32 %v1131_v28, %v1032_v5  ;;  %v1216_v51 = vadd.f32 %v1215_v46, %v1116_v24  ;;  %3874 = vmatpush1.msra.mxu1 %v11393_v10  ;;  %3630 = vmatprep.mubr.f32.mxu0 %v10789_v0  ;;  %v4087_v46 = vand.u32 4294901760, %v4086_v53 }
 0x1a1   : > { %v1133_v52 = vpop.f32.mrf.mxu0  ;;  %v1217_v16 = vpop.f32.mrf.mxu1  ;;  %3714 = vmatprep.mubr.f32.mxu1 %v10789_v0  ;;  %4082 = vmatprep.subr.mxu1 %v4081_v4 }
 0x1a2   : > { %v1134_v56 = vadd.f32 %v1133_v52, %v1034_v36  ;;  %v1218_v57 = vadd.f32 %v1217_v16, %v1118_v38 }
 0x1a3   : > { %v1139_v55 = vpop.f32.mrf.mxu0  ;;  %v1224_v27 = vpop.f32.mrf.mxu1  ;;  %3633 = vmatmul.mubr.f32.gmra.mxu0 %v11329_v23  ;;  %3718 = vmatmul.mubr.f32.gmra.mxu1 %v11309_v12 }
 0x1a4   : > { %v1140_v40 = vadd.f32 %v1139_v55, %v1039_v47  ;;  %v1225_v10 = vadd.f32 %v1224_v27, %v1124_v50  ;;  %3723 = vmatprep.mubr.f32.mxu1 %v10789_v0  ;;  %3812 = vmatprep.mubr.f32.mxu0 %v10789_v0 }
 0x1a5   : > { %v1141_v58 = vpop.f32.mrf.mxu0  ;;  %v1226_v60 = vpop.f32.mrf.mxu1 }
 0x1a6   : > { %v1142_v45 = vadd.f32 %v1141_v58, %v1041_v48  ;;  %v1227_v5 = vadd.f32 %v1226_v60, %v1126_v6 }
 0x1a7   : > { %v1233_v24 = vpop.f32.mrf.mxu1  ;;  %v1320_v25 = vpop.f32.mrf.mxu0  ;;  %3727 = vmatmul.mubr.f32.gmra.mxu1 %v11326_v19  ;;  %3814 = vmatmul.mubr.f32.vlgmr.msra.gmra.mxu0 %v11264_v21 }
 0x1a8   : > { %v1234_v29 = vadd.f32 %v1233_v24, %v1132_v43  ;;  %v1321_v33 = vadd.f32 %v1320_v25, %v1216_v51  ;;  %3969 = vmatpush1.msra.mxu0 %v11493_v7  ;;  %3732 = vmatprep.mubr.f32.mxu1 %v10789_v0 }
 0x1a9   : > { %4182 = vmatprep.subr.mxu0 %v11470_v22  ;;  %v1235_v36 = vpop.f32.mrf.mxu1  ;;  %v1322_v38 = vpop.f32.mrf.mxu0  ;;  %3819 = vmatprep.mubr.f32.mxu0 %v10789_v0 }
 0x1aa   : > { %v1236_v44 = vadd.f32 %v1235_v36, %v1134_v56  ;;  %v1323_v32 = vadd.f32 %v1322_v38, %v1218_v57  ;;  %v2680_v38 = vpop.permute.xlu0 %2679 }
 0x1ab   : > { %v1242_v47 = vpop.f32.mrf.mxu1  ;;  %v1327_v50 = vpop.f32.mrf.mxu0  ;;  %3736 = vmatmul.mubr.f32.gmra.mxu1 %v11340_v26  ;;  %3821 = vmatmul.mubr.f32.gmra.mxu0 %v11278_v39 }
 0x1ac   : > { %v1243_v1 = vadd.f32 %v1242_v47, %v1140_v40  ;;  %v1328_v3 = vadd.f32 %v1327_v50, %v1225_v10  ;;  %3826 = vmatprep.mubr.f32.mxu0 %v10789_v0  ;;  %3907 = vmatprep.mubr.f32.mxu1 %v10789_v0 }
 0x1ad   : > { %v1244_v4 = vpop.f32.mrf.mxu1  ;;  %v1329_v48 = vpop.f32.mrf.mxu0 }
 0x1ae   : > { %v1245_v6 = vadd.f32 %v1244_v4, %v1142_v45  ;;  %v1330_v28 = vadd.f32 %v1329_v48, %v1227_v5 }
 0x1af   : > { %v1334_v43 = vpop.f32.mrf.mxu0  ;;  %v1415_v51 = vpop.f32.mrf.mxu1  ;;  %3828 = vmatmul.mubr.f32.gmra.mxu0 %v11299_v63  ;;  %3909 = vmatmul.mubr.f32.vlgmr.msra.gmra.mxu1 %v11264_v21 }
 0x1b0   : > { %v1335_v52 = vadd.f32 %v1334_v43, %v1234_v29  ;;  %v11523_v16 = vadd.f32 %v1415_v51, %v1321_v33  ;;  %4088 = vmatpush1.msra.mxu1 %v4087_v46  ;;  %3833 = vmatprep.mubr.f32.mxu0 %v10789_v0  ;;  %v2682_v29 = vpop.permute.xlu1 %2681 }
 0x1b1   : > { %4282 = vmatprep.subr.mxu1 %v11459_v9  ;;  %v1336_v56 = vpop.f32.mrf.mxu0  ;;  %v1417_v57 = vpop.f32.mrf.mxu1  ;;  %3914 = vmatprep.mubr.f32.mxu1 %v10789_v0  ;;  %v2691_v50 = vsel %vm2683_vm2, %v2680_v38, %v2682_v29 }
 0x1b2   : > { %v1337_v55 = vadd.f32 %v1336_v56, %v1236_v44  ;;  %v11528_v27 = vadd.f32 %v1417_v57, %v1323_v32  ;;  %v11556_v48 = vand.u32 4294901760, %v2691_v50 }
 0x1b3   : > { %v1341_v40 = vpop.f32.mrf.mxu0  ;;  %v1422_v10 = vpop.f32.mrf.mxu1  ;;  %3835 = vmatmul.mubr.f32.gmra.mxu0 %v11314_v15  ;;  %3916 = vmatmul.mubr.f32.gmra.mxu1 %v11278_v39 }
 0x1b4   : > { %v1342_v58 = vadd.f32 %v1341_v40, %v1243_v1  ;;  %v11532_v60 = vadd.f32 %v1422_v10, %v1328_v3  ;;  %3921 = vmatprep.mubr.f32.mxu1 %v10789_v0  ;;  %4002 = vmatprep.mubr.f32.mxu0 %v10789_v0  ;;  %v11567_v56 = vsub.f32 %v2691_v50, %v11556_v48 }
 0x1b5   : > { %v1343_v45 = vpop.f32.mrf.mxu0  ;;  %v1424_v5 = vpop.f32.mrf.mxu1 }
 0x1b6   : > { %v1344_v24 = vadd.f32 %v1343_v45, %v1245_v6  ;;  %v11536_v25 = vadd.f32 %v1424_v5, %v1330_v28  ;;  %v4691_v45 = vand.u32 4294901760, %v11567_v56 }
 0x1b7   : > { %v1429_v33 = vpop.f32.mrf.mxu1  ;;  %v1514_v36 = vpop.f32.mrf.mxu0  ;;  %3923 = vmatmul.mubr.f32.gmra.mxu1 %v11299_v63  ;;  %4008 = vmatmul.mubr.f32.vlgmr.msra.gmra.mxu0 %v11321_v13 }
 0x1b8   : > { %v11540_v53 = vadd.f32 %v1429_v33, %v1335_v52  ;;  %4185 = vmatpush1.msra.mxu0 %v11501_v54  ;;  %3928 = vmatprep.mubr.f32.mxu1 %v10789_v0  ;;  %v4692_v50 = vsub.f32 %v11567_v56, %v4691_v45 }
 0x1b9   : > { %4387 = vmatprep.subr.mxu0 %v4079_v59  ;;  %v1431_v44 = vpop.f32.mrf.mxu1  ;;  %v1516_v32 = vpop.f32.mrf.mxu0  ;;  %4013 = vmatprep.mubr.f32.mxu0 %v10789_v0 }
 0x1ba   : > { %v11547_v47 = vadd.f32 %v1431_v44, %v1337_v55 }
 0x1bb   : > { %v1436_v1 = vpop.f32.mrf.mxu1  ;;  %v1525_v3 = vpop.f32.mrf.mxu0  ;;  %3930 = vmatmul.mubr.f32.gmra.mxu1 %v11314_v15  ;;  %4019 = vmatmul.mubr.f32.gmra.mxu0 %v11335_v17 }
 0x1bc   : > { %v11552_v4 = vadd.f32 %v1436_v1, %v1342_v58  ;;  %4024 = vmatprep.mubr.f32.mxu0 %v10789_v0  ;;  %4121 = vmatprep.mubr.f32.mxu1 %v10789_v0 }
 0x1bd   : > { %v1438_v22 = vpop.f32.mrf.mxu1  ;;  %v1527_v59 = vpop.f32.mrf.mxu0 }
 0x1be   : > { %v11558_v6 = vadd.f32 %v1438_v22, %v1344_v24  ;;  %v2690_v22 = vsel %vm2683_vm2, %v11438_v42, %v2680_v38 }
 0x1bf   : > { %v1536_v28 = vpop.f32.mrf.mxu0  ;;  %v1629_v46 = vpop.f32.mrf.mxu1  ;;  %4030 = vmatmul.mubr.f32.gmra.mxu0 %v11353_v34  ;;  %4123 = vmatmul.mubr.f32.vlgmr.msra.gmra.mxu1 %v11264_v21 }
 0x1c0   : > { %v1630_v43 = vadd.f32 %v1629_v46, %v1514_v36  ;;  %4284 = vmatpush1.msra.mxu1 %v11493_v7  ;;  %4035 = vmatprep.mubr.f32.mxu0 %v10789_v0 }
 0x1c1   : > { %4484 = vmatprep.subr.mxu1 %v11459_v9  ;;  %v1538_v51 = vpop.f32.mrf.mxu0  ;;  %v1631_v52 = vpop.f32.mrf.mxu1  ;;  %4128 = vmatprep.mubr.f32.mxu1 %v10789_v0 }
 0x1c2   : > { %v1632_v57 = vadd.f32 %v1631_v52, %v1516_v32  ;;  %v4693_v52 = vand.u32 4294901760, %v4692_v50 }
 0x1c3   : > { %v1547_v55 = vpop.f32.mrf.mxu0  ;;  %v1636_v40 = vpop.f32.mrf.mxu1  ;;  %4041 = vmatmul.mubr.f32.gmra.mxu0 %v11363_v31  ;;  %4130 = vmatmul.mubr.f32.gmra.mxu1 %v11278_v39 }
 0x1c4   : > { %v1637_v10 = vadd.f32 %v1636_v40, %v1525_v3  ;;  %4135 = vmatprep.mubr.f32.mxu1 %v10789_v0  ;;  %4218 = vmatprep.mubr.f32.mxu0 %v10789_v0 }
 0x1c5   : > { %v1549_v9 = vpop.f32.mrf.mxu0  ;;  %v1638_v58 = vpop.f32.mrf.mxu1 }
 0x1c6   : > { %v1639_v5 = vadd.f32 %v1638_v58, %v1527_v59 }
 0x1c7   : > { %v1643_v24 = vpop.f32.mrf.mxu1  ;;  %v1727_v29 = vpop.f32.mrf.mxu0  ;;  %4137 = vmatmul.mubr.f32.gmra.mxu1 %v11299_v63  ;;  %4221 = vmatmul.mubr.f32.vlgmr.msra.gmra.mxu0 %v11276_v30 }
 0x1c8   : > { %v1644_v33 = vadd.f32 %v1643_v24, %v1536_v28  ;;  %v1728_v36 = vadd.f32 %v1727_v29, %v1630_v43  ;;  %4391 = vmatpush1.msra.mxu0 %v4085_v11  ;;  %4142 = vmatprep.mubr.f32.mxu1 %v10789_v0 }
 0x1c9   : > { %v1645_v44 = vpop.f32.mrf.mxu1  ;;  %v1729_v32 = vpop.f32.mrf.mxu0  ;;  %4226 = vmatprep.mubr.f32.mxu0 %v10789_v0  ;;  %4579 = vmatprep.subr.mxu0 %v11556_v48 }
 0x1ca   : > { %v1646_v1 = vadd.f32 %v1645_v44, %v1538_v51  ;;  %v1730_v3 = vadd.f32 %v1729_v32, %v1632_v57  ;;  %v11590_v51 = vand.u32 4294901760, %v2690_v22 }
 0x1cb   : > { %v1650_v59 = vpop.f32.mrf.mxu1  ;;  %v1735_v54 = vpop.f32.mrf.mxu0  ;;  %4144 = vmatmul.mubr.f32.gmra.mxu1 %v11314_v15  ;;  %4229 = vmatmul.mubr.f32.gmra.mxu0 %v11297_v62 }
 0x1cc   : > { %v1651_v11 = vadd.f32 %v1650_v59, %v1547_v55  ;;  %v1736_v28 = vadd.f32 %v1735_v54, %v1637_v10  ;;  %4234 = vmatprep.mubr.f32.mxu0 %v10789_v0  ;;  %4317 = vmatprep.mubr.f32.mxu1 %v10789_v0 }
 0x1cd   : > { %v1652_v46 = vpop.f32.mrf.mxu1  ;;  %v1737_v43 = vpop.f32.mrf.mxu0 }
 0x1ce   : > { %v1653_v57 = vadd.f32 %v1652_v46, %v1549_v9  ;;  %v1738_v40 = vadd.f32 %v1737_v43, %v1639_v5  ;;  %v11598_v9 = vsub.f32 %v2690_v22, %v11590_v51 }
 0x1cf   : > { %v1743_v42 = vpop.f32.mrf.mxu0  ;;  %v1827_v38 = vpop.f32.mrf.mxu1  ;;  %4237 = vmatmul.mubr.f32.gmra.mxu0 %v11312_v14  ;;  %4321 = vmatmul.mubr.f32.vlgmr.msra.gmra.mxu1 %v11294_v61 }
 0x1d0   : > { %v1744_v58 = vadd.f32 %v1743_v42, %v1644_v33  ;;  %v1828_v55 = vadd.f32 %v1827_v38, %v1728_v36  ;;  %4486 = vmatpush1.msra.mxu1 %v11493_v7  ;;  %4242 = vmatprep.mubr.f32.mxu0 %v10789_v0  ;;  %v4697_v59 = vand.u32 4294901760, %v11598_v9 }
 0x1d1   : > { %v1745_v10 = vpop.f32.mrf.mxu0  ;;  %v1829_v24 = vpop.f32.mrf.mxu1  ;;  %4326 = vmatprep.mubr.f32.mxu1 %v10789_v0  ;;  %4694 = vmatprep.subr.mxu1 %v4693_v52 }
 0x1d2   : > { %v1746_v5 = vadd.f32 %v1745_v10, %v1646_v1  ;;  %v1830_v29 = vadd.f32 %v1829_v24, %v1730_v3  ;;  %v4698_v52 = vsub.f32 %v11598_v9, %v4697_v59 }
 0x1d3   : > { %v1751_v44 = vpop.f32.mrf.mxu0  ;;  %v1836_v32 = vpop.f32.mrf.mxu1  ;;  %4245 = vmatmul.mubr.f32.gmra.mxu0 %v11329_v23  ;;  %4330 = vmatmul.mubr.f32.gmra.mxu1 %v11309_v12 }
 0x1d4   : > { %v1752_v33 = vadd.f32 %v1751_v44, %v1651_v11  ;;  %v1837_v7 = vadd.f32 %v1836_v32, %v1736_v28  ;;  %4335 = vmatprep.mubr.f32.mxu1 %v10789_v0  ;;  %4424 = vmatprep.mubr.f32.mxu0 %v10789_v0 }
 0x1d5   : > { %v1753_v36 = vpop.f32.mrf.mxu0  ;;  %v1838_v50 = vpop.f32.mrf.mxu1 }
 0x1d6   : > { %v1754_v22 = vadd.f32 %v1753_v36, %v1653_v57  ;;  %v1839_v54 = vadd.f32 %v1838_v50, %v1738_v40  ;;  %v4699_v36 = vand.u32 4294901760, %v4698_v52 }
 0x1d7   : > { %v1845_v1 = vpop.f32.mrf.mxu1  ;;  %v1932_v3 = vpop.f32.mrf.mxu0  ;;  %4339 = vmatmul.mubr.f32.gmra.mxu1 %v11326_v19  ;;  %4426 = vmatmul.mubr.f32.vlgmr.msra.gmra.mxu0 %v11264_v21 }
 0x1d8   : > { %v1846_v46 = vadd.f32 %v1845_v1, %v1744_v58  ;;  %v1933_v43 = vadd.f32 %v1932_v3, %v1828_v55  ;;  %4581 = vmatpush1.msra.mxu0 %v11590_v51  ;;  %4344 = vmatprep.mubr.f32.mxu1 %v10789_v0 }
 0x1d9   : > { %4794 = vmatprep.subr.mxu0 %v11567_v56  ;;  %v1847_v11 = vpop.f32.mrf.mxu1  ;;  %v1934_v28 = vpop.f32.mrf.mxu0  ;;  %4431 = vmatprep.mubr.f32.mxu0 %v10789_v0 }
 0x1da   : > { %v1848_v57 = vadd.f32 %v1847_v11, %v1746_v5  ;;  %v1935_v40 = vadd.f32 %v1934_v28, %v1830_v29 }
 0x1db   : > { %v1854_v42 = vpop.f32.mrf.mxu1  ;;  %v1939_v38 = vpop.f32.mrf.mxu0  ;;  %4348 = vmatmul.mubr.f32.gmra.mxu1 %v11340_v26  ;;  %4433 = vmatmul.mubr.f32.gmra.mxu0 %v11278_v39 }
 0x1dc   : > { %v1855_v58 = vadd.f32 %v1854_v42, %v1752_v33  ;;  %v1940_v55 = vadd.f32 %v1939_v38, %v1837_v7  ;;  %4438 = vmatprep.mubr.f32.mxu0 %v10789_v0  ;;  %4519 = vmatprep.mubr.f32.mxu1 %v10789_v0 }
 0x1dd   : > { %v1856_v10 = vpop.f32.mrf.mxu1  ;;  %v1941_v24 = vpop.f32.mrf.mxu0 }
 0x1de   : > { %v1857_v44 = vadd.f32 %v1856_v10, %v1754_v22  ;;  %v1942_v32 = vadd.f32 %v1941_v24, %v1839_v54 }
 0x1df   : > { %v1946_v50 = vpop.f32.mrf.mxu0  ;;  %v2027_v5 = vpop.f32.mrf.mxu1  ;;  %4440 = vmatmul.mubr.f32.gmra.mxu0 %v11299_v63  ;;  %4521 = vmatmul.mubr.f32.vlgmr.msra.gmra.mxu1 %v11264_v21 }
 0x1e0   : > { %v1947_v29 = vadd.f32 %v1946_v50, %v1846_v46  ;;  %v11620_v1 = vadd.f32 %v2027_v5, %v1933_v43  ;;  %4700 = vmatpush1.msra.mxu1 %v4699_v36  ;;  %4445 = vmatprep.mubr.f32.mxu0 %v10789_v0 }
 0x1e1   : > { %4894 = vmatprep.subr.mxu1 %v11556_v48  ;;  %v1948_v33 = vpop.f32.mrf.mxu0  ;;  %v2029_v7 = vpop.f32.mrf.mxu1  ;;  %4526 = vmatprep.mubr.f32.mxu1 %v10789_v0 }
 0x1e2   : > { %v1949_v22 = vadd.f32 %v1948_v33, %v1848_v57  ;;  %v11625_v54 = vadd.f32 %v2029_v7, %v1935_v40  ;;  %v11635_v57 = vpop.permute.xlu1 %5169 }
 0x1e3   : > { %v1953_v3 = vpop.f32.mrf.mxu0  ;;  %v2034_v11 = vpop.f32.mrf.mxu1  ;;  %4447 = vmatmul.mubr.f32.gmra.mxu0 %v11314_v15  ;;  %4528 = vmatmul.mubr.f32.gmra.mxu1 %v11278_v39 }
 0x1e4   : > { %v1954_v46 = vadd.f32 %v1953_v3, %v1855_v58  ;;  %v11629_v43 = vadd.f32 %v2034_v11, %v1940_v55  ;;  %4533 = vmatprep.mubr.f32.mxu1 %v10789_v0  ;;  %4614 = vmatprep.mubr.f32.mxu0 %v10789_v0  ;;  %v5168_v55 = vpop.permute.xlu0 %5167 }
 0x1e5   : > { %v1955_v28 = vpop.f32.mrf.mxu0  ;;  %v2036_v52 = vpop.f32.mrf.mxu1 }
 0x1e6   : > { %v1956_v42 = vadd.f32 %v1955_v28, %v1857_v44  ;;  %v11633_v38 = vadd.f32 %v2036_v52, %v1942_v32 }
 0x1e7   : > { %v2041_v40 = vpop.f32.mrf.mxu1  ;;  %v2126_v10 = vpop.f32.mrf.mxu0  ;;  %4535 = vmatmul.mubr.f32.gmra.mxu1 %v11299_v63  ;;  %4620 = vmatmul.mubr.f32.vlgmr.msra.gmra.mxu0 %v11321_v13  ;;  %v5185_v13 = vsel %vm5183_vm3, %v5168_v55, %v11635_v57 }
 0x1e8   : > { %v11639_v58 = vadd.f32 %v2041_v40, %v1947_v29  ;;  %4797 = vmatpush1.msra.mxu0 %v11598_v9  ;;  %4540 = vmatprep.mubr.f32.mxu1 %v10789_v0  ;;  %v11656_v29 = vand.u32 4294901760, %v5185_v13 }
 0x1e9   : > { %4999 = vmatprep.subr.mxu0 %v4691_v45  ;;  %v2043_v24 = vpop.f32.mrf.mxu1  ;;  %v2128_v44 = vpop.f32.mrf.mxu0  ;;  %4625 = vmatprep.mubr.f32.mxu0 %v10789_v0 }
 0x1ea   : > { %v11646_v32 = vadd.f32 %v2043_v24, %v1949_v22 }
 0x1eb   : > { %v2048_v36 = vpop.f32.mrf.mxu1  ;;  %v2137_v50 = vpop.f32.mrf.mxu0  ;;  %4542 = vmatmul.mubr.f32.gmra.mxu1 %v11314_v15  ;;  %4631 = vmatmul.mubr.f32.gmra.mxu0 %v11335_v17 }
 0x1ec   : > { %v11652_v5 = vadd.f32 %v2048_v36, %v1954_v46  ;;  %4636 = vmatprep.mubr.f32.mxu0 %v10789_v0  ;;  %4733 = vmatprep.mubr.f32.mxu1 %v10789_v0  ;;  %v11667_v46 = vsub.f32 %v5185_v13, %v11656_v29  ;;  %v5166_v36 = vpop.permute.xlu0 %5165 }
 0x1ed   : > { %v2050_v56 = vpop.f32.mrf.mxu1  ;;  %v2139_v45 = vpop.f32.mrf.mxu0 }
 0x1ee   : > { %v11658_v33 = vadd.f32 %v2050_v56, %v1956_v42 }
 0x1ef   : > { %v2148_v7 = vpop.f32.mrf.mxu0  ;;  %v2241_v22 = vpop.f32.mrf.mxu1  ;;  %4642 = vmatmul.mubr.f32.gmra.mxu0 %v11353_v34  ;;  %4735 = vmatmul.mubr.f32.vlgmr.msra.gmra.mxu1 %v11264_v21 }
 0x1f0   : > { %v2242_v3 = vadd.f32 %v2241_v22, %v2126_v10  ;;  %4896 = vmatpush1.msra.mxu1 %v11590_v51  ;;  %4647 = vmatprep.mubr.f32.mxu0 %v10789_v0  ;;  %v13245_v10 = vand.u32 4294901760, %v11667_v46 }
 0x1f1   : > { %5096 = vmatprep.subr.mxu1 %v11556_v48  ;;  %v2150_v17 = vpop.f32.mrf.mxu0  ;;  %v2243_v11 = vpop.f32.mrf.mxu1  ;;  %4740 = vmatprep.mubr.f32.mxu1 %v10789_v0 }
 0x1f2   : > { %v2244_v28 = vadd.f32 %v2243_v11, %v2128_v44  ;;  %v5356_v11 = vsub.f32 %v11667_v46, %v13245_v10 }
 0x1f3   : > { %v2159_v52 = vpop.f32.mrf.mxu0  ;;  %v2248_v42 = vpop.f32.mrf.mxu1  ;;  %4653 = vmatmul.mubr.f32.gmra.mxu0 %v11363_v31  ;;  %4742 = vmatmul.mubr.f32.gmra.mxu1 %v11278_v39 }
 0x1f4   : > { %v2249_v34 = vadd.f32 %v2248_v42, %v2137_v50  ;;  %4747 = vmatprep.mubr.f32.mxu1 %v10789_v0  ;;  %4830 = vmatprep.mubr.f32.mxu0 %v10789_v0 }
 0x1f5   : > { %v2161_v48 = vpop.f32.mrf.mxu0  ;;  %v2250_v40 = vpop.f32.mrf.mxu1 }
 0x1f6   : > { %v2251_v24 = vadd.f32 %v2250_v40, %v2139_v45  ;;  %v5184_v45 = vsel %vm5183_vm3, %v5166_v36, %v5168_v55 }
 0x1f7   : > { %v2255_v13 = vpop.f32.mrf.mxu1  ;;  %v2339_v56 = vpop.f32.mrf.mxu0  ;;  %4749 = vmatmul.mubr.f32.gmra.mxu1 %v11299_v63  ;;  %4833 = vmatmul.mubr.f32.vlgmr.msra.gmra.mxu0 %v11276_v30  ;;  %v11687_v40 = vand.u32 4294901760, %v5184_v45 }
 0x1f8   : > { %v2256_v31 = vadd.f32 %v2255_v13, %v2148_v7  ;;  %v2340_v44 = vadd.f32 %v2339_v56, %v2242_v3  ;;  %5003 = vmatpush1.msra.mxu0 %v4697_v59  ;;  %4754 = vmatprep.mubr.f32.mxu1 %v10789_v0  ;;  %v5357_v13 = vand.u32 4294901760, %v5356_v11 }
 0x1f9   : > { %v2257_v50 = vpop.f32.mrf.mxu1  ;;  %v2341_v22 = vpop.f32.mrf.mxu0  ;;  %4838 = vmatprep.mubr.f32.mxu0 %v10789_v0  ;;  %5243 = vmatprep.subr.mxu0 %v11656_v29 }
 0x1fa   : > { %v2258_v30 = vadd.f32 %v2257_v50, %v2150_v17  ;;  %v2342_v7 = vadd.f32 %v2341_v22, %v2244_v28  ;;  %v10603_v17 = vld [vmem:[%s13241_s0 + $0x40] sm:$0xff] }
 0x1fb   : > { %v2262_v3 = vpop.f32.mrf.mxu1  ;;  %v2347_v42 = vpop.f32.mrf.mxu0  ;;  %4756 = vmatmul.mubr.f32.gmra.mxu1 %v11314_v15  ;;  %4841 = vmatmul.mubr.f32.gmra.mxu0 %v11297_v62  ;;  %v11697_v62 = vsub.f32 %v5184_v45, %v11687_v40  ;;  %v5201_v11 = vsel %vm204_vm0, %v10603_v17, 0 }
 0x1fc   : > { %v2263_v9 = vadd.f32 %v2262_v3, %v2159_v52  ;;  %v2348_v59 = vadd.f32 %v2347_v42, %v2249_v34  ;;  %4846 = vmatprep.mubr.f32.mxu0 %v10789_v0  ;;  %4929 = vmatprep.mubr.f32.mxu1 %v10789_v0 }
 0x1fd   : > { %v2264_v55 = vpop.f32.mrf.mxu1  ;;  %v2349_v36 = vpop.f32.mrf.mxu0 }
 0x1fe   : > { %v2265_v28 = vadd.f32 %v2264_v55, %v2161_v48  ;;  %v2350_v56 = vadd.f32 %v2349_v36, %v2251_v24 }
 0x1ff   : > { %v2355_v50 = vpop.f32.mrf.mxu0  ;;  %v2439_v22 = vpop.f32.mrf.mxu1  ;;  %4849 = vmatmul.mubr.f32.gmra.mxu0 %v11312_v14  ;;  %4933 = vmatmul.mubr.f32.vlgmr.msra.gmra.mxu1 %v11294_v61  ;;  %v10604_v61 = vld [vmem:[%s13241_s0 + $0x48] sm:$0xff] }
 0x200   : > { %v2356_v52 = vadd.f32 %v2355_v50, %v2256_v31  ;;  %v2440_v34 = vadd.f32 %v2439_v22, %v2340_v44  ;;  %5098 = vmatpush1.msra.mxu1 %v11590_v51  ;;  %4854 = vmatprep.mubr.f32.mxu0 %v10789_v0  ;;  %v11708_v51 = vand.u32 4294901760, %v5201_v11  ;;  %v13244_v44 = vand.u32 4294901760, %v11697_v62 }
 0x201   : > { %v2357_v3 = vpop.f32.mrf.mxu0  ;;  %v2441_v48 = vpop.f32.mrf.mxu1  ;;  %4938 = vmatprep.mubr.f32.mxu1 %v10789_v0  ;;  %5358 = vmatprep.subr.mxu1 %v5357_v13  ;;  %v5204_v36 = vsel %vm204_vm0, %v10604_v61, 0 }
 0x202   : > { %v2358_v14 = vadd.f32 %v2357_v3, %v2258_v30  ;;  %v2442_v24 = vadd.f32 %v2441_v48, %v2342_v7  ;;  %v5362_v22 = vsub.f32 %v11697_v62, %v13244_v44 }
 0x203   : > { %v2363_v45 = vpop.f32.mrf.mxu0  ;;  %v2448_v31 = vpop.f32.mrf.mxu1  ;;  %4857 = vmatmul.mubr.f32.gmra.mxu0 %v11329_v23  ;;  %4942 = vmatmul.mubr.f32.gmra.mxu1 %v11309_v12  ;;  %v10605_v23 = vld [vmem:[%s13241_s0 + $0x50] sm:$0xff] }
 0x204   : > { %v2364_v42 = vadd.f32 %v2363_v45, %v2263_v9  ;;  %v2449_v55 = vadd.f32 %v2448_v31, %v2348_v59  ;;  %4947 = vmatprep.mubr.f32.mxu1 %v10789_v0  ;;  %5036 = vmatprep.mubr.f32.mxu0 %v10789_v0  ;;  %v11720_v9 = vsub.f32 %v5201_v11, %v11708_v51  ;;  %v11722_v59 = vand.u32 4294901760, %v5204_v36  ;;  %v10606_v11 = vld [vmem:[%s13241_s0 + $0x58] sm:$0xff] }
 0x205   : > { %v2365_v30 = vpop.f32.mrf.mxu0  ;;  %v2450_v7 = vpop.f32.mrf.mxu1 }
 0x206   : > { %v2366_v13 = vadd.f32 %v2365_v30, %v2265_v28  ;;  %v2451_v12 = vadd.f32 %v2450_v7, %v2350_v56  ;;  %v5207_v28 = vsel %vm204_vm0, %v10605_v23, 0  ;;  %v11738_v31 = vand.u32 4294901760, %v11720_v9 }
 0x207   : > { %v2457_v17 = vpop.f32.mrf.mxu1  ;;  %v2544_v50 = vpop.f32.mrf.mxu0  ;;  %4951 = vmatmul.mubr.f32.gmra.mxu1 %v11326_v19  ;;  %5038 = vmatmul.mubr.f32.vlgmr.msra.gmra.mxu0 %v11264_v21  ;;  %v11741_v30 = vsub.f32 %v5204_v36, %v11722_v59  ;;  %v11743_v7 = vand.u32 4294901760, %v5207_v28 }
 0x208   : > { %v2458_v3 = vadd.f32 %v2457_v17, %v2356_v52  ;;  %v2545_v48 = vadd.f32 %v2544_v50, %v2440_v34  ;;  %5245 = vmatpush1.msra.mxu0 %v11687_v40  ;;  %4956 = vmatprep.mubr.f32.mxu1 %v10789_v0 }
 0x209   : > { %5458 = vmatprep.subr.mxu0 %v11667_v46  ;;  %v2459_v19 = vpop.f32.mrf.mxu1  ;;  %v2546_v56 = vpop.f32.mrf.mxu0  ;;  %5043 = vmatprep.mubr.f32.mxu0 %v10789_v0  ;;  %v11756_v36 = vsub.f32 %v5207_v28, %v11743_v7 }
 0x20a   : > { %v2460_v61 = vadd.f32 %v2459_v19, %v2358_v14  ;;  %v2547_v45 = vadd.f32 %v2546_v56, %v2442_v24  ;;  %v5363_v14 = vand.u32 4294901760, %v5362_v22  ;;  %v5210_v24 = vsel %vm204_vm0, %v10606_v11, 0 }
 0x20b   : > { %v2466_v52 = vpop.f32.mrf.mxu1  ;;  %v2551_v34 = vpop.f32.mrf.mxu0  ;;  %4960 = vmatmul.mubr.f32.gmra.mxu1 %v11340_v26  ;;  %5045 = vmatmul.mubr.f32.gmra.mxu0 %v11278_v39  ;;  %v11758_v22 = vand.u32 4294901760, %v5210_v24 }
 0x20c   : > { %v2467_v23 = vadd.f32 %v2466_v52, %v2364_v42  ;;  %v2552_v17 = vadd.f32 %v2551_v34, %v2449_v55  ;;  %5050 = vmatprep.mubr.f32.mxu0 %v10789_v0  ;;  %5131 = vmatprep.mubr.f32.mxu1 %v10789_v0  ;;  %v5282_v42 = vsub.f32 %v11720_v9, %v11738_v31  ;;  %v11753_v55 = vand.u32 4294901760, %v11741_v30 }
 0x20d   : > { %v2468_v26 = vpop.f32.mrf.mxu1  ;;  %v2553_v50 = vpop.f32.mrf.mxu0 }
 0x20e   : > { %v2469_v19 = vadd.f32 %v2468_v26, %v2366_v13  ;;  %v2554_v56 = vadd.f32 %v2553_v50, %v2451_v12 }
 0x20f   : > { %v2558_v44 = vpop.f32.mrf.mxu0  ;;  %v2639_v10 = vpop.f32.mrf.mxu1  ;;  %5052 = vmatmul.mubr.f32.gmra.mxu0 %v11299_v63  ;;  %5133 = vmatmul.mubr.f32.vlgmr.msra.gmra.mxu1 %v11264_v21 }
 0x210   : > { %v2559_v11 = vadd.f32 %v2558_v44, %v2458_v3  ;;  %v11760_v13 = vadd.f32 %v2639_v10, %v2545_v48  ;;  %5364 = vmatpush1.msra.mxu1 %v5363_v14  ;;  %5057 = vmatprep.mubr.f32.mxu0 %v10789_v0  ;;  %v11769_v10 = vand.u32 4294901760, %v5282_v42  ;;  %v5293_v44 = vsub.f32 %v11741_v30, %v11753_v55 }
 0x211   : > { %5558 = vmatprep.subr.mxu1 %v11656_v29  ;;  %v2560_v21 = vpop.f32.mrf.mxu0  ;;  %v2641_v12 = vpop.f32.mrf.mxu1  ;;  %5138 = vmatprep.mubr.f32.mxu1 %v10789_v0  ;;  %v11774_v3 = vand.u32 4294901760, %v11756_v36  ;;  %v11777_v48 = vsub.f32 %v5210_v24, %v11758_v22 }
 0x212   : > { %v2561_v52 = vadd.f32 %v2560_v21, %v2460_v61  ;;  %v11765_v34 = vadd.f32 %v2641_v12, %v2547_v45  ;;  %v11785_v21 = vpop.permute.xlu0 %5173 }
 0x213   : > { %v2565_v26 = vpop.f32.mrf.mxu0  ;;  %v2646_v28 = vpop.f32.mrf.mxu1  ;;  %5059 = vmatmul.mubr.f32.gmra.mxu0 %v11314_v15  ;;  %5140 = vmatmul.mubr.f32.gmra.mxu1 %v11278_v39  ;;  %v11794_v24 = vand.u32 4294901760, %v11777_v48 }
 0x214   : > { %13260 = vst [vmem:[#allocation5_spill] sm:$0xff] %v11765_v34  ;;  %v2566_v61 = vadd.f32 %v2565_v26, %v2467_v23  ;;  %v11779_v45 = vadd.f32 %v2646_v28, %v2552_v17  ;;  %5145 = vmatprep.mubr.f32.mxu1 %v10789_v0  ;;  %5278 = vmatprep.mubr.f32.mxu0 %v10789_v0  ;;  %v11789_v23 = vand.u32 4294901760, %v5293_v44  ;;  %v11796_v26 = vpop.permute.xlu1 %5171 }
 0x215   : > { %v2567_v14 = vpop.f32.mrf.mxu0  ;;  %v2648_v39 = vpop.f32.mrf.mxu1  ;;  %v5304_v17 = vsub.f32 %v11756_v36, %v11774_v3 }
 0x216   : > { %v2568_v50 = vadd.f32 %v2567_v14, %v2469_v19  ;;  %v11783_v42 = vadd.f32 %v2648_v39, %v2554_v56 }
 0x217   : > { %v2653_v12 = vpop.f32.mrf.mxu1  ;;  %v2785_v34 = vpop.f32.mrf.mxu0  ;;  %5147 = vmatmul.mubr.f32.gmra.mxu1 %v11299_v63  ;;  %5284 = vmatmul.mubr.f32.vlgmr.msra.gmra.mxu0 %v11769_v10  ;;  %v13262_v63 = vand.u32 4294901760, %v11667_v46  ;;  %v11814_v46 = vand.u32 4294901760, %v5304_v17 }
 0x218   : > { %v11798_v19 = vadd.f32 %v2653_v12, %v2559_v11  ;;  %v2786_v56 = vadd.f32 %v2785_v34, %v11423_v35  ;;  %5461 = vmatpush1.msra.mxu0 %v11697_v62  ;;  %5152 = vmatprep.mubr.f32.mxu1 %v10789_v0  ;;  %v5187_v11 = vsel %vm5183_vm3, %v11796_v26, %v11785_v21 }
 0x219   : > { %5663 = vmatprep.subr.mxu0 %v13262_v63  ;;  %v2655_v28 = vpop.f32.mrf.mxu1  ;;  %v2787_v44 = vpop.f32.mrf.mxu0  ;;  %5289 = vmatprep.mubr.f32.mxu0 %v10789_v0  ;;  %v5315_v12 = vsub.f32 %v11777_v48, %v11794_v24 }
 0x21a   : > { %13261 = vst [vmem:[#allocation6_spill] sm:$0xff] %v11798_v19  ;;  %v11806_v14 = vadd.f32 %v2655_v28, %v2561_v52  ;;  %v2788_v39 = vadd.f32 %v2787_v44, %v11428_v18  ;;  %v11823_v44 = vand.u32 4294901760, %v5187_v11 }
 0x21b   : > { %v2660_v35 = vpop.f32.mrf.mxu1  ;;  %v2796_v34 = vpop.f32.mrf.mxu0  ;;  %5154 = vmatmul.mubr.f32.gmra.mxu1 %v11314_v15  ;;  %5295 = vmatmul.mubr.f32.gmra.mxu0 %v11789_v23 }
 0x21c   : > { %13263 = vst [vmem:[#allocation7_spill] sm:$0xff] %v11806_v14  ;;  %v11818_v63 = vadd.f32 %v2660_v35, %v2566_v61  ;;  %v2797_v52 = vadd.f32 %v2796_v34, %v11432_v20  ;;  %5300 = vmatprep.mubr.f32.mxu0 %v10789_v0  ;;  %5397 = vmatprep.mubr.f32.mxu1 %v10789_v0  ;;  %v11830_v61 = vand.u32 4294901760, %v5315_v12 }
 0x21d   : > { %v2662_v18 = vpop.f32.mrf.mxu1  ;;  %v2798_v28 = vpop.f32.mrf.mxu0 }
 0x21e   : > { %13264 = vst [vmem:[#allocation8_spill] sm:$0xff] %v11818_v63  ;;  %v11825_v15 = vadd.f32 %v2662_v18, %v2568_v50  ;;  %v2799_v17 = vadd.f32 %v2798_v28, %v11436_v41  ;;  %v11838_v41 = vsub.f32 %v5187_v11, %v11823_v44 }
 0x21f   : > { %v2807_v14 = vpop.f32.mrf.mxu0  ;;  %v2900_v19 = vpop.f32.mrf.mxu1  ;;  %5306 = vmatmul.mubr.f32.gmra.mxu0 %v11814_v46  ;;  %5399 = vmatmul.mubr.f32.vlgmr.msra.gmra.mxu1 %v11708_v51 }
 0x220   : > { %13265 = vst [vmem:[#allocation9_spill] sm:$0xff] %v11825_v15  ;;  %v2808_v20 = vadd.f32 %v2807_v14, %v11442_v49  ;;  %v2901_v35 = vadd.f32 %v2900_v19, %v2786_v56  ;;  %5560 = vmatpush1.msra.mxu1 %v11687_v40  ;;  %5311 = vmatprep.mubr.f32.mxu0 %v10789_v0  ;;  %v13246_v14 = vand.u32 4294901760, %v11838_v41 }
 0x221   : > { %5760 = vmatprep.subr.mxu1 %v11656_v29  ;;  %v2809_v50 = vpop.f32.mrf.mxu0  ;;  %v2902_v34 = vpop.f32.mrf.mxu1  ;;  %5404 = vmatprep.mubr.f32.mxu1 %v10789_v0 }
 0x222   : > { %v2810_v18 = vadd.f32 %v2809_v50, %v11449_v2  ;;  %v2903_v12 = vadd.f32 %v2902_v34, %v2788_v39 }
 0x223   : > { %v2818_v28 = vpop.f32.mrf.mxu0  ;;  %v2907_v15 = vpop.f32.mrf.mxu1  ;;  %5317 = vmatmul.mubr.f32.gmra.mxu0 %v11830_v61  ;;  %5406 = vmatmul.mubr.f32.gmra.mxu1 %v11722_v59 }
 0x224   : > { %v2819_v49 = vadd.f32 %v2818_v28, %v11455_v8  ;;  %v2908_v19 = vadd.f32 %v2907_v15, %v2797_v52  ;;  %5411 = vmatprep.mubr.f32.mxu1 %v10789_v0  ;;  %5494 = vmatprep.mubr.f32.mxu0 %v10789_v0  ;;  %v13266_v52 = vand.u32 4294901760, %v11697_v62 }
 0x225   : > { %v2820_v29 = vpop.f32.mrf.mxu0  ;;  %v2909_v56 = vpop.f32.mrf.mxu1 }
 0x226   : > { %v2821_v2 = vadd.f32 %v2820_v29, %v11461_v37  ;;  %v2910_v39 = vadd.f32 %v2909_v56, %v2799_v17  ;;  %v5968_v37 = vsub.f32 %v11838_v41, %v13246_v14 }
 0x227   : > { %v2914_v11 = vpop.f32.mrf.mxu1  ;;  %v2998_v50 = vpop.f32.mrf.mxu0  ;;  %5413 = vmatmul.mubr.f32.gmra.mxu1 %v11743_v7  ;;  %5497 = vmatmul.mubr.f32.vlgmr.msra.gmra.mxu0 %v11720_v9 }
 0x228   : > { %v2915_v34 = vadd.f32 %v2914_v11, %v2808_v20  ;;  %v2999_v8 = vadd.f32 %v2998_v50, %v2901_v35  ;;  %5667 = vmatpush1.msra.mxu0 %v13266_v52  ;;  %5418 = vmatprep.mubr.f32.mxu1 %v10789_v0  ;;  %v5186_v20 = vsel %vm5183_vm3, %v11635_v57, %v11796_v26 }
 0x229   : > { %v2916_v15 = vpop.f32.mrf.mxu1  ;;  %v3000_v28 = vpop.f32.mrf.mxu0  ;;  %5502 = vmatprep.mubr.f32.mxu0 %v10789_v0  ;;  %5855 = vmatprep.subr.mxu0 %v11823_v44 }
 0x22a   : > { %v2917_v17 = vadd.f32 %v2916_v15, %v2810_v18  ;;  %v3001_v29 = vadd.f32 %v3000_v28, %v2903_v12  ;;  %v5969_v18 = vand.u32 4294901760, %v5968_v37  ;;  %v11865_v12 = vand.u32 4294901760, %v5186_v20 }
 0x22b   : > { %v2921_v62 = vpop.f32.mrf.mxu1  ;;  %v3006_v35 = vpop.f32.mrf.mxu0  ;;  %5420 = vmatmul.mubr.f32.gmra.mxu1 %v11758_v22  ;;  %5505 = vmatmul.mubr.f32.gmra.mxu0 %v11741_v30 }
 0x22c   : > { %v2922_v56 = vadd.f32 %v2921_v62, %v2819_v49  ;;  %v3007_v11 = vadd.f32 %v3006_v35, %v2908_v19  ;;  %5510 = vmatprep.mubr.f32.mxu0 %v10789_v0  ;;  %5593 = vmatprep.mubr.f32.mxu1 %v10789_v0 }
 0x22d   : > { %v2923_v50 = vpop.f32.mrf.mxu1  ;;  %v3008_v52 = vpop.f32.mrf.mxu0 }
 0x22e   : > { %v2924_v15 = vadd.f32 %v2923_v50, %v2821_v2  ;;  %v3009_v28 = vadd.f32 %v3008_v52, %v2910_v39  ;;  %v11873_v2 = vsub.f32 %v5186_v20, %v11865_v12 }
 0x22f   : > { %v3014_v57 = vpop.f32.mrf.mxu0  ;;  %v3098_v26 = vpop.f32.mrf.mxu1  ;;  %5513 = vmatmul.mubr.f32.gmra.mxu0 %v11756_v36  ;;  %5597 = vmatmul.mubr.f32.vlgmr.msra.gmra.mxu1 %v11738_v31 }
 0x230   : > { %v3015_v14 = vadd.f32 %v3014_v57, %v2915_v34  ;;  %v3099_v49 = vadd.f32 %v3098_v26, %v2999_v8  ;;  %5762 = vmatpush1.msra.mxu1 %v11687_v40  ;;  %5518 = vmatprep.mubr.f32.mxu0 %v10789_v0 }
 0x231   : > { %v3016_v19 = vpop.f32.mrf.mxu0  ;;  %v3100_v62 = vpop.f32.mrf.mxu1  ;;  %5602 = vmatprep.mubr.f32.mxu1 %v10789_v0  ;;  %5970 = vmatprep.subr.mxu1 %v5969_v18  ;;  %v13247_v18 = vand.u32 4294901760, %v11873_v2 }
 0x232   : > { %v3017_v39 = vadd.f32 %v3016_v19, %v2917_v17  ;;  %v3101_v37 = vadd.f32 %v3100_v62, %v3001_v29 }
 0x233   : > { %v3022_v35 = vpop.f32.mrf.mxu0  ;;  %v3107_v50 = vpop.f32.mrf.mxu1  ;;  %5521 = vmatmul.mubr.f32.gmra.mxu0 %v11777_v48  ;;  %5606 = vmatmul.mubr.f32.gmra.mxu1 %v11753_v55 }
 0x234   : > { %v3023_v34 = vadd.f32 %v3022_v35, %v2922_v56  ;;  %v3108_v40 = vadd.f32 %v3107_v50, %v3007_v11  ;;  %5611 = vmatprep.mubr.f32.mxu1 %v10789_v0  ;;  %5700 = vmatprep.mubr.f32.mxu0 %v10789_v0 }
 0x235   : > { %v3024_v8 = vpop.f32.mrf.mxu0  ;;  %v3109_v52 = vpop.f32.mrf.mxu1 }
 0x236   : > { %v3025_v20 = vadd.f32 %v3024_v8, %v2924_v15  ;;  %v3110_v57 = vadd.f32 %v3109_v52, %v3009_v28  ;;  %v5974_v15 = vsub.f32 %v11873_v2, %v13247_v18 }
 0x237   : > { %v3116_v17 = vpop.f32.mrf.mxu1  ;;  %v3203_v29 = vpop.f32.mrf.mxu0  ;;  %5615 = vmatmul.mubr.f32.gmra.mxu1 %v11774_v3  ;;  %5702 = vmatmul.mubr.f32.vlgmr.msra.gmra.mxu0 %v11708_v51 }
 0x238   : > { %v3117_v26 = vadd.f32 %v3116_v17, %v3015_v14  ;;  %v3204_v19 = vadd.f32 %v3203_v29, %v3099_v49  ;;  %5857 = vmatpush1.msra.mxu0 %v11865_v12  ;;  %5620 = vmatprep.mubr.f32.mxu1 %v10789_v0  ;;  %v5975_v63 = vand.u32 4294901760, %v5974_v15 }
 0x239   : > { %6070 = vmatprep.subr.mxu0 %v11838_v41  ;;  %v3118_v56 = vpop.f32.mrf.mxu1  ;;  %v3205_v11 = vpop.f32.mrf.mxu0  ;;  %5707 = vmatprep.mubr.f32.mxu0 %v10789_v0 }
 0x23a   : > { %v3119_v28 = vadd.f32 %v3118_v56, %v3017_v39  ;;  %v3206_v62 = vadd.f32 %v3205_v11, %v3101_v37 }
 0x23b   : > { %v3125_v35 = vpop.f32.mrf.mxu1  ;;  %v3210_v50 = vpop.f32.mrf.mxu0  ;;  %5624 = vmatmul.mubr.f32.gmra.mxu1 %v11794_v24  ;;  %5709 = vmatmul.mubr.f32.gmra.mxu0 %v11722_v59 }
 0x23c   : > { %v3126_v14 = vadd.f32 %v3125_v35, %v3023_v34  ;;  %v3211_v49 = vadd.f32 %v3210_v50, %v3108_v40  ;;  %5714 = vmatprep.mubr.f32.mxu0 %v10789_v0  ;;  %5795 = vmatprep.mubr.f32.mxu1 %v10789_v0 }
 0x23d   : > { %v3127_v8 = vpop.f32.mrf.mxu1  ;;  %v3212_v52 = vpop.f32.mrf.mxu0 }
 0x23e   : > { %v3128_v17 = vadd.f32 %v3127_v8, %v3025_v20  ;;  %v3213_v29 = vadd.f32 %v3212_v52, %v3110_v57 }
 0x23f   : > { %v3217_v18 = vpop.f32.mrf.mxu0  ;;  %v3298_v39 = vpop.f32.mrf.mxu1  ;;  %5716 = vmatmul.mubr.f32.gmra.mxu0 %v11743_v7  ;;  %5797 = vmatmul.mubr.f32.vlgmr.msra.gmra.mxu1 %v11708_v51 }
 0x240   : > { %v3218_v37 = vadd.f32 %v3217_v18, %v3117_v26  ;;  %v11895_v56 = vadd.f32 %v3298_v39, %v3204_v19  ;;  %5976 = vmatpush1.msra.mxu1 %v5975_v63  ;;  %5721 = vmatprep.mubr.f32.mxu0 %v10789_v0 }
 0x241   : > { %6170 = vmatprep.subr.mxu1 %v11823_v44  ;;  %v3219_v34 = vpop.f32.mrf.mxu0  ;;  %v3300_v40 = vpop.f32.mrf.mxu1  ;;  %5802 = vmatprep.mubr.f32.mxu1 %v10789_v0 }
 0x242   : > { %v3220_v20 = vadd.f32 %v3219_v34, %v3119_v28  ;;  %v11900_v57 = vadd.f32 %v3300_v40, %v3206_v62  ;;  %v11910_v28 = vpop.permute.xlu0 %5177 }
 0x243   : > { %v3224_v11 = vpop.f32.mrf.mxu0  ;;  %v3305_v15 = vpop.f32.mrf.mxu1  ;;  %5723 = vmatmul.mubr.f32.gmra.mxu0 %v11758_v22  ;;  %5804 = vmatmul.mubr.f32.gmra.mxu1 %v11722_v59 }
 0x244   : > { %v3225_v18 = vadd.f32 %v3224_v11, %v3126_v14  ;;  %v11904_v26 = vadd.f32 %v3305_v15, %v3211_v49  ;;  %5809 = vmatprep.mubr.f32.mxu1 %v10789_v0  ;;  %5890 = vmatprep.mubr.f32.mxu0 %v10789_v0  ;;  %v11914_v14 = vpop.permute.xlu1 %5175 }
 0x245   : > { %v3226_v63 = vpop.f32.mrf.mxu0  ;;  %v3307_v19 = vpop.f32.mrf.mxu1 }
 0x246   : > { %v3227_v35 = vadd.f32 %v3226_v63, %v3128_v17  ;;  %v11908_v50 = vadd.f32 %v3307_v19, %v3213_v29  ;;  %v13267_v17 = vand.u32 4294901760, %v11838_v41 }
 0x247   : > { %v3312_v62 = vpop.f32.mrf.mxu1  ;;  %v3397_v8 = vpop.f32.mrf.mxu0  ;;  %5811 = vmatmul.mubr.f32.gmra.mxu1 %v11743_v7  ;;  %5896 = vmatmul.mubr.f32.vlgmr.msra.gmra.mxu0 %v11769_v10 }
 0x248   : > { %v11916_v49 = vadd.f32 %v3312_v62, %v3218_v37  ;;  %v3398_v52 = vadd.f32 %v3397_v8, %v11523_v16  ;;  %6073 = vmatpush1.msra.mxu0 %v11873_v2  ;;  %5816 = vmatprep.mubr.f32.mxu1 %v10789_v0  ;;  %v5189_v37 = vsel %vm5183_vm3, %v11914_v14, %v11910_v28 }
 0x249   : > { %6275 = vmatprep.subr.mxu0 %v13267_v17  ;;  %v3314_v29 = vpop.f32.mrf.mxu1  ;;  %v3399_v39 = vpop.f32.mrf.mxu0  ;;  %5901 = vmatprep.mubr.f32.mxu0 %v10789_v0  ;;  %v11937_v63 = vand.u32 4294901760, %v5189_v37 }
 0x24a   : > { %v11924_v34 = vadd.f32 %v3314_v29, %v3220_v20  ;;  %v3400_v40 = vadd.f32 %v3399_v39, %v11528_v27 }
 0x24b   : > { %v3319_v16 = vpop.f32.mrf.mxu1  ;;  %v3408_v11 = vpop.f32.mrf.mxu0  ;;  %5818 = vmatmul.mubr.f32.gmra.mxu1 %v11758_v22  ;;  %5907 = vmatmul.mubr.f32.gmra.mxu0 %v11789_v23 }
 0x24c   : > { %v11932_v41 = vadd.f32 %v3319_v16, %v3225_v18  ;;  %v3409_v15 = vadd.f32 %v3408_v11, %v11532_v60  ;;  %5912 = vmatprep.mubr.f32.mxu0 %v10789_v0  ;;  %6009 = vmatprep.mubr.f32.mxu1 %v10789_v0 }
 0x24d   : > { %v3321_v20 = vpop.f32.mrf.mxu1  ;;  %v3410_v27 = vpop.f32.mrf.mxu0 }
 0x24e   : > { %v11939_v19 = vadd.f32 %v3321_v20, %v3227_v35  ;;  %v3411_v62 = vadd.f32 %v3410_v27, %v11536_v25  ;;  %v11950_v25 = vsub.f32 %v5189_v37, %v11937_v63 }
 0x24f   : > { %v3419_v8 = vpop.f32.mrf.mxu0  ;;  %v3512_v17 = vpop.f32.mrf.mxu1  ;;  %5918 = vmatmul.mubr.f32.gmra.mxu0 %v11814_v46  ;;  %6011 = vmatmul.mubr.f32.vlgmr.msra.gmra.mxu1 %v11708_v51 }
 0x250   : > { %v3420_v60 = vadd.f32 %v3419_v8, %v11540_v53  ;;  %v3513_v18 = vadd.f32 %v3512_v17, %v3398_v52  ;;  %6172 = vmatpush1.msra.mxu1 %v11865_v12  ;;  %5923 = vmatprep.mubr.f32.mxu0 %v10789_v0  ;;  %v13248_v37 = vand.u32 4294901760, %v11950_v25 }
 0x251   : > { %6372 = vmatprep.subr.mxu1 %v11823_v44  ;;  %v3421_v29 = vpop.f32.mrf.mxu0  ;;  %v3514_v35 = vpop.f32.mrf.mxu1  ;;  %6016 = vmatprep.mubr.f32.mxu1 %v10789_v0 }
 0x252   : > { %v3422_v39 = vadd.f32 %v3421_v29, %v11547_v47  ;;  %v3515_v16 = vadd.f32 %v3514_v35, %v3400_v40 }
 0x253   : > { %v3430_v11 = vpop.f32.mrf.mxu0  ;;  %v3519_v20 = vpop.f32.mrf.mxu1  ;;  %5929 = vmatmul.mubr.f32.gmra.mxu0 %v11830_v61  ;;  %6018 = vmatmul.mubr.f32.gmra.mxu1 %v11722_v59 }
 0x254   : > { %v3431_v53 = vadd.f32 %v3430_v11, %v11552_v4  ;;  %v3520_v52 = vadd.f32 %v3519_v20, %v3409_v15  ;;  %6023 = vmatprep.mubr.f32.mxu1 %v10789_v0  ;;  %6106 = vmatprep.mubr.f32.mxu0 %v10789_v0  ;;  %v13268_v15 = vand.u32 4294901760, %v11873_v2 }
 0x255   : > { %v3432_v44 = vpop.f32.mrf.mxu0  ;;  %v3521_v27 = vpop.f32.mrf.mxu1 }
 0x256   : > { %v3433_v47 = vadd.f32 %v3432_v44, %v11558_v6  ;;  %v3522_v40 = vadd.f32 %v3521_v27, %v3411_v62  ;;  %v6580_v6 = vsub.f32 %v11950_v25, %v13248_v37 }
 0x257   : > { %v3526_v8 = vpop.f32.mrf.mxu1  ;;  %v3610_v17 = vpop.f32.mrf.mxu0  ;;  %6025 = vmatmul.mubr.f32.gmra.mxu1 %v11743_v7  ;;  %6109 = vmatmul.mubr.f32.vlgmr.msra.gmra.mxu0 %v11720_v9 }
 0x258   : > { %v3527_v29 = vadd.f32 %v3526_v8, %v3420_v60  ;;  %v3611_v4 = vadd.f32 %v3610_v17, %v3513_v18  ;;  %6279 = vmatpush1.msra.mxu0 %v13268_v15  ;;  %6030 = vmatprep.mubr.f32.mxu1 %v10789_v0  ;;  %v5188_v60 = vsel %vm5183_vm3, %v11785_v21, %v11914_v14 }
 0x259   : > { %v3528_v35 = vpop.f32.mrf.mxu1  ;;  %v3612_v11 = vpop.f32.mrf.mxu0  ;;  %6114 = vmatprep.mubr.f32.mxu0 %v10789_v0  ;;  %6467 = vmatprep.subr.mxu0 %v11937_v63 }
 0x25a   : > { %v3529_v62 = vadd.f32 %v3528_v35, %v3422_v39  ;;  %v3613_v20 = vadd.f32 %v3612_v11, %v3515_v16  ;;  %v6581_v39 = vand.u32 4294901760, %v6580_v6  ;;  %v11977_v16 = vand.u32 4294901760, %v5188_v60 }
 0x25b   : > { %v3533_v2 = vpop.f32.mrf.mxu1  ;;  %v3618_v18 = vpop.f32.mrf.mxu0  ;;  %6032 = vmatmul.mubr.f32.gmra.mxu1 %v11758_v22  ;;  %6117 = vmatmul.mubr.f32.gmra.mxu0 %v11741_v30 }
 0x25c   : > { %v3534_v44 = vadd.f32 %v3533_v2, %v3431_v53  ;;  %v3619_v27 = vadd.f32 %v3618_v18, %v3520_v52  ;;  %6122 = vmatprep.mubr.f32.mxu0 %v10789_v0  ;;  %6205 = vmatprep.mubr.f32.mxu1 %v10789_v0 }
 0x25d   : > { %v3535_v8 = vpop.f32.mrf.mxu1  ;;  %v3620_v17 = vpop.f32.mrf.mxu0 }
 0x25e   : > { %v3536_v15 = vadd.f32 %v3535_v8, %v3433_v47  ;;  %v3621_v35 = vadd.f32 %v3620_v17, %v3522_v40  ;;  %v11985_v47 = vsub.f32 %v5188_v60, %v11977_v16 }
 0x25f   : > { %v3626_v21 = vpop.f32.mrf.mxu0  ;;  %v3710_v14 = vpop.f32.mrf.mxu1  ;;  %6125 = vmatmul.mubr.f32.gmra.mxu0 %v11756_v36  ;;  %6209 = vmatmul.mubr.f32.vlgmr.msra.gmra.mxu1 %v11738_v31 }
 0x260   : > { %v3627_v11 = vadd.f32 %v3626_v21, %v3527_v29  ;;  %v3711_v53 = vadd.f32 %v3710_v14, %v3611_v4  ;;  %6374 = vmatpush1.msra.mxu1 %v11865_v12  ;;  %6130 = vmatprep.mubr.f32.mxu0 %v10789_v0 }
 0x261   : > { %v3628_v52 = vpop.f32.mrf.mxu0  ;;  %v3712_v2 = vpop.f32.mrf.mxu1  ;;  %6214 = vmatprep.mubr.f32.mxu1 %v10789_v0  ;;  %6582 = vmatprep.subr.mxu1 %v6581_v39  ;;  %v13249_v39 = vand.u32 4294901760, %v11985_v47 }
 0x262   : > { %v3629_v40 = vadd.f32 %v3628_v52, %v3529_v62  ;;  %v3713_v6 = vadd.f32 %v3712_v2, %v3613_v20 }
 0x263   : > { %v3634_v18 = vpop.f32.mrf.mxu0  ;;  %v3719_v8 = vpop.f32.mrf.mxu1  ;;  %6133 = vmatmul.mubr.f32.gmra.mxu0 %v11777_v48  ;;  %6218 = vmatmul.mubr.f32.gmra.mxu1 %v11753_v55 }
 0x264   : > { %v3635_v29 = vadd.f32 %v3634_v18, %v3534_v44  ;;  %v3720_v12 = vadd.f32 %v3719_v8, %v3619_v27  ;;  %6223 = vmatprep.mubr.f32.mxu1 %v10789_v0  ;;  %6312 = vmatprep.mubr.f32.mxu0 %v10789_v0 }
 0x265   : > { %v3636_v4 = vpop.f32.mrf.mxu0  ;;  %v3721_v17 = vpop.f32.mrf.mxu1 }
 0x266   : > { %v3637_v60 = vadd.f32 %v3636_v4, %v3536_v15  ;;  %v3722_v21 = vadd.f32 %v3721_v17, %v3621_v35  ;;  %v6586_v15 = vsub.f32 %v11985_v47, %v13249_v39 }
 0x267   : > { %v3728_v62 = vpop.f32.mrf.mxu1  ;;  %v3815_v20 = vpop.f32.mrf.mxu0  ;;  %6227 = vmatmul.mubr.f32.gmra.mxu1 %v11774_v3  ;;  %6314 = vmatmul.mubr.f32.vlgmr.msra.gmra.mxu0 %v11708_v51 }
 0x268   : > { %v3729_v14 = vadd.f32 %v3728_v62, %v3627_v11  ;;  %v3816_v52 = vadd.f32 %v3815_v20, %v3711_v53  ;;  %6469 = vmatpush1.msra.mxu0 %v11977_v16  ;;  %6232 = vmatprep.mubr.f32.mxu1 %v10789_v0  ;;  %v6587_v37 = vand.u32 4294901760, %v6586_v15 }
 0x269   : > { %6682 = vmatprep.subr.mxu0 %v11950_v25  ;;  %v3730_v44 = vpop.f32.mrf.mxu1  ;;  %v3817_v27 = vpop.f32.mrf.mxu0  ;;  %6319 = vmatprep.mubr.f32.mxu0 %v10789_v0 }
 0x26a   : > { %v3731_v35 = vadd.f32 %v3730_v44, %v3629_v40  ;;  %v3818_v2 = vadd.f32 %v3817_v27, %v3713_v6 }
 0x26b   : > { %v3737_v18 = vpop.f32.mrf.mxu1  ;;  %v3822_v8 = vpop.f32.mrf.mxu0  ;;  %6236 = vmatmul.mubr.f32.gmra.mxu1 %v11794_v24  ;;  %6321 = vmatmul.mubr.f32.gmra.mxu0 %v11722_v59 }
 0x26c   : > { %v3738_v11 = vadd.f32 %v3737_v18, %v3635_v29  ;;  %v3823_v53 = vadd.f32 %v3822_v8, %v3720_v12  ;;  %6326 = vmatprep.mubr.f32.mxu0 %v10789_v0  ;;  %6407 = vmatprep.mubr.f32.mxu1 %v10789_v0 }
 0x26d   : > { %v3739_v4 = vpop.f32.mrf.mxu1  ;;  %v3824_v17 = vpop.f32.mrf.mxu0 }
 0x26e   : > { %v3740_v62 = vadd.f32 %v3739_v4, %v3637_v60  ;;  %v3825_v20 = vadd.f32 %v3824_v17, %v3722_v21  ;;  %v12024_v17 = vpop.permute.xlu1 %5179 }
 0x26f   : > { %v3829_v39 = vpop.f32.mrf.mxu0  ;;  %v3910_v40 = vpop.f32.mrf.mxu1  ;;  %6328 = vmatmul.mubr.f32.gmra.mxu0 %v11743_v7  ;;  %6409 = vmatmul.mubr.f32.vlgmr.msra.gmra.mxu1 %v11708_v51 }
 0x270   : > { %v3830_v6 = vadd.f32 %v3829_v39, %v3729_v14  ;;  %v12007_v44 = vadd.f32 %v3910_v40, %v3816_v52  ;;  %6588 = vmatpush1.msra.mxu1 %v6587_v37  ;;  %6333 = vmatprep.mubr.f32.mxu0 %v10789_v0 }
 0x271   : > { %6782 = vmatprep.subr.mxu1 %v11937_v63  ;;  %v3831_v29 = vpop.f32.mrf.mxu0  ;;  %v3912_v12 = vpop.f32.mrf.mxu1  ;;  %6414 = vmatprep.mubr.f32.mxu1 %v10789_v0 }
 0x272   : > { %v3832_v60 = vadd.f32 %v3831_v29, %v3731_v35  ;;  %v12012_v21 = vadd.f32 %v3912_v12, %v3818_v2  ;;  %v5182_v35 = vpop.permute.xlu0 %5181 }
 0x273   : > { %v3836_v27 = vpop.f32.mrf.mxu0  ;;  %v3917_v15 = vpop.f32.mrf.mxu1  ;;  %6335 = vmatmul.mubr.f32.gmra.mxu0 %v11758_v22  ;;  %6416 = vmatmul.mubr.f32.gmra.mxu1 %v11722_v59 }
 0x274   : > { %v3837_v39 = vadd.f32 %v3836_v27, %v3738_v11  ;;  %v12016_v14 = vadd.f32 %v3917_v15, %v3823_v53  ;;  %6421 = vmatprep.mubr.f32.mxu1 %v10789_v0  ;;  %6502 = vmatprep.mubr.f32.mxu0 %v10789_v0 }
 0x275   : > { %v3838_v37 = vpop.f32.mrf.mxu0  ;;  %v3919_v52 = vpop.f32.mrf.mxu1 }
 0x276   : > { %v3839_v18 = vadd.f32 %v3838_v37, %v3740_v62  ;;  %v12020_v8 = vadd.f32 %v3919_v52, %v3825_v20  ;;  %v13269_v62 = vand.u32 4294901760, %v11950_v25 }
 0x277   : > { %v3924_v2 = vpop.f32.mrf.mxu1  ;;  %v4009_v4 = vpop.f32.mrf.mxu0  ;;  %6423 = vmatmul.mubr.f32.gmra.mxu1 %v11743_v7  ;;  %6508 = vmatmul.mubr.f32.vlgmr.msra.gmra.mxu0 %v11769_v10 }
 0x278   : > { %v12026_v11 = vadd.f32 %v3924_v2, %v3830_v6  ;;  %v4010_v53 = vadd.f32 %v4009_v4, %v11620_v1  ;;  %6685 = vmatpush1.msra.mxu0 %v11985_v47  ;;  %6428 = vmatprep.mubr.f32.mxu1 %v10789_v0  ;;  %v5191_v6 = vsel %vm5183_vm3, %v12024_v17, %v5182_v35 }
 0x279   : > { %6887 = vmatprep.subr.mxu0 %v13269_v62  ;;  %v3926_v20 = vpop.f32.mrf.mxu1  ;;  %v4011_v40 = vpop.f32.mrf.mxu0  ;;  %6513 = vmatprep.mubr.f32.mxu0 %v10789_v0 }
 0x27a   : > { %v12034_v29 = vadd.f32 %v3926_v20, %v3832_v60  ;;  %v4012_v12 = vadd.f32 %v4011_v40, %v11625_v54  ;;  %v12046_v54 = vand.u32 4294901760, %v5191_v6 }
 0x27b   : > { %v3931_v27 = vpop.f32.mrf.mxu1  ;;  %v4020_v1 = vpop.f32.mrf.mxu0  ;;  %6430 = vmatmul.mubr.f32.gmra.mxu1 %v11758_v22  ;;  %6519 = vmatmul.mubr.f32.gmra.mxu0 %v11789_v23 }
 0x27c   : > { %v12041_v15 = vadd.f32 %v3931_v27, %v3837_v39  ;;  %v4021_v25 = vadd.f32 %v4020_v1, %v11629_v43  ;;  %6524 = vmatprep.mubr.f32.mxu0 %v10789_v0  ;;  %6621 = vmatprep.mubr.f32.mxu1 %v10789_v0 }
 0x27d   : > { %v3933_v60 = vpop.f32.mrf.mxu1  ;;  %v4022_v37 = vpop.f32.mrf.mxu0 }
 0x27e   : > { %v12048_v52 = vadd.f32 %v3933_v60, %v3839_v18  ;;  %v4023_v35 = vadd.f32 %v4022_v37, %v11633_v38  ;;  %v12059_v38 = vsub.f32 %v5191_v6, %v12046_v54 }
 0x27f   : > { %v4031_v2 = vpop.f32.mrf.mxu0  ;;  %v4124_v4 = vpop.f32.mrf.mxu1  ;;  %6530 = vmatmul.mubr.f32.gmra.mxu0 %v11814_v46  ;;  %6623 = vmatmul.mubr.f32.vlgmr.msra.gmra.mxu1 %v11708_v51 }
 0x280   : > { %v4032_v43 = vadd.f32 %v4031_v2, %v11639_v58  ;;  %v4125_v39 = vadd.f32 %v4124_v4, %v4010_v53  ;;  %6784 = vmatpush1.msra.mxu1 %v11977_v16  ;;  %6535 = vmatprep.mubr.f32.mxu0 %v10789_v0  ;;  %v7191_v6 = vand.u32 4294901760, %v12059_v38 }
 0x281   : > { %6984 = vmatprep.subr.mxu1 %v11937_v63  ;;  %v4033_v62 = vpop.f32.mrf.mxu0  ;;  %v4126_v18 = vpop.f32.mrf.mxu1  ;;  %6628 = vmatprep.mubr.f32.mxu1 %v10789_v0 }
 0x282   : > { %v4034_v20 = vadd.f32 %v4033_v62, %v11646_v32  ;;  %v4127_v40 = vadd.f32 %v4126_v18, %v4012_v12 }
 0x283   : > { %v4042_v27 = vpop.f32.mrf.mxu0  ;;  %v4131_v1 = vpop.f32.mrf.mxu1  ;;  %6541 = vmatmul.mubr.f32.gmra.mxu0 %v11830_v61  ;;  %6630 = vmatmul.mubr.f32.gmra.mxu1 %v11722_v59 }
 0x284   : > { %v4043_v58 = vadd.f32 %v4042_v27, %v11652_v5  ;;  %v4132_v53 = vadd.f32 %v4131_v1, %v4021_v25  ;;  %6635 = vmatprep.mubr.f32.mxu1 %v10789_v0  ;;  %6718 = vmatprep.mubr.f32.mxu0 %v10789_v0  ;;  %v13270_v25 = vand.u32 4294901760, %v11985_v47 }
 0x285   : > { %v4044_v63 = vpop.f32.mrf.mxu0  ;;  %v4133_v60 = vpop.f32.mrf.mxu1 }
 0x286   : > { %v4045_v32 = vadd.f32 %v4044_v63, %v11658_v33  ;;  %v4134_v12 = vadd.f32 %v4133_v60, %v4023_v35  ;;  %v7192_v33 = vsub.f32 %v12059_v38, %v7191_v6 }
 0x287   : > { %v4138_v37 = vpop.f32.mrf.mxu1  ;;  %v4222_v2 = vpop.f32.mrf.mxu0  ;;  %6637 = vmatmul.mubr.f32.gmra.mxu1 %v11743_v7  ;;  %6721 = vmatmul.mubr.f32.vlgmr.msra.gmra.mxu0 %v11720_v9 }
 0x288   : > { %v4139_v4 = vadd.f32 %v4138_v37, %v4032_v43  ;;  %v4223_v5 = vadd.f32 %v4222_v2, %v4125_v39  ;;  %6891 = vmatpush1.msra.mxu0 %v13270_v25  ;;  %6642 = vmatprep.mubr.f32.mxu1 %v10789_v0  ;;  %v5190_v43 = vsel %vm5183_vm3, %v11910_v28, %v12024_v17 }
 0x289   : > { %v4140_v62 = vpop.f32.mrf.mxu1  ;;  %v4224_v18 = vpop.f32.mrf.mxu0  ;;  %6726 = vmatprep.mubr.f32.mxu0 %v10789_v0  ;;  %7079 = vmatprep.subr.mxu0 %v12046_v54 }
 0x28a   : > { %v4141_v35 = vadd.f32 %v4140_v62, %v4034_v20  ;;  %v4225_v27 = vadd.f32 %v4224_v18, %v4127_v40  ;;  %v7193_v20 = vand.u32 4294901760, %v7192_v33  ;;  %v12086_v40 = vand.u32 4294901760, %v5190_v43 }
 0x28b   : > { %v4145_v47 = vpop.f32.mrf.mxu1  ;;  %v4230_v39 = vpop.f32.mrf.mxu0  ;;  %6644 = vmatmul.mubr.f32.gmra.mxu1 %v11758_v22  ;;  %6729 = vmatmul.mubr.f32.gmra.mxu0 %v11741_v30 }
 0x28c   : > { %v4146_v1 = vadd.f32 %v4145_v47, %v4043_v58  ;;  %v4231_v63 = vadd.f32 %v4230_v39, %v4132_v53  ;;  %6734 = vmatprep.mubr.f32.mxu0 %v10789_v0  ;;  %6817 = vmatprep.mubr.f32.mxu1 %v10789_v0 }
 0x28d   : > { %v4147_v60 = vpop.f32.mrf.mxu1  ;;  %v4232_v37 = vpop.f32.mrf.mxu0 }
 0x28e   : > { %v4148_v2 = vadd.f32 %v4147_v60, %v4045_v32  ;;  %v4233_v25 = vadd.f32 %v4232_v37, %v4134_v12  ;;  %v12094_v32 = vsub.f32 %v5190_v43, %v12086_v40 }
 0x28f   : > { %v4238_v28 = vpop.f32.mrf.mxu0  ;;  %v4322_v17 = vpop.f32.mrf.mxu1  ;;  %6737 = vmatmul.mubr.f32.gmra.mxu0 %v11756_v36  ;;  %6821 = vmatmul.mubr.f32.vlgmr.msra.gmra.mxu1 %v11738_v31 }
 0x290   : > { %v4239_v62 = vadd.f32 %v4238_v28, %v4139_v4  ;;  %v4323_v58 = vadd.f32 %v4322_v17, %v4223_v5  ;;  %6986 = vmatpush1.msra.mxu1 %v11977_v16  ;;  %6742 = vmatprep.mubr.f32.mxu0 %v10789_v0  ;;  %v13250_v37 = vand.u32 4294901760, %v12094_v32 }
 0x291   : > { %v4240_v53 = vpop.f32.mrf.mxu0  ;;  %v4324_v18 = vpop.f32.mrf.mxu1  ;;  %6826 = vmatprep.mubr.f32.mxu1 %v10789_v0  ;;  %7194 = vmatprep.subr.mxu1 %v7193_v20 }
 0x292   : > { %v4241_v12 = vadd.f32 %v4240_v53, %v4141_v35  ;;  %v4325_v33 = vadd.f32 %v4324_v18, %v4225_v27 }
 0x293   : > { %v4246_v47 = vpop.f32.mrf.mxu0  ;;  %v4331_v39 = vpop.f32.mrf.mxu1  ;;  %6745 = vmatmul.mubr.f32.gmra.mxu0 %v11777_v48  ;;  %6830 = vmatmul.mubr.f32.gmra.mxu1 %v11753_v55 }
 0x294   : > { %v4247_v4 = vadd.f32 %v4246_v47, %v4146_v1  ;;  %v4332_v16 = vadd.f32 %v4331_v39, %v4231_v63  ;;  %6835 = vmatprep.mubr.f32.mxu1 %v10789_v0  ;;  %6924 = vmatprep.mubr.f32.mxu0 %v10789_v0 }
 0x295   : > { %v4248_v5 = vpop.f32.mrf.mxu0  ;;  %v4333_v60 = vpop.f32.mrf.mxu1 }
 0x296   : > { %v4249_v43 = vadd.f32 %v4248_v5, %v4148_v2  ;;  %v4334_v20 = vadd.f32 %v4333_v60, %v4233_v25  ;;  %v7198_v2 = vsub.f32 %v12094_v32, %v13250_v37 }
 0x297   : > { %v4340_v35 = vpop.f32.mrf.mxu1  ;;  %v4427_v27 = vpop.f32.mrf.mxu0  ;;  %6839 = vmatmul.mubr.f32.gmra.mxu1 %v11774_v3  ;;  %6926 = vmatmul.mubr.f32.vlgmr.msra.gmra.mxu0 %v11708_v51 }
 0x298   : > { %v4341_v28 = vadd.f32 %v4340_v35, %v4239_v62  ;;  %v4428_v17 = vadd.f32 %v4427_v27, %v4323_v58  ;;  %7081 = vmatpush1.msra.mxu0 %v12086_v40  ;;  %6844 = vmatprep.mubr.f32.mxu1 %v10789_v0  ;;  %v7199_v27 = vand.u32 4294901760, %v7198_v2 }
 0x299   : > { %7294 = vmatprep.subr.mxu0 %v12059_v38  ;;  %v4342_v1 = vpop.f32.mrf.mxu1  ;;  %v4429_v63 = vpop.f32.mrf.mxu0  ;;  %6931 = vmatprep.mubr.f32.mxu0 %v10789_v0 }
 0x29a   : > { %v4343_v25 = vadd.f32 %v4342_v1, %v4241_v12  ;;  %v4430_v53 = vadd.f32 %v4429_v63, %v4325_v33 }
 0x29b   : > { %v4349_v18 = vpop.f32.mrf.mxu1  ;;  %v4434_v47 = vpop.f32.mrf.mxu0  ;;  %6848 = vmatmul.mubr.f32.gmra.mxu1 %v11794_v24  ;;  %6933 = vmatmul.mubr.f32.gmra.mxu0 %v11722_v59 }
 0x29c   : > { %v4350_v62 = vadd.f32 %v4349_v18, %v4247_v4  ;;  %v4435_v58 = vadd.f32 %v4434_v47, %v4332_v16  ;;  %6938 = vmatprep.mubr.f32.mxu0 %v10789_v0  ;;  %7019 = vmatprep.mubr.f32.mxu1 %v10789_v0 }
 0x29d   : > { %v4351_v39 = vpop.f32.mrf.mxu1  ;;  %v4436_v5 = vpop.f32.mrf.mxu0 }
 0x29e   : > { %v4352_v60 = vadd.f32 %v4351_v39, %v4249_v43  ;;  %v4437_v35 = vadd.f32 %v4436_v5, %v4334_v20 }
 0x29f   : > { %v4441_v37 = vpop.f32.mrf.mxu0  ;;  %v4522_v12 = vpop.f32.mrf.mxu1  ;;  %6940 = vmatmul.mubr.f32.gmra.mxu0 %v11743_v7  ;;  %7021 = vmatmul.mubr.f32.vlgmr.msra.gmra.mxu1 %v11708_v51 }
 0x2a0   : > { %v4442_v33 = vadd.f32 %v4441_v37, %v4341_v28  ;;  %v12116_v1 = vadd.f32 %v4522_v12, %v4428_v17  ;;  %7200 = vmatpush1.msra.mxu1 %v7199_v27  ;;  %6945 = vmatprep.mubr.f32.mxu0 %v10789_v0  ;;  %v13272_v27 = vld [vmem:[#allocation5_spill] sm:$0xff] }
 0x2a1   : > { %7394 = vmatprep.subr.mxu1 %v12046_v54  ;;  %v4443_v4 = vpop.f32.mrf.mxu0  ;;  %v4524_v16 = vpop.f32.mrf.mxu1  ;;  %7026 = vmatprep.mubr.f32.mxu1 %v10789_v0 }
 0x2a2   : > { %v4444_v43 = vadd.f32 %v4443_v4, %v4343_v25  ;;  %v12121_v20 = vadd.f32 %v4524_v16, %v4430_v53 }
 0x2a3   : > { %v4448_v63 = vpop.f32.mrf.mxu0  ;;  %v4529_v2 = vpop.f32.mrf.mxu1  ;;  %6947 = vmatmul.mubr.f32.gmra.mxu0 %v11758_v22  ;;  %7028 = vmatmul.mubr.f32.gmra.mxu1 %v11722_v59 }
 0x2a4   : > { %v4449_v37 = vadd.f32 %v4448_v63, %v4350_v62  ;;  %v12125_v28 = vadd.f32 %v4529_v2, %v4435_v58  ;;  %7033 = vmatprep.mubr.f32.mxu1 %v10789_v0  ;;  %7114 = vmatprep.mubr.f32.mxu0 %v10789_v0 }
 0x2a5   : > { %v4450_v17 = vpop.f32.mrf.mxu0  ;;  %v4531_v18 = vpop.f32.mrf.mxu1 }
 0x2a6   : > { %v4451_v47 = vadd.f32 %v4450_v17, %v4352_v60  ;;  %v12129_v25 = vadd.f32 %v4531_v18, %v4437_v35 }
 0x2a7   : > { %v4536_v53 = vpop.f32.mrf.mxu1  ;;  %v4621_v39 = vpop.f32.mrf.mxu0  ;;  %7035 = vmatmul.mubr.f32.gmra.mxu1 %v11743_v7  ;;  %7120 = vmatmul.mubr.f32.vlgmr.msra.gmra.mxu0 %v11769_v10  ;;  %v7693_v10 = vld [vmem:[%s10866_s25 + $0x8] sm:$0xff] }
 0x2a8   : > { %v12133_v5 = vadd.f32 %v4536_v53, %v4442_v33  ;;  %v4622_v62 = vadd.f32 %v4621_v39, %v11760_v13  ;;  %7297 = vmatpush1.msra.mxu0 %v12094_v32  ;;  %7040 = vmatprep.mubr.f32.mxu1 %v10789_v0  ;;  %v13276_v39 = vld [vmem:[#allocation7_spill] sm:$0xff] }
 0x2a9   : > { %7499 = vmatprep.subr.mxu0 %v7191_v6  ;;  %v4538_v58 = vpop.f32.mrf.mxu1  ;;  %v4623_v60 = vpop.f32.mrf.mxu0  ;;  %7125 = vmatprep.mubr.f32.mxu0 %v10789_v0 }
 0x2aa   : > { %v12141_v35 = vadd.f32 %v4538_v58, %v4444_v43  ;;  %v4624_v12 = vadd.f32 %v4623_v60, %v13272_v27  ;;  %v12152_v43 = vand.u32 4294901760, %v7693_v10 }
 0x2ab   : > { %v4543_v33 = vpop.f32.mrf.mxu1  ;;  %v4632_v4 = vpop.f32.mrf.mxu0  ;;  %7042 = vmatmul.mubr.f32.gmra.mxu1 %v11758_v22  ;;  %7131 = vmatmul.mubr.f32.gmra.mxu0 %v11789_v23  ;;  %v13275_v23 = vld [vmem:[#allocation6_spill] sm:$0xff] }
 0x2ac   : > { %13271 = vst [vmem:[#allocation10_spill] sm:$0xff] %v12141_v35  ;;  %v12147_v13 = vadd.f32 %v4543_v33, %v4449_v37  ;;  %v4633_v38 = vadd.f32 %v4632_v4, %v11779_v45  ;;  %7136 = vmatprep.mubr.f32.mxu0 %v10789_v0  ;;  %7233 = vmatprep.mubr.f32.mxu1 %v10789_v0 }
 0x2ad   : > { %v4545_v6 = vpop.f32.mrf.mxu1  ;;  %v4634_v16 = vpop.f32.mrf.mxu0 }
 0x2ae   : > { %13273 = vst [vmem:[#allocation5_spill] sm:$0xff] %v12147_v13  ;;  %v12154_v63 = vadd.f32 %v4545_v6, %v4451_v47  ;;  %v4635_v2 = vadd.f32 %v4634_v16, %v11783_v42  ;;  %v12165_v42 = vsub.f32 %v7693_v10, %v12152_v43  ;;  %v13278_v16 = vld [vmem:[#allocation9_spill] sm:$0xff] }
 0x2af   : > { %v4643_v17 = vpop.f32.mrf.mxu0  ;;  %v4736_v18 = vpop.f32.mrf.mxu1  ;;  %7142 = vmatmul.mubr.f32.gmra.mxu0 %v11814_v46  ;;  %7235 = vmatmul.mubr.f32.vlgmr.msra.gmra.mxu1 %v11708_v51 }
 0x2b0   : > { %13274 = vst [vmem:[#allocation11_spill] sm:$0xff] %v12154_v63  ;;  %v4644_v45 = vadd.f32 %v4643_v17, %v13275_v23  ;;  %v4737_v37 = vadd.f32 %v4736_v18, %v4622_v62  ;;  %7396 = vmatpush1.msra.mxu1 %v12086_v40  ;;  %7147 = vmatprep.mubr.f32.mxu0 %v10789_v0  ;;  %v13277_v62 = vld [vmem:[#allocation8_spill] sm:$0xff]  ;;  %v7860_v10 = vand.u32 4294901760, %v12165_v42 }
 0x2b1   : > { %7596 = vmatprep.subr.mxu1 %v12046_v54  ;;  %v4645_v53 = vpop.f32.mrf.mxu0  ;;  %v4738_v47 = vpop.f32.mrf.mxu1  ;;  %7240 = vmatprep.mubr.f32.mxu1 %v10789_v0 }
 0x2b2   : > { %v4646_v46 = vadd.f32 %v4645_v53, %v13276_v39  ;;  %v4739_v58 = vadd.f32 %v4738_v47, %v4624_v12  ;;  %v13279_v53 = vand.u32 4294901760, %v12094_v32 }
 0x2b3   : > { %v4654_v60 = vpop.f32.mrf.mxu0  ;;  %v4743_v27 = vpop.f32.mrf.mxu1  ;;  %7153 = vmatmul.mubr.f32.gmra.mxu0 %v11830_v61  ;;  %7242 = vmatmul.mubr.f32.gmra.mxu1 %v11722_v59 }
 0x2b4   : > { %v4655_v33 = vadd.f32 %v4654_v60, %v13277_v62  ;;  %v4744_v4 = vadd.f32 %v4743_v27, %v4633_v38  ;;  %7247 = vmatprep.mubr.f32.mxu1 %v10789_v0  ;;  %7330 = vmatprep.mubr.f32.mxu0 %v10789_v0  ;;  %v7861_v60 = vsub.f32 %v12165_v42, %v7860_v10 }
 0x2b5   : > { %v4656_v54 = vpop.f32.mrf.mxu0  ;;  %v4745_v6 = vpop.f32.mrf.mxu1 }
 0x2b6   : > { %v4657_v12 = vadd.f32 %v4656_v54, %v13278_v16  ;;  %v4746_v17 = vadd.f32 %v4745_v6, %v4635_v2  ;;  %v7692_v2 = vld [vmem:[%s10866_s25] sm:$0xff] }
 0x2b7   : > { %v4750_v18 = vpop.f32.mrf.mxu1  ;;  %v4834_v23 = vpop.f32.mrf.mxu0  ;;  %7249 = vmatmul.mubr.f32.gmra.mxu1 %v11743_v7  ;;  %7333 = vmatmul.mubr.f32.vlgmr.msra.gmra.mxu0 %v11720_v9  ;;  %v12190_v54 = vand.u32 4294901760, %v7692_v2 }
 0x2b8   : > { %v4751_v61 = vadd.f32 %v4750_v18, %v4644_v45  ;;  %v4835_v38 = vadd.f32 %v4834_v23, %v4737_v37  ;;  %7503 = vmatpush1.msra.mxu0 %v13279_v53  ;;  %7254 = vmatprep.mubr.f32.mxu1 %v10789_v0  ;;  %v7862_v18 = vand.u32 4294901760, %v7861_v60 }
 0x2b9   : > { %v4752_v47 = vpop.f32.mrf.mxu1  ;;  %v4836_v39 = vpop.f32.mrf.mxu0  ;;  %7338 = vmatprep.mubr.f32.mxu0 %v10789_v0  ;;  %7748 = vmatprep.subr.mxu0 %v12152_v43 }
 0x2ba   : > { %v4753_v27 = vadd.f32 %v4752_v47, %v4646_v46  ;;  %v4837_v9 = vadd.f32 %v4836_v39, %v4739_v58  ;;  %v10607_v46 = vld [vmem:[%s13241_s0 + $0x60] sm:$0xff] }
 0x2bb   : > { %v4757_v45 = vpop.f32.mrf.mxu1  ;;  %v4842_v37 = vpop.f32.mrf.mxu0  ;;  %7256 = vmatmul.mubr.f32.gmra.mxu1 %v11758_v22  ;;  %7341 = vmatmul.mubr.f32.gmra.mxu0 %v11741_v30  ;;  %v7706_v39 = vsel %vm204_vm0, %v10607_v46, 0 }
 0x2bc   : > { %v4758_v32 = vadd.f32 %v4757_v45, %v4655_v33  ;;  %v4843_v62 = vadd.f32 %v4842_v37, %v4744_v4  ;;  %7346 = vmatprep.mubr.f32.mxu0 %v10789_v0  ;;  %7429 = vmatprep.mubr.f32.mxu1 %v10789_v0  ;;  %v12200_v4 = vsub.f32 %v7692_v2, %v12190_v54 }
 0x2bd   : > { %v4759_v6 = vpop.f32.mrf.mxu1  ;;  %v4844_v16 = vpop.f32.mrf.mxu0 }
 0x2be   : > { %v4760_v58 = vadd.f32 %v4759_v6, %v4657_v12  ;;  %v4845_v23 = vadd.f32 %v4844_v16, %v4746_v17  ;;  %v13251_v37 = vand.u32 4294901760, %v12200_v4 }
 0x2bf   : > { %v4850_v53 = vpop.f32.mrf.mxu0  ;;  %v4934_v47 = vpop.f32.mrf.mxu1  ;;  %7349 = vmatmul.mubr.f32.gmra.mxu0 %v11756_v36  ;;  %7433 = vmatmul.mubr.f32.vlgmr.msra.gmra.mxu1 %v11738_v31  ;;  %v10608_v31 = vld [vmem:[%s13241_s0 + $0x68] sm:$0xff] }
 0x2c0   : > { %v4851_v30 = vadd.f32 %v4850_v53, %v4751_v61  ;;  %v4935_v33 = vadd.f32 %v4934_v47, %v4835_v38  ;;  %7598 = vmatpush1.msra.mxu1 %v12086_v40  ;;  %7354 = vmatprep.mubr.f32.mxu0 %v10789_v0  ;;  %v12209_v38 = vand.u32 4294901760, %v7706_v39  ;;  %v7709_v6 = vsel %vm204_vm0, %v10608_v31, 0 }
 0x2c1   : > { %v4852_v60 = vpop.f32.mrf.mxu0  ;;  %v4936_v12 = vpop.f32.mrf.mxu1  ;;  %7438 = vmatprep.mubr.f32.mxu1 %v10789_v0  ;;  %7863 = vmatprep.subr.mxu1 %v7862_v18 }
 0x2c2   : > { %v4853_v36 = vadd.f32 %v4852_v60, %v4753_v27  ;;  %v4937_v17 = vadd.f32 %v4936_v12, %v4837_v9 }
 0x2c3   : > { %v4858_v61 = vpop.f32.mrf.mxu0  ;;  %v4943_v40 = vpop.f32.mrf.mxu1  ;;  %7357 = vmatmul.mubr.f32.gmra.mxu0 %v11777_v48  ;;  %7442 = vmatmul.mubr.f32.gmra.mxu1 %v11753_v55  ;;  %v10609_v48 = vld [vmem:[%s13241_s0 + $0x70] sm:$0xff] }
 0x2c4   : > { %v4859_v2 = vadd.f32 %v4858_v61, %v4758_v32  ;;  %v4944_v45 = vadd.f32 %v4943_v40, %v4843_v62  ;;  %7447 = vmatprep.mubr.f32.mxu1 %v10789_v0  ;;  %7536 = vmatprep.mubr.f32.mxu0 %v10789_v0  ;;  %v12221_v32 = vsub.f32 %v7706_v39, %v12209_v38  ;;  %v12223_v62 = vand.u32 4294901760, %v7709_v6  ;;  %v10610_v39 = vld [vmem:[%s13241_s0 + $0x78] sm:$0xff] }
 0x2c5   : > { %v4860_v27 = vpop.f32.mrf.mxu0  ;;  %v4945_v9 = vpop.f32.mrf.mxu1 }
 0x2c6   : > { %v4861_v16 = vadd.f32 %v4860_v27, %v4760_v58  ;;  %v4946_v55 = vadd.f32 %v4945_v9, %v4845_v23  ;;  %v7867_v58 = vsub.f32 %v12200_v4, %v13251_v37  ;;  %v7712_v23 = vsel %vm204_vm0, %v10609_v48, 0 }
 0x2c7   : > { %v4952_v18 = vpop.f32.mrf.mxu1  ;;  %v5039_v46 = vpop.f32.mrf.mxu0  ;;  %7451 = vmatmul.mubr.f32.gmra.mxu1 %v11774_v3  ;;  %7538 = vmatmul.mubr.f32.vlgmr.msra.gmra.mxu0 %v11708_v51  ;;  %v12239_v61 = vand.u32 4294901760, %v12221_v32  ;;  %v12242_v40 = vsub.f32 %v7709_v6, %v12223_v62  ;;  %v12244_v27 = vand.u32 4294901760, %v7712_v23 }
 0x2c8   : > { %v4953_v53 = vadd.f32 %v4952_v18, %v4851_v30  ;;  %v5040_v47 = vadd.f32 %v5039_v46, %v4935_v33  ;;  %7456 = vmatprep.mubr.f32.mxu1 %v10789_v0  ;;  %7543 = vmatprep.mubr.f32.mxu0 %v10789_v0 }
 0x2c9   : > { %v4954_v3 = vpop.f32.mrf.mxu1  ;;  %v5041_v60 = vpop.f32.mrf.mxu0  ;;  %7750 = vmatpush1.msra.mxu0 %v12190_v54  ;;  %v12257_v6 = vsub.f32 %v7712_v23, %v12244_v27 }
 0x2ca   : > { %v4955_v30 = vadd.f32 %v4954_v3, %v4853_v36  ;;  %v5042_v33 = vadd.f32 %v5041_v60, %v4937_v17  ;;  %7963 = vmatprep.subr.mxu0 %v12165_v42  ;;  %v7868_v36 = vand.u32 4294901760, %v7867_v58  ;;  %v7715_v17 = vsel %vm204_vm0, %v10610_v39, 0 }
 0x2cb   : > { %v4961_v12 = vpop.f32.mrf.mxu1  ;;  %v5046_v31 = vpop.f32.mrf.mxu0  ;;  %7460 = vmatmul.mubr.f32.gmra.mxu1 %v11794_v24  ;;  %7545 = vmatmul.mubr.f32.gmra.mxu0 %v11722_v59  ;;  %v12259_v58 = vand.u32 4294901760, %v7715_v17 }
 0x2cc   : > { %v4962_v9 = vadd.f32 %v4961_v12, %v4859_v2  ;;  %v5047_v48 = vadd.f32 %v5046_v31, %v4944_v45  ;;  %7550 = vmatprep.mubr.f32.mxu0 %v10789_v0  ;;  %7631 = vmatprep.mubr.f32.mxu1 %v10789_v0  ;;  %v7787_v2 = vsub.f32 %v12221_v32, %v12239_v61  ;;  %v12254_v45 = vand.u32 4294901760, %v12242_v40 }
 0x2cd   : > { %v4963_v24 = vpop.f32.mrf.mxu1  ;;  %v5048_v18 = vpop.f32.mrf.mxu0 }
 0x2ce   : > { %v4964_v46 = vadd.f32 %v4963_v24, %v4861_v16  ;;  %v5049_v3 = vadd.f32 %v5048_v18, %v4946_v55 }
 0x2cf   : > { %v5053_v60 = vpop.f32.mrf.mxu0  ;;  %v5134_v37 = vpop.f32.mrf.mxu1  ;;  %7552 = vmatmul.mubr.f32.gmra.mxu0 %v11743_v7  ;;  %7633 = vmatmul.mubr.f32.vlgmr.msra.gmra.mxu1 %v11708_v51 }
 0x2d0   : > { %v5054_v39 = vadd.f32 %v5053_v60, %v4953_v53  ;;  %v12261_v16 = vadd.f32 %v5134_v37, %v5040_v47  ;;  %7869 = vmatpush1.msra.mxu1 %v7868_v36  ;;  %7557 = vmatprep.mubr.f32.mxu0 %v10789_v0  ;;  %v12270_v37 = vand.u32 4294901760, %v7787_v2  ;;  %v7798_v53 = vsub.f32 %v12242_v40, %v12254_v45 }
 0x2d1   : > { %v5055_v55 = vpop.f32.mrf.mxu0  ;;  %v5136_v12 = vpop.f32.mrf.mxu1  ;;  %7638 = vmatprep.mubr.f32.mxu1 %v10789_v0  ;;  %8063 = vmatprep.subr.mxu1 %v12152_v43  ;;  %v12275_v47 = vand.u32 4294901760, %v12257_v6  ;;  %v12278_v36 = vsub.f32 %v7715_v17, %v12259_v58 }
 0x2d2   : > { %13280 = vst [vmem:[#allocation6_spill] sm:$0xff] %v12261_v16  ;;  %v5056_v51 = vadd.f32 %v5055_v55, %v4955_v30  ;;  %v12266_v31 = vadd.f32 %v5136_v12, %v5042_v33  ;;  %v12288_v17 = vand.u32 4294901760, %v7798_v53  ;;  %v7694_v16 = vld [vmem:[%s10866_s25 + $0x10] sm:$0xff] }
 0x2d3   : > { %v5060_v24 = vpop.f32.mrf.mxu0  ;;  %v5141_v23 = vpop.f32.mrf.mxu1  ;;  %7559 = vmatmul.mubr.f32.gmra.mxu0 %v11758_v22  ;;  %7640 = vmatmul.mubr.f32.gmra.mxu1 %v11722_v59 }
 0x2d4   : > { %13281 = vst [vmem:[#allocation7_spill] sm:$0xff] %v12266_v31  ;;  %v5061_v30 = vadd.f32 %v5060_v24, %v4962_v9  ;;  %v12280_v33 = vadd.f32 %v5141_v23, %v5047_v48  ;;  %7645 = vmatprep.mubr.f32.mxu1 %v10789_v0  ;;  %7783 = vmatprep.mubr.f32.mxu0 %v10789_v0  ;;  %v12293_v48 = vand.u32 4294901760, %v12278_v36  ;;  %v7695_v23 = vld [vmem:[%s10866_s25 + $0x18] sm:$0xff]  ;;  %v13288_v31 = vand.u32 4294901760, %v12200_v4 }
 0x2d5   : > { %v5062_v18 = vpop.f32.mrf.mxu0  ;;  %v5143_v59 = vpop.f32.mrf.mxu1  ;;  %v7809_v9 = vsub.f32 %v12257_v6, %v12275_v47 }
 0x2d6   : > { %13282 = vst [vmem:[#allocation8_spill] sm:$0xff] %v12280_v33  ;;  %v5063_v60 = vadd.f32 %v5062_v18, %v4964_v46  ;;  %v12284_v2 = vadd.f32 %v5143_v59, %v5049_v3  ;;  %v7820_v59 = vsub.f32 %v12278_v36, %v12293_v48 }
 0x2d7   : > { %v5148_v55 = vpop.f32.mrf.mxu1  ;;  %v5285_v12 = vpop.f32.mrf.mxu0  ;;  %7647 = vmatmul.mubr.f32.gmra.mxu1 %v11743_v7  ;;  %7789 = vmatmul.mubr.f32.vlgmr.msra.gmra.mxu0 %v12270_v37 }
 0x2d8   : > { %13283 = vst [vmem:[#allocation9_spill] sm:$0xff] %v12284_v2  ;;  %v12295_v24 = vadd.f32 %v5148_v55, %v5054_v39  ;;  %7652 = vmatprep.mubr.f32.mxu1 %v10789_v0  ;;  %7794 = vmatprep.mubr.f32.mxu0 %v10789_v0  ;;  %v12307_v39 = vand.u32 4294901760, %v7809_v9  ;;  %v12321_v9 = vand.u32 4294901760, %v7820_v59 }
 0x2d9   : > { %v5150_v46 = vpop.f32.mrf.mxu1  ;;  %v5287_v3 = vpop.f32.mrf.mxu0  ;;  %7966 = vmatpush1.msra.mxu0 %v12200_v4  ;;  %v12350_v4 = vand.u32 4294901760, %v7694_v16 }
 0x2da   : > { %13284 = vst [vmem:[#allocation12_spill] sm:$0xff] %v12295_v24  ;;  %v12300_v7 = vadd.f32 %v5150_v46, %v5056_v51  ;;  %8168 = vmatprep.subr.mxu0 %v7860_v10  ;;  %v12315_v51 = vand.u32 4294901760, %v7695_v23 }
 0x2db   : > { %v5155_v53 = vpop.f32.mrf.mxu1  ;;  %v5296_v18 = vpop.f32.mrf.mxu0  ;;  %7654 = vmatmul.mubr.f32.gmra.mxu1 %v11758_v22  ;;  %7800 = vmatmul.mubr.f32.gmra.mxu0 %v12288_v17 }
 0x2dc   : > { %13285 = vst [vmem:[#allocation13_spill] sm:$0xff] %v12300_v7  ;;  %v12311_v55 = vadd.f32 %v5155_v53, %v5061_v30  ;;  %7805 = vmatprep.mubr.f32.mxu0 %v10789_v0  ;;  %7902 = vmatprep.mubr.f32.mxu1 %v10789_v0 }
 0x2dd   : > { %v5157_v42 = vpop.f32.mrf.mxu1  ;;  %v5298_v10 = vpop.f32.mrf.mxu0 }
 0x2de   : > { %13286 = vst [vmem:[#allocation14_spill] sm:$0xff] %v12311_v55  ;;  %v12317_v46 = vadd.f32 %v5157_v42, %v5063_v60  ;;  %v12328_v60 = vsub.f32 %v7695_v23, %v12315_v51 }
 0x2df   : > { %v5307_v22 = vpop.f32.mrf.mxu0  ;;  %v5400_v7 = vpop.f32.mrf.mxu1  ;;  %7811 = vmatmul.mubr.f32.gmra.mxu0 %v12307_v39  ;;  %7904 = vmatmul.mubr.f32.vlgmr.msra.gmra.mxu1 %v12209_v38 }
 0x2e0   : > { %13287 = vst [vmem:[#allocation15_spill] sm:$0xff] %v12317_v46  ;;  %v5401_v30 = vadd.f32 %v5400_v7, %v5285_v12  ;;  %8065 = vmatpush1.msra.mxu1 %v12190_v54  ;;  %7816 = vmatprep.mubr.f32.mxu0 %v10789_v0 }
 0x2e1   : > { %v5309_v53 = vpop.f32.mrf.mxu0  ;;  %v5402_v55 = vpop.f32.mrf.mxu1  ;;  %7909 = vmatprep.mubr.f32.mxu1 %v10789_v0  ;;  %8265 = vmatprep.subr.mxu1 %v12152_v43  ;;  %v13252_v43 = vand.u32 4294901760, %v12328_v60 }
 0x2e2   : > { %v5403_v42 = vadd.f32 %v5402_v55, %v5287_v3 }
 0x2e3   : > { %v5318_v46 = vpop.f32.mrf.mxu0  ;;  %v5407_v24 = vpop.f32.mrf.mxu1  ;;  %7822 = vmatmul.mubr.f32.gmra.mxu0 %v12321_v9  ;;  %7911 = vmatmul.mubr.f32.gmra.mxu1 %v12223_v62 }
 0x2e4   : > { %v5408_v12 = vadd.f32 %v5407_v24, %v5296_v18  ;;  %7916 = vmatprep.mubr.f32.mxu1 %v10789_v0  ;;  %7999 = vmatprep.mubr.f32.mxu0 %v10789_v0 }
 0x2e5   : > { %v5320_v7 = vpop.f32.mrf.mxu0  ;;  %v5409_v59 = vpop.f32.mrf.mxu1 }
 0x2e6   : > { %v5410_v2 = vadd.f32 %v5409_v59, %v5298_v10  ;;  %v8473_v10 = vsub.f32 %v12328_v60, %v13252_v43 }
 0x2e7   : > { %v5414_v23 = vpop.f32.mrf.mxu1  ;;  %v5498_v33 = vpop.f32.mrf.mxu0  ;;  %7918 = vmatmul.mubr.f32.gmra.mxu1 %v12244_v27  ;;  %8002 = vmatmul.mubr.f32.vlgmr.msra.gmra.mxu0 %v12221_v32 }
 0x2e8   : > { %v5415_v3 = vadd.f32 %v5414_v23, %v5307_v22  ;;  %v5499_v55 = vadd.f32 %v5498_v33, %v5401_v30  ;;  %7923 = vmatprep.mubr.f32.mxu1 %v10789_v0  ;;  %8007 = vmatprep.mubr.f32.mxu0 %v10789_v0 }
 0x2e9   : > { %v5416_v24 = vpop.f32.mrf.mxu1  ;;  %v5500_v18 = vpop.f32.mrf.mxu0  ;;  %8172 = vmatpush1.msra.mxu0 %v13288_v31 }
 0x2ea   : > { %v5417_v59 = vadd.f32 %v5416_v24, %v5309_v53  ;;  %v5501_v63 = vadd.f32 %v5500_v18, %v5403_v42  ;;  %8360 = vmatprep.subr.mxu0 %v12315_v51  ;;  %v8474_v53 = vand.u32 4294901760, %v8473_v10 }
 0x2eb   : > { %v5421_v22 = vpop.f32.mrf.mxu1  ;;  %v5506_v33 = vpop.f32.mrf.mxu0  ;;  %7925 = vmatmul.mubr.f32.gmra.mxu1 %v12259_v58  ;;  %8010 = vmatmul.mubr.f32.gmra.mxu0 %v12242_v40 }
 0x2ec   : > { %v5422_v30 = vadd.f32 %v5421_v22, %v5318_v46  ;;  %v5507_v23 = vadd.f32 %v5506_v33, %v5408_v12  ;;  %8015 = vmatprep.mubr.f32.mxu0 %v10789_v0  ;;  %8098 = vmatprep.mubr.f32.mxu1 %v10789_v0  ;;  %v12357_v12 = vsub.f32 %v7694_v16, %v12350_v4 }
 0x2ed   : > { %v5423_v31 = vpop.f32.mrf.mxu1  ;;  %v5508_v43 = vpop.f32.mrf.mxu0 }
 0x2ee   : > { %v5424_v42 = vadd.f32 %v5423_v31, %v5320_v7  ;;  %v5509_v24 = vadd.f32 %v5508_v43, %v5410_v2  ;;  %v13253_v16 = vand.u32 4294901760, %v12357_v12 }
 0x2ef   : > { %v5514_v18 = vpop.f32.mrf.mxu0  ;;  %v5598_v13 = vpop.f32.mrf.mxu1  ;;  %8018 = vmatmul.mubr.f32.gmra.mxu0 %v12257_v6  ;;  %8102 = vmatmul.mubr.f32.vlgmr.msra.gmra.mxu1 %v12239_v61 }
 0x2f0   : > { %v5515_v35 = vadd.f32 %v5514_v18, %v5415_v3  ;;  %v5599_v46 = vadd.f32 %v5598_v13, %v5499_v55  ;;  %8267 = vmatpush1.msra.mxu1 %v12190_v54  ;;  %8023 = vmatprep.mubr.f32.mxu0 %v10789_v0 }
 0x2f1   : > { %v5516_v22 = vpop.f32.mrf.mxu0  ;;  %v5600_v33 = vpop.f32.mrf.mxu1  ;;  %8107 = vmatprep.mubr.f32.mxu1 %v10789_v0  ;;  %8475 = vmatprep.subr.mxu1 %v8474_v53 }
 0x2f2   : > { %v5517_v2 = vadd.f32 %v5516_v22, %v5417_v59  ;;  %v5601_v7 = vadd.f32 %v5600_v33, %v5501_v63 }
 0x2f3   : > { %v5522_v43 = vpop.f32.mrf.mxu0  ;;  %v5607_v10 = vpop.f32.mrf.mxu1  ;;  %8026 = vmatmul.mubr.f32.gmra.mxu0 %v12278_v36  ;;  %8111 = vmatmul.mubr.f32.gmra.mxu1 %v12254_v45 }
 0x2f4   : > { %v5523_v13 = vadd.f32 %v5522_v43, %v5422_v30  ;;  %v5608_v54 = vadd.f32 %v5607_v10, %v5507_v23  ;;  %8116 = vmatprep.mubr.f32.mxu1 %v10789_v0  ;;  %8205 = vmatprep.mubr.f32.mxu0 %v10789_v0  ;;  %v8479_v30 = vsub.f32 %v12357_v12, %v13253_v16 }
 0x2f5   : > { %v5524_v3 = vpop.f32.mrf.mxu0  ;;  %v5609_v55 = vpop.f32.mrf.mxu1 }
 0x2f6   : > { %v5525_v31 = vadd.f32 %v5524_v3, %v5424_v42  ;;  %v5610_v53 = vadd.f32 %v5609_v55, %v5509_v24  ;;  %v8480_v3 = vand.u32 4294901760, %v8479_v30 }
 0x2f7   : > { %v5616_v59 = vpop.f32.mrf.mxu1  ;;  %v5703_v63 = vpop.f32.mrf.mxu0  ;;  %8120 = vmatmul.mubr.f32.gmra.mxu1 %v12275_v47  ;;  %8207 = vmatmul.mubr.f32.vlgmr.msra.gmra.mxu0 %v12209_v38 }
 0x2f8   : > { %v5617_v18 = vadd.f32 %v5616_v59, %v5515_v35  ;;  %v5704_v22 = vadd.f32 %v5703_v63, %v5599_v46  ;;  %8125 = vmatprep.mubr.f32.mxu1 %v10789_v0  ;;  %8212 = vmatprep.mubr.f32.mxu0 %v10789_v0 }
 0x2f9   : > { %v5618_v23 = vpop.f32.mrf.mxu1  ;;  %v5705_v33 = vpop.f32.mrf.mxu0  ;;  %8362 = vmatpush1.msra.mxu0 %v12350_v4 }
 0x2fa   : > { %v5619_v42 = vadd.f32 %v5618_v23, %v5517_v2  ;;  %v5706_v24 = vadd.f32 %v5705_v33, %v5601_v7  ;;  %8575 = vmatprep.subr.mxu0 %v12328_v60 }
 0x2fb   : > { %v5625_v43 = vpop.f32.mrf.mxu1  ;;  %v5710_v10 = vpop.f32.mrf.mxu0  ;;  %8129 = vmatmul.mubr.f32.gmra.mxu1 %v12293_v48  ;;  %8214 = vmatmul.mubr.f32.gmra.mxu0 %v12223_v62 }
 0x2fc   : > { %v5626_v35 = vadd.f32 %v5625_v43, %v5523_v13  ;;  %v5711_v46 = vadd.f32 %v5710_v10, %v5608_v54  ;;  %8219 = vmatprep.mubr.f32.mxu0 %v10789_v0  ;;  %8300 = vmatprep.mubr.f32.mxu1 %v10789_v0 }
 0x2fd   : > { %v5627_v55 = vpop.f32.mrf.mxu1  ;;  %v5712_v59 = vpop.f32.mrf.mxu0 }
 0x2fe   : > { %v5628_v63 = vadd.f32 %v5627_v55, %v5525_v31  ;;  %v5713_v2 = vadd.f32 %v5712_v59, %v5610_v53 }
 0x2ff   : > { %v5717_v7 = vpop.f32.mrf.mxu0  ;;  %v5798_v23 = vpop.f32.mrf.mxu1  ;;  %8221 = vmatmul.mubr.f32.gmra.mxu0 %v12244_v27  ;;  %8302 = vmatmul.mubr.f32.vlgmr.msra.gmra.mxu1 %v12209_v38 }
 0x300   : > { %v5718_v33 = vadd.f32 %v5717_v7, %v5617_v18  ;;  %v5799_v16 = vadd.f32 %v5798_v23, %v5704_v22  ;;  %8481 = vmatpush1.msra.mxu1 %v8480_v3  ;;  %8226 = vmatprep.mubr.f32.mxu0 %v10789_v0  ;;  %v13289_v23 = vand.u32 4294901760, %v12328_v60 }
 0x301   : > { %v5719_v13 = vpop.f32.mrf.mxu0  ;;  %v5800_v54 = vpop.f32.mrf.mxu1  ;;  %8307 = vmatprep.mubr.f32.mxu1 %v10789_v0  ;;  %8675 = vmatprep.subr.mxu1 %v12315_v51 }
 0x302   : > { %v12384_v31 = vadd.f32 %v5799_v16, %v11895_v56  ;;  %v5720_v53 = vadd.f32 %v5719_v13, %v5619_v42  ;;  %v5801_v30 = vadd.f32 %v5800_v54, %v5706_v24  ;;  %v7697_v13 = vld [vmem:[%s10866_s25 + $0x28] sm:$0xff] }
 0x303   : > { %v5724_v43 = vpop.f32.mrf.mxu0  ;;  %v5805_v10 = vpop.f32.mrf.mxu1  ;;  %8228 = vmatmul.mubr.f32.gmra.mxu0 %v12259_v58  ;;  %8309 = vmatmul.mubr.f32.gmra.mxu1 %v12223_v62 }
 0x304   : > { %v12389_v18 = vadd.f32 %v5801_v30, %v11900_v57  ;;  %v5725_v22 = vadd.f32 %v5724_v43, %v5626_v35  ;;  %v5806_v3 = vadd.f32 %v5805_v10, %v5711_v46  ;;  %8314 = vmatprep.mubr.f32.mxu1 %v10789_v0  ;;  %8395 = vmatprep.mubr.f32.mxu0 %v10789_v0  ;;  %v12417_v43 = vand.u32 4294901760, %v7697_v13 }
 0x305   : > { %v5726_v55 = vpop.f32.mrf.mxu0  ;;  %v5807_v56 = vpop.f32.mrf.mxu1 }
 0x306   : > { %v12394_v16 = vadd.f32 %v5806_v3, %v11904_v26  ;;  %v5727_v42 = vadd.f32 %v5726_v55, %v5628_v63  ;;  %v5808_v24 = vadd.f32 %v5807_v56, %v5713_v2 }
 0x307   : > { %v5812_v59 = vpop.f32.mrf.mxu1  ;;  %v5897_v7 = vpop.f32.mrf.mxu0  ;;  %8316 = vmatmul.mubr.f32.gmra.mxu1 %v12244_v27  ;;  %8401 = vmatmul.mubr.f32.vlgmr.msra.gmra.mxu0 %v12270_v37 }
 0x308   : > { %v12399_v57 = vadd.f32 %v5808_v24, %v11908_v50  ;;  %v5813_v35 = vadd.f32 %v5812_v59, %v5718_v33  ;;  %8321 = vmatprep.mubr.f32.mxu1 %v10789_v0  ;;  %8406 = vmatprep.mubr.f32.mxu0 %v10789_v0 }
 0x309   : > { %v5814_v46 = vpop.f32.mrf.mxu1  ;;  %v5899_v26 = vpop.f32.mrf.mxu0  ;;  %8578 = vmatpush1.msra.mxu0 %v12357_v12 }
 0x30a   : > { %v12405_v63 = vadd.f32 %v5813_v35, %v11916_v49  ;;  %v5815_v2 = vadd.f32 %v5814_v46, %v5720_v53  ;;  %8780 = vmatprep.subr.mxu0 %v13289_v23 }
 0x30b   : > { %v5819_v54 = vpop.f32.mrf.mxu1  ;;  %v5908_v50 = vpop.f32.mrf.mxu0  ;;  %8323 = vmatmul.mubr.f32.gmra.mxu1 %v12259_v58  ;;  %8412 = vmatmul.mubr.f32.gmra.mxu0 %v12288_v17 }
 0x30c   : > { %v12413_v33 = vadd.f32 %v5815_v2, %v11924_v34  ;;  %v5820_v30 = vadd.f32 %v5819_v54, %v5725_v22  ;;  %8417 = vmatprep.mubr.f32.mxu0 %v10789_v0  ;;  %8514 = vmatprep.mubr.f32.mxu1 %v10789_v0 }
 0x30d   : > { %v5821_v49 = vpop.f32.mrf.mxu1  ;;  %v5910_v53 = vpop.f32.mrf.mxu0 }
 0x30e   : > { %v12420_v60 = vadd.f32 %v5820_v30, %v11932_v41  ;;  %v5822_v10 = vadd.f32 %v5821_v49, %v5727_v42  ;;  %v12432_v41 = vsub.f32 %v7697_v13, %v12417_v43  ;;  %v13290_v49 = vand.u32 4294901760, %v12357_v12 }
 0x30f   : > { %v5919_v3 = vpop.f32.mrf.mxu0  ;;  %v6012_v55 = vpop.f32.mrf.mxu1  ;;  %8423 = vmatmul.mubr.f32.gmra.mxu0 %v12307_v39  ;;  %8516 = vmatmul.mubr.f32.vlgmr.msra.gmra.mxu1 %v12209_v38 }
 0x310   : > { %v12425_v34 = vadd.f32 %v5822_v10, %v11939_v19  ;;  %v6013_v22 = vadd.f32 %v6012_v55, %v5897_v7  ;;  %8677 = vmatpush1.msra.mxu1 %v12350_v4  ;;  %8428 = vmatprep.mubr.f32.mxu0 %v10789_v0  ;;  %v7696_v10 = vld [vmem:[%s10866_s25 + $0x20] sm:$0xff] }
 0x311   : > { %v5921_v56 = vpop.f32.mrf.mxu0  ;;  %v6014_v24 = vpop.f32.mrf.mxu1  ;;  %8521 = vmatprep.mubr.f32.mxu1 %v10789_v0  ;;  %8877 = vmatprep.subr.mxu1 %v12315_v51  ;;  %v13254_v51 = vand.u32 4294901760, %v12432_v41  ;;  %v12454_v12 = vand.u32 4294901760, %v7696_v10 }
 0x312   : > { %v6015_v42 = vadd.f32 %v6014_v24, %v5899_v26 }
 0x313   : > { %v5930_v59 = vpop.f32.mrf.mxu0  ;;  %v6019_v35 = vpop.f32.mrf.mxu1  ;;  %8434 = vmatmul.mubr.f32.gmra.mxu0 %v12321_v9  ;;  %8523 = vmatmul.mubr.f32.gmra.mxu1 %v12223_v62 }
 0x314   : > { %v6020_v19 = vadd.f32 %v6019_v35, %v5908_v50  ;;  %8528 = vmatprep.mubr.f32.mxu1 %v10789_v0  ;;  %8611 = vmatprep.mubr.f32.mxu0 %v10789_v0 }
 0x315   : > { %v5932_v7 = vpop.f32.mrf.mxu0  ;;  %v6021_v46 = vpop.f32.mrf.mxu1 }
 0x316   : > { %v6022_v2 = vadd.f32 %v6021_v46, %v5910_v53  ;;  %v9085_v53 = vsub.f32 %v12432_v41, %v13254_v51 }
 0x317   : > { %v6026_v23 = vpop.f32.mrf.mxu1  ;;  %v6110_v13 = vpop.f32.mrf.mxu0  ;;  %8530 = vmatmul.mubr.f32.gmra.mxu1 %v12244_v27  ;;  %8614 = vmatmul.mubr.f32.vlgmr.msra.gmra.mxu0 %v12221_v32 }
 0x318   : > { %v6027_v26 = vadd.f32 %v6026_v23, %v5919_v3  ;;  %v6111_v54 = vadd.f32 %v6110_v13, %v6013_v22  ;;  %8535 = vmatprep.mubr.f32.mxu1 %v10789_v0  ;;  %8619 = vmatprep.mubr.f32.mxu0 %v10789_v0 }
 0x319   : > { %v6028_v50 = vpop.f32.mrf.mxu1  ;;  %v6112_v30 = vpop.f32.mrf.mxu0  ;;  %8784 = vmatpush1.msra.mxu0 %v13290_v49 }
 0x31a   : > { %v6029_v55 = vadd.f32 %v6028_v50, %v5921_v56  ;;  %v6113_v24 = vadd.f32 %v6112_v30, %v6015_v42  ;;  %8972 = vmatprep.subr.mxu0 %v12417_v43  ;;  %v9086_v56 = vand.u32 4294901760, %v9085_v53 }
 0x31b   : > { %v6033_v3 = vpop.f32.mrf.mxu1  ;;  %v6118_v22 = vpop.f32.mrf.mxu0  ;;  %8537 = vmatmul.mubr.f32.gmra.mxu1 %v12259_v58  ;;  %8622 = vmatmul.mubr.f32.gmra.mxu0 %v12242_v40 }
 0x31c   : > { %v6034_v35 = vadd.f32 %v6033_v3, %v5930_v59  ;;  %v6119_v46 = vadd.f32 %v6118_v22, %v6020_v19  ;;  %8627 = vmatprep.mubr.f32.mxu0 %v10789_v0  ;;  %8710 = vmatprep.mubr.f32.mxu1 %v10789_v0  ;;  %v12461_v19 = vsub.f32 %v7696_v10, %v12454_v12 }
 0x31d   : > { %v6035_v23 = vpop.f32.mrf.mxu1  ;;  %v6120_v13 = vpop.f32.mrf.mxu0 }
 0x31e   : > { %v6036_v42 = vadd.f32 %v6035_v23, %v5932_v7  ;;  %v6121_v50 = vadd.f32 %v6120_v13, %v6022_v2 }
 0x31f   : > { %v6126_v30 = vpop.f32.mrf.mxu0  ;;  %v6210_v49 = vpop.f32.mrf.mxu1  ;;  %8630 = vmatmul.mubr.f32.gmra.mxu0 %v12257_v6  ;;  %8714 = vmatmul.mubr.f32.vlgmr.msra.gmra.mxu1 %v12239_v61 }
 0x320   : > { %v6127_v51 = vadd.f32 %v6126_v30, %v6027_v26  ;;  %v6211_v59 = vadd.f32 %v6210_v49, %v6111_v54  ;;  %8879 = vmatpush1.msra.mxu1 %v12350_v4  ;;  %8635 = vmatprep.mubr.f32.mxu0 %v10789_v0  ;;  %v13255_v54 = vand.u32 4294901760, %v12461_v19 }
 0x321   : > { %v6128_v3 = vpop.f32.mrf.mxu0  ;;  %v6212_v22 = vpop.f32.mrf.mxu1  ;;  %8719 = vmatprep.mubr.f32.mxu1 %v10789_v0  ;;  %9087 = vmatprep.subr.mxu1 %v9086_v56 }
 0x322   : > { %v6129_v7 = vadd.f32 %v6128_v3, %v6029_v55  ;;  %v6213_v2 = vadd.f32 %v6212_v22, %v6113_v24 }
 0x323   : > { %v6134_v53 = vpop.f32.mrf.mxu0  ;;  %v6219_v23 = vpop.f32.mrf.mxu1  ;;  %8638 = vmatmul.mubr.f32.gmra.mxu0 %v12278_v36  ;;  %8723 = vmatmul.mubr.f32.gmra.mxu1 %v12254_v45 }
 0x324   : > { %v6135_v26 = vadd.f32 %v6134_v53, %v6034_v35  ;;  %v6220_v4 = vadd.f32 %v6219_v23, %v6119_v46  ;;  %8728 = vmatprep.mubr.f32.mxu1 %v10789_v0  ;;  %8817 = vmatprep.mubr.f32.mxu0 %v10789_v0  ;;  %v9091_v35 = vsub.f32 %v12461_v19, %v13255_v54 }
 0x325   : > { %v6136_v10 = vpop.f32.mrf.mxu0  ;;  %v6221_v13 = vpop.f32.mrf.mxu1 }
 0x326   : > { %v6137_v30 = vadd.f32 %v6136_v10, %v6036_v42  ;;  %v6222_v56 = vadd.f32 %v6221_v13, %v6121_v50  ;;  %v9092_v10 = vand.u32 4294901760, %v9091_v35 }
 0x327   : > { %v6228_v55 = vpop.f32.mrf.mxu1  ;;  %v6315_v24 = vpop.f32.mrf.mxu0  ;;  %8732 = vmatmul.mubr.f32.gmra.mxu1 %v12275_v47  ;;  %8819 = vmatmul.mubr.f32.vlgmr.msra.gmra.mxu0 %v12209_v38 }
 0x328   : > { %v6229_v49 = vadd.f32 %v6228_v55, %v6127_v51  ;;  %v6316_v3 = vadd.f32 %v6315_v24, %v6211_v59  ;;  %8737 = vmatprep.mubr.f32.mxu1 %v10789_v0  ;;  %8824 = vmatprep.mubr.f32.mxu0 %v10789_v0 }
 0x329   : > { %v6230_v46 = vpop.f32.mrf.mxu1  ;;  %v6317_v22 = vpop.f32.mrf.mxu0  ;;  %8974 = vmatpush1.msra.mxu0 %v12454_v12 }
 0x32a   : > { %v6231_v42 = vadd.f32 %v6230_v46, %v6129_v7  ;;  %v6318_v50 = vadd.f32 %v6317_v22, %v6213_v2  ;;  %9187 = vmatprep.subr.mxu0 %v12432_v41 }
 0x32b   : > { %v6237_v53 = vpop.f32.mrf.mxu1  ;;  %v6322_v23 = vpop.f32.mrf.mxu0  ;;  %8741 = vmatmul.mubr.f32.gmra.mxu1 %v12293_v48  ;;  %8826 = vmatmul.mubr.f32.gmra.mxu0 %v12223_v62 }
 0x32c   : > { %v6238_v51 = vadd.f32 %v6237_v53, %v6135_v26  ;;  %v6323_v59 = vadd.f32 %v6322_v23, %v6220_v4  ;;  %8831 = vmatprep.mubr.f32.mxu0 %v10789_v0  ;;  %8912 = vmatprep.mubr.f32.mxu1 %v10789_v0 }
 0x32d   : > { %v6239_v13 = vpop.f32.mrf.mxu1  ;;  %v6324_v55 = vpop.f32.mrf.mxu0 }
 0x32e   : > { %v6240_v24 = vadd.f32 %v6239_v13, %v6137_v30  ;;  %v6325_v7 = vadd.f32 %v6324_v55, %v6222_v56 }
 0x32f   : > { %v6329_v2 = vpop.f32.mrf.mxu0  ;;  %v6410_v46 = vpop.f32.mrf.mxu1  ;;  %8833 = vmatmul.mubr.f32.gmra.mxu0 %v12244_v27  ;;  %8914 = vmatmul.mubr.f32.vlgmr.msra.gmra.mxu1 %v12209_v38 }
 0x330   : > { %v6330_v22 = vadd.f32 %v6329_v2, %v6229_v49  ;;  %v6411_v54 = vadd.f32 %v6410_v46, %v6316_v3  ;;  %9093 = vmatpush1.msra.mxu1 %v9092_v10  ;;  %8838 = vmatprep.mubr.f32.mxu0 %v10789_v0  ;;  %v13291_v46 = vand.u32 4294901760, %v12432_v41 }
 0x331   : > { %v6331_v26 = vpop.f32.mrf.mxu0  ;;  %v6412_v4 = vpop.f32.mrf.mxu1  ;;  %8919 = vmatprep.mubr.f32.mxu1 %v10789_v0  ;;  %9287 = vmatprep.subr.mxu1 %v12417_v43 }
 0x332   : > { %v12488_v30 = vadd.f32 %v6411_v54, %v12007_v44  ;;  %v6332_v56 = vadd.f32 %v6331_v26, %v6231_v42  ;;  %v6413_v35 = vadd.f32 %v6412_v4, %v6318_v50  ;;  %v7699_v26 = vld [vmem:[%s10866_s25 + $0x38] sm:$0xff] }
 0x333   : > { %v6336_v53 = vpop.f32.mrf.mxu0  ;;  %v6417_v23 = vpop.f32.mrf.mxu1  ;;  %8840 = vmatmul.mubr.f32.gmra.mxu0 %v12259_v58  ;;  %8921 = vmatmul.mubr.f32.gmra.mxu1 %v12223_v62 }
 0x334   : > { %v12493_v49 = vadd.f32 %v6413_v35, %v12012_v21  ;;  %v6337_v3 = vadd.f32 %v6336_v53, %v6238_v51  ;;  %v6418_v10 = vadd.f32 %v6417_v23, %v6323_v59  ;;  %8926 = vmatprep.mubr.f32.mxu1 %v10789_v0  ;;  %9007 = vmatprep.mubr.f32.mxu0 %v10789_v0  ;;  %v12521_v53 = vand.u32 4294901760, %v7699_v26 }
 0x335   : > { %v6338_v13 = vpop.f32.mrf.mxu0  ;;  %v6419_v44 = vpop.f32.mrf.mxu1 }
 0x336   : > { %v12498_v54 = vadd.f32 %v6418_v10, %v12016_v14  ;;  %v6339_v42 = vadd.f32 %v6338_v13, %v6240_v24  ;;  %v6420_v50 = vadd.f32 %v6419_v44, %v6325_v7 }
 0x337   : > { %v6424_v55 = vpop.f32.mrf.mxu1  ;;  %v6509_v2 = vpop.f32.mrf.mxu0  ;;  %8928 = vmatmul.mubr.f32.gmra.mxu1 %v12244_v27  ;;  %9013 = vmatmul.mubr.f32.vlgmr.msra.gmra.mxu0 %v12270_v37 }
 0x338   : > { %v12503_v21 = vadd.f32 %v6420_v50, %v12020_v8  ;;  %v6425_v51 = vadd.f32 %v6424_v55, %v6330_v22  ;;  %8933 = vmatprep.mubr.f32.mxu1 %v10789_v0  ;;  %9018 = vmatprep.mubr.f32.mxu0 %v10789_v0 }
 0x339   : > { %v6426_v59 = vpop.f32.mrf.mxu1  ;;  %v6511_v14 = vpop.f32.mrf.mxu0  ;;  %9190 = vmatpush1.msra.mxu0 %v12461_v19 }
 0x33a   : > { %v12509_v24 = vadd.f32 %v6425_v51, %v12026_v11  ;;  %v6427_v7 = vadd.f32 %v6426_v59, %v6332_v56  ;;  %9392 = vmatprep.subr.mxu0 %v13291_v46 }
 0x33b   : > { %v6431_v4 = vpop.f32.mrf.mxu1  ;;  %v6520_v8 = vpop.f32.mrf.mxu0  ;;  %8935 = vmatmul.mubr.f32.gmra.mxu1 %v12259_v58  ;;  %9024 = vmatmul.mubr.f32.gmra.mxu0 %v12288_v17 }
 0x33c   : > { %v12517_v22 = vadd.f32 %v6427_v7, %v12034_v29  ;;  %v6432_v35 = vadd.f32 %v6431_v4, %v6337_v3  ;;  %9029 = vmatprep.mubr.f32.mxu0 %v10789_v0  ;;  %9126 = vmatprep.mubr.f32.mxu1 %v10789_v0 }
 0x33d   : > { %v6433_v11 = vpop.f32.mrf.mxu1  ;;  %v6522_v56 = vpop.f32.mrf.mxu0 }
 0x33e   : > { %13292 = vst [vmem:[#allocation16_spill] sm:$0xff] %v12517_v22  ;;  %v12524_v41 = vadd.f32 %v6432_v35, %v12041_v15  ;;  %v6434_v23 = vadd.f32 %v6433_v11, %v6339_v42  ;;  %v12536_v15 = vsub.f32 %v7699_v26, %v12521_v53  ;;  %v13295_v11 = vand.u32 4294901760, %v12461_v19 }
 0x33f   : > { %v6531_v10 = vpop.f32.mrf.mxu0  ;;  %v6624_v13 = vpop.f32.mrf.mxu1  ;;  %9035 = vmatmul.mubr.f32.gmra.mxu0 %v12307_v39  ;;  %9128 = vmatmul.mubr.f32.vlgmr.msra.gmra.mxu1 %v12209_v38 }
 0x340   : > { %13293 = vst [vmem:[#allocation17_spill] sm:$0xff] %v12524_v41  ;;  %v12529_v29 = vadd.f32 %v6434_v23, %v12048_v52  ;;  %v6625_v3 = vadd.f32 %v6624_v13, %v6509_v2  ;;  %9289 = vmatpush1.msra.mxu1 %v12454_v12  ;;  %9040 = vmatprep.mubr.f32.mxu0 %v10789_v0  ;;  %v7698_v23 = vld [vmem:[%s10866_s25 + $0x30] sm:$0xff]  ;;  %s134_s25 = sand.u32 1, %s10779_s10  }
 0x341   : > { %v6533_v44 = vpop.f32.mrf.mxu0  ;;  %v6626_v50 = vpop.f32.mrf.mxu1  ;;  %9133 = vmatprep.mubr.f32.mxu1 %v10789_v0  ;;  %9489 = vmatprep.subr.mxu1 %v12417_v43  ;;  %v13256_v43 = vand.u32 4294901760, %v12536_v15  ;;  %v12558_v19 = vand.u32 4294901760, %v7698_v23  ;;  %s10597_s24 = sshll.u32 %s134_s25, 8  ;;  %s13201_s13 = scalar_lea.sflag [#allocation3], %s134_s25 }
 0x342   : > { %13294 = vst [vmem:[#allocation18_spill] sm:$0xff] %v12529_v29  ;;  %v6627_v42 = vadd.f32 %v6626_v50, %v6511_v14  ;;  %s12804_s26 = scalar_lea.vmem [#allocation2], %s10597_s24 }
 0x343   : > { %v6542_v55 = vpop.f32.mrf.mxu0  ;;  %v6631_v51 = vpop.f32.mrf.mxu1  ;;  %9046 = vmatmul.mubr.f32.gmra.mxu0 %v12321_v9  ;;  %9135 = vmatmul.mubr.f32.gmra.mxu1 %v12223_v62  ;;  %s10531_s28 = sshll.u32 %s12804_s26, 4  ;;  %s13195_s28 = int_to_ptr.vmem [resolvable:$true] %s10531_s28 }
 0x344   : > { %v6632_v52 = vadd.f32 %v6631_v51, %v6520_v8  ;;  %9140 = vmatprep.mubr.f32.mxu1 %v10789_v0  ;;  %9223 = vmatprep.mubr.f32.mxu0 %v10789_v0  ;;  %s10727_s4 = scalar_lea.vmem %s13195_s28, 4096  ;;  %p10734_p0 = scmp.lt.s32.totalorder %s13195_s28, %s10732_s6 }
 0x345   : > { %v6544_v2 = vpop.f32.mrf.mxu0  ;;  %v6633_v59 = vpop.f32.mrf.mxu1  ;;  %p10728_p11 = scmp.ne.s32.totalorder %s13195_s28, %s10727_s4  ;;  %p10735_p1 = scmp.lt.s32.totalorder %s10733_s7, %s10727_s4 }
 0x346   : > { %v6634_v7 = vadd.f32 %v6633_v59, %v6522_v56  ;;  %v9697_v56 = vsub.f32 %v12536_v15, %v13256_v43 }
 0x347   : > { %v6638_v46 = vpop.f32.mrf.mxu1  ;;  %v6722_v26 = vpop.f32.mrf.mxu0  ;;  %9142 = vmatmul.mubr.f32.gmra.mxu1 %v12244_v27  ;;  %9226 = vmatmul.mubr.f32.vlgmr.msra.gmra.mxu0 %v12221_v32  ;;  %p10729_p12 = pnand %p10728_p11, %p10849_p5  ;;  %p10736_p2 = por %p10735_p1, %p10734_p0 }
 0x348   : > { %v6639_v14 = vadd.f32 %v6638_v46, %v6531_v10  ;;  %v6723_v4 = vadd.f32 %v6722_v26, %v6625_v3  ;;  %9147 = vmatprep.mubr.f32.mxu1 %v10789_v0  ;;  %9231 = vmatprep.mubr.f32.mxu0 %v10789_v0 }
 0x349   : > { %v6640_v8 = vpop.f32.mrf.mxu1  ;;  %v6724_v35 = vpop.f32.mrf.mxu0  ;;  %9396 = vmatpush1.msra.mxu0 %v13295_v11  ;;  %p10730_p13 = pneg %p10729_p12 }
 0x34a   : > { %v6641_v13 = vadd.f32 %v6640_v8, %v6533_v44  ;;  %v6725_v50 = vadd.f32 %v6724_v35, %v6627_v42  ;;  %9584 = vmatprep.subr.mxu0 %v12521_v53  ;;  %v9698_v44 = vand.u32 4294901760, %v9697_v56 }
 0x34b   : > { %v6645_v10 = vpop.f32.mrf.mxu1  ;;  %v6730_v3 = vpop.f32.mrf.mxu0  ;;  %9149 = vmatmul.mubr.f32.gmra.mxu1 %v12259_v58  ;;  %9234 = vmatmul.mubr.f32.gmra.mxu0 %v12242_v40  ;;  %p10737_p3 = pnand %p10736_p2, %p10730_p13 }
 0x34c   : > { %v6646_v51 = vadd.f32 %v6645_v10, %v6542_v55  ;;  %v6731_v59 = vadd.f32 %v6730_v3, %v6632_v52  ;;  %9239 = vmatprep.mubr.f32.mxu0 %v10789_v0  ;;  %9322 = vmatprep.mubr.f32.mxu1 %v10789_v0  ;;  %v12565_v52 = vsub.f32 %v7698_v23, %v12558_v19 }
 0x34d   : > { %v6647_v46 = vpop.f32.mrf.mxu1  ;;  %v6732_v26 = vpop.f32.mrf.mxu0 }
 0x34e   : > { %v6648_v42 = vadd.f32 %v6647_v46, %v6544_v2  ;;  %v6733_v8 = vadd.f32 %v6732_v26, %v6634_v7 }
 0x34f   : > { %v6738_v35 = vpop.f32.mrf.mxu0  ;;  %v6822_v11 = vpop.f32.mrf.mxu1  ;;  %9242 = vmatmul.mubr.f32.gmra.mxu0 %v12257_v6  ;;  %9326 = vmatmul.mubr.f32.vlgmr.msra.gmra.mxu1 %v12239_v61 }
 0x350   : > { %v6739_v43 = vadd.f32 %v6738_v35, %v6639_v14  ;;  %v6823_v55 = vadd.f32 %v6822_v11, %v6723_v4  ;;  %9491 = vmatpush1.msra.mxu1 %v12454_v12  ;;  %9247 = vmatprep.mubr.f32.mxu0 %v10789_v0  ;;  %v13257_v4 = vand.u32 4294901760, %v12565_v52 }
 0x351   : > { %v6740_v10 = vpop.f32.mrf.mxu0  ;;  %v6824_v3 = vpop.f32.mrf.mxu1  ;;  %9331 = vmatprep.mubr.f32.mxu1 %v10789_v0  ;;  %9699 = vmatprep.subr.mxu1 %v9698_v44 }
 0x352   : > { %v6741_v2 = vadd.f32 %v6740_v10, %v6641_v13  ;;  %v6825_v7 = vadd.f32 %v6824_v3, %v6725_v50 }
 0x353   : > { %v6746_v56 = vpop.f32.mrf.mxu0  ;;  %v6831_v46 = vpop.f32.mrf.mxu1  ;;  %9250 = vmatmul.mubr.f32.gmra.mxu0 %v12278_v36  ;;  %9335 = vmatmul.mubr.f32.gmra.mxu1 %v12254_v45 }
 0x354   : > { %v6747_v14 = vadd.f32 %v6746_v56, %v6646_v51  ;;  %v6832_v12 = vadd.f32 %v6831_v46, %v6731_v59  ;;  %9340 = vmatprep.mubr.f32.mxu1 %v10789_v0  ;;  %9429 = vmatprep.mubr.f32.mxu0 %v10789_v0  ;;  %v9703_v51 = vsub.f32 %v12565_v52, %v13257_v4 }
 0x355   : > { %v6748_v23 = vpop.f32.mrf.mxu0  ;;  %v6833_v26 = vpop.f32.mrf.mxu1 }
 0x356   : > { %v6749_v35 = vadd.f32 %v6748_v23, %v6648_v42  ;;  %v6834_v44 = vadd.f32 %v6833_v26, %v6733_v8  ;;  %v9704_v23 = vand.u32 4294901760, %v9703_v51 }
 0x357   : > { %v6840_v13 = vpop.f32.mrf.mxu1  ;;  %v6927_v50 = vpop.f32.mrf.mxu0  ;;  %9344 = vmatmul.mubr.f32.gmra.mxu1 %v12275_v47  ;;  %9431 = vmatmul.mubr.f32.vlgmr.msra.gmra.mxu0 %v12209_v38 }
 0x358   : > { %v6841_v11 = vadd.f32 %v6840_v13, %v6739_v43  ;;  %v6928_v10 = vadd.f32 %v6927_v50, %v6823_v55  ;;  %9349 = vmatprep.mubr.f32.mxu1 %v10789_v0  ;;  %9436 = vmatprep.mubr.f32.mxu0 %v10789_v0 }
 0x359   : > { %v6842_v59 = vpop.f32.mrf.mxu1  ;;  %v6929_v3 = vpop.f32.mrf.mxu0  ;;  %9586 = vmatpush1.msra.mxu0 %v12558_v19 }
 0x35a   : > { %v6843_v42 = vadd.f32 %v6842_v59, %v6741_v2  ;;  %v6930_v8 = vadd.f32 %v6929_v3, %v6825_v7  ;;  %9799 = vmatprep.subr.mxu0 %v12536_v15 }
 0x35b   : > { %v6849_v56 = vpop.f32.mrf.mxu1  ;;  %v6934_v46 = vpop.f32.mrf.mxu0  ;;  %9353 = vmatmul.mubr.f32.gmra.mxu1 %v12293_v48  ;;  %9438 = vmatmul.mubr.f32.gmra.mxu0 %v12223_v62 }
 0x35c   : > { %v6850_v43 = vadd.f32 %v6849_v56, %v6747_v14  ;;  %v6935_v55 = vadd.f32 %v6934_v46, %v6832_v12  ;;  %9443 = vmatprep.mubr.f32.mxu0 %v10789_v0  ;;  %9524 = vmatprep.mubr.f32.mxu1 %v10789_v0 }
 0x35d   : > { %v6851_v26 = vpop.f32.mrf.mxu1  ;;  %v6936_v13 = vpop.f32.mrf.mxu0 }
 0x35e   : > { %v6852_v50 = vadd.f32 %v6851_v26, %v6749_v35  ;;  %v6937_v2 = vadd.f32 %v6936_v13, %v6834_v44 }
 0x35f   : > { %v6941_v7 = vpop.f32.mrf.mxu0  ;;  %v7022_v59 = vpop.f32.mrf.mxu1  ;;  %9445 = vmatmul.mubr.f32.gmra.mxu0 %v12244_v27  ;;  %9526 = vmatmul.mubr.f32.vlgmr.msra.gmra.mxu1 %v12209_v38 }
 0x360   : > { %v6942_v3 = vadd.f32 %v6941_v7, %v6841_v11  ;;  %v7023_v4 = vadd.f32 %v7022_v59, %v6928_v10  ;;  %9705 = vmatpush1.msra.mxu1 %v9704_v23  ;;  %9450 = vmatprep.mubr.f32.mxu0 %v10789_v0 }
 0x361   : > { %v6943_v14 = vpop.f32.mrf.mxu0  ;;  %v7024_v12 = vpop.f32.mrf.mxu1  ;;  %9531 = vmatprep.mubr.f32.mxu1 %v10789_v0  ;;  %9899 = vmatprep.subr.mxu1 %v12521_v53 }
 0x362   : > { %v12592_v35 = vadd.f32 %v7023_v4, %v12116_v1  ;;  %v6944_v44 = vadd.f32 %v6943_v14, %v6843_v42  ;;  %v7025_v51 = vadd.f32 %v7024_v12, %v6930_v8 }
 0x363   : > { %v6948_v56 = vpop.f32.mrf.mxu0  ;;  %v7029_v46 = vpop.f32.mrf.mxu1  ;;  %9452 = vmatmul.mubr.f32.gmra.mxu0 %v12259_v58  ;;  %9533 = vmatmul.mubr.f32.gmra.mxu1 %v12223_v62 }
 0x364   : > { %13296 = vst [vmem:[#allocation19_spill] sm:$0xff] %v12592_v35  ;;  %v12597_v11 = vadd.f32 %v7025_v51, %v12121_v20  ;;  %v6949_v10 = vadd.f32 %v6948_v56, %v6850_v43  ;;  %v7030_v23 = vadd.f32 %v7029_v46, %v6935_v55  ;;  %9538 = vmatprep.mubr.f32.mxu1 %v10789_v0 }
 0x365   : > { %9619 = vmatprep.mubr.f32.mxu0 %v10789_v0  ;;  %v6950_v26 = vpop.f32.mrf.mxu0  ;;  %v7031_v1 = vpop.f32.mrf.mxu1 }
 0x366   : > { %13297 = vst [vmem:[#allocation20_spill] sm:$0xff] %v12597_v11  ;;  %v12602_v4 = vadd.f32 %v7030_v23, %v12125_v28  ;;  %v6951_v42 = vadd.f32 %v6950_v26, %v6852_v50  ;;  %v7032_v8 = vadd.f32 %v7031_v1, %v6937_v2  ;;  %v13301_v2 = vand.u32 4294901760, %v12536_v15 }
 0x367   : > { %v7036_v13 = vpop.f32.mrf.mxu1  ;;  %v7121_v7 = vpop.f32.mrf.mxu0  ;;  %9540 = vmatmul.mubr.f32.gmra.mxu1 %v12244_v27  ;;  %9625 = vmatmul.mubr.f32.vlgmr.msra.gmra.mxu0 %v12270_v37 }
 0x368   : > { %13298 = vst [vmem:[#allocation21_spill] sm:$0xff] %v12602_v4  ;;  %v12607_v20 = vadd.f32 %v7032_v8, %v12129_v25  ;;  %v7037_v43 = vadd.f32 %v7036_v13, %v6942_v3  ;;  %9545 = vmatprep.mubr.f32.mxu1 %v10789_v0  ;;  %9630 = vmatprep.mubr.f32.mxu0 %v10789_v0  ;;  %v13302_v25 = vld [vmem:[#allocation10_spill] sm:$0xff] }
 0x369   : > { %v7038_v55 = vpop.f32.mrf.mxu1  ;;  %v7123_v59 = vpop.f32.mrf.mxu0  ;;  %9802 = vmatpush1.msra.mxu0 %v12565_v52 }
 0x36a   : > { %13299 = vst [vmem:[#allocation22_spill] sm:$0xff] %v12607_v20  ;;  %v12613_v28 = vadd.f32 %v7037_v43, %v12133_v5  ;;  %v7039_v50 = vadd.f32 %v7038_v55, %v6944_v44  ;;  %10004 = vmatprep.subr.mxu0 %v13301_v2  ;;  %v13304_v44 = vld [vmem:[#allocation5_spill] sm:$0xff] }
 0x36b   : > { %v7043_v37 = vpop.f32.mrf.mxu1  ;;  %v7132_v14 = vpop.f32.mrf.mxu0  ;;  %9547 = vmatmul.mubr.f32.gmra.mxu1 %v12259_v58  ;;  %9636 = vmatmul.mubr.f32.gmra.mxu0 %v12288_v17  ;;  %v13306_v17 = vld [vmem:[#allocation11_spill] sm:$0xff] }
 0x36c   : > { %13300 = vst [vmem:[#allocation23_spill] sm:$0xff] %v12613_v28  ;;  %v12620_v3 = vadd.f32 %v7039_v50, %v13302_v25  ;;  %v7044_v12 = vadd.f32 %v7043_v37, %v6949_v10  ;;  %9641 = vmatprep.mubr.f32.mxu0 %v10789_v0  ;;  %9738 = vmatprep.mubr.f32.mxu1 %v10789_v0  ;;  %v13308_v25 = vand.u32 4294901760, %v12565_v52 }
 0x36d   : > { %v7045_v5 = vpop.f32.mrf.mxu1  ;;  %v7134_v51 = vpop.f32.mrf.mxu0 }
 0x36e   : > { %13303 = vst [vmem:[#allocation10_spill] sm:$0xff] %v12620_v3  ;;  %v12625_v56 = vadd.f32 %v7044_v12, %v13304_v44  ;;  %v7046_v15 = vadd.f32 %v7045_v5, %v6951_v42 }
 0x36f   : > { %v7143_v46 = vpop.f32.mrf.mxu0  ;;  %v7236_v23 = vpop.f32.mrf.mxu1  ;;  %9647 = vmatmul.mubr.f32.gmra.mxu0 %v12307_v39  ;;  %9740 = vmatmul.mubr.f32.vlgmr.msra.gmra.mxu1 %v12209_v38 }
 0x370   : > { %13305 = vst [vmem:[#allocation5_spill] sm:$0xff] %v12625_v56  ;;  %v12630_v26 = vadd.f32 %v7046_v15, %v13306_v17  ;;  %v7237_v10 = vadd.f32 %v7236_v23, %v7121_v7  ;;  %9901 = vmatpush1.msra.mxu1 %v12558_v19  ;;  %9652 = vmatprep.mubr.f32.mxu0 %v10789_v0 }
 0x371   : > { %v7145_v1 = vpop.f32.mrf.mxu0  ;;  %v7238_v8 = vpop.f32.mrf.mxu1  ;;  %9745 = vmatprep.mubr.f32.mxu1 %v10789_v0  ;;  %10101 = vmatprep.subr.mxu1 %v12521_v53 }
 0x372   : > { %13307 = vst [vmem:[#allocation11_spill] sm:$0xff] %v12630_v26  ;;  %v7239_v42 = vadd.f32 %v7238_v8, %v7123_v59 }
 0x373   : > { %v7154_v13 = vpop.f32.mrf.mxu0  ;;  %v7243_v43 = vpop.f32.mrf.mxu1  ;;  %9658 = vmatmul.mubr.f32.gmra.mxu0 %v12321_v9  ;;  %9747 = vmatmul.mubr.f32.gmra.mxu1 %v12223_v62 }
 0x374   : > { %v7244_v39 = vadd.f32 %v7243_v43, %v7132_v14  ;;  %9752 = vmatprep.mubr.f32.mxu1 %v10789_v0  ;;  %9835 = vmatprep.mubr.f32.mxu0 %v10789_v0 }
 0x375   : > { %v7156_v7 = vpop.f32.mrf.mxu0  ;;  %v7245_v55 = vpop.f32.mrf.mxu1 }
 0x376   : > { %v7246_v50 = vadd.f32 %v7245_v55, %v7134_v51 }
 0x377   : > { %v7250_v2 = vpop.f32.mrf.mxu1  ;;  %v7334_v37 = vpop.f32.mrf.mxu0  ;;  %9754 = vmatmul.mubr.f32.gmra.mxu1 %v12244_v27  ;;  %9838 = vmatmul.mubr.f32.vlgmr.msra.gmra.mxu0 %v12221_v32 }
 0x378   : > { %v7251_v53 = vadd.f32 %v7250_v2, %v7143_v46  ;;  %v7335_v59 = vadd.f32 %v7334_v37, %v7237_v10  ;;  %9759 = vmatprep.mubr.f32.mxu1 %v10789_v0  ;;  %9843 = vmatprep.mubr.f32.mxu0 %v10789_v0 }
 0x379   : > { %v7252_v9 = vpop.f32.mrf.mxu1  ;;  %v7336_v14 = vpop.f32.mrf.mxu0  ;;  %10008 = vmatpush1.msra.mxu0 %v13308_v25 }
 0x37a   : > { %v7253_v12 = vadd.f32 %v7252_v9, %v7145_v1  ;;  %v7337_v5 = vadd.f32 %v7336_v14, %v7239_v42 }
 0x37b   : > { %v7257_v51 = vpop.f32.mrf.mxu1  ;;  %v7342_v44 = vpop.f32.mrf.mxu0  ;;  %9761 = vmatmul.mubr.f32.gmra.mxu1 %v12259_v58  ;;  %9846 = vmatmul.mubr.f32.gmra.mxu0 %v12242_v40 }
 0x37c   : > { %v7258_v32 = vadd.f32 %v7257_v51, %v7154_v13  ;;  %v7343_v15 = vadd.f32 %v7342_v44, %v7244_v39  ;;  %9851 = vmatprep.mubr.f32.mxu0 %v10789_v0  ;;  %9934 = vmatprep.mubr.f32.mxu1 %v10789_v0 }
 0x37d   : > { %v7259_v46 = vpop.f32.mrf.mxu1  ;;  %v7344_v23 = vpop.f32.mrf.mxu0 }
 0x37e   : > { %v7260_v17 = vadd.f32 %v7259_v46, %v7156_v7  ;;  %v7345_v10 = vadd.f32 %v7344_v23, %v7246_v50 }
 0x37f   : > { %v7350_v52 = vpop.f32.mrf.mxu0  ;;  %v7434_v8 = vpop.f32.mrf.mxu1  ;;  %9854 = vmatmul.mubr.f32.gmra.mxu0 %v12257_v6  ;;  %9938 = vmatmul.mubr.f32.vlgmr.msra.gmra.mxu1 %v12239_v61 }
 0x380   : > { %v7351_v1 = vadd.f32 %v7350_v52, %v7251_v53  ;;  %v7435_v42 = vadd.f32 %v7434_v8, %v7335_v59  ;;  %10103 = vmatpush1.msra.mxu1 %v12558_v19  ;;  %9859 = vmatprep.mubr.f32.mxu0 %v10789_v0 }
 0x381   : > { %v7352_v40 = vpop.f32.mrf.mxu0  ;;  %v7436_v13 = vpop.f32.mrf.mxu1  ;;  %9943 = vmatprep.mubr.f32.mxu1 %v10789_v0 }
 0x382   : > { %v7353_v43 = vadd.f32 %v7352_v40, %v7253_v12  ;;  %v7437_v39 = vadd.f32 %v7436_v13, %v7337_v5 }
 0x383   : > { %v7358_v7 = vpop.f32.mrf.mxu0  ;;  %v7443_v55 = vpop.f32.mrf.mxu1  ;;  %9862 = vmatmul.mubr.f32.gmra.mxu0 %v12278_v36  ;;  %9947 = vmatmul.mubr.f32.gmra.mxu1 %v12254_v45 }
 0x384   : > { %v7359_v6 = vadd.f32 %v7358_v7, %v7258_v32  ;;  %v7444_v61 = vadd.f32 %v7443_v55, %v7343_v15  ;;  %9952 = vmatprep.mubr.f32.mxu1 %v10789_v0  ;;  %10041 = vmatprep.mubr.f32.mxu0 %v10789_v0 }
 0x385   : > { %v7360_v19 = vpop.f32.mrf.mxu0  ;;  %v7445_v50 = vpop.f32.mrf.mxu1 }
 0x386   : > { %v7361_v2 = vadd.f32 %v7360_v19, %v7260_v17  ;;  %v7446_v37 = vadd.f32 %v7445_v50, %v7345_v10 }
 0x387   : > { %v7452_v53 = vpop.f32.mrf.mxu1  ;;  %v7539_v59 = vpop.f32.mrf.mxu0  ;;  %9956 = vmatmul.mubr.f32.gmra.mxu1 %v12275_v47  ;;  %10043 = vmatmul.mubr.f32.vlgmr.msra.gmra.mxu0 %v12209_v38 }
 0x388   : > { %v7453_v9 = vadd.f32 %v7452_v53, %v7351_v1  ;;  %v7540_v36 = vadd.f32 %v7539_v59, %v7435_v42  ;;  %9961 = vmatprep.mubr.f32.mxu1 %v10789_v0  ;;  %10048 = vmatprep.mubr.f32.mxu0 %v10789_v0  ;;  %v13309_v42 = vld [vmem:[#allocation6_spill] sm:$0xff] }
 0x389   : > { %v7454_v45 = vpop.f32.mrf.mxu1  ;;  %v7541_v14 = vpop.f32.mrf.mxu0 }
 0x38a   : > { %v7455_v25 = vadd.f32 %v7454_v45, %v7353_v43  ;;  %v7542_v12 = vadd.f32 %v7541_v14, %v7437_v39  ;;  %v13315_v45 = vld [vmem:[#allocation9_spill] sm:$0xff] }
 0x38b   : > { %v7461_v5 = vpop.f32.mrf.mxu1  ;;  %v7546_v51 = vpop.f32.mrf.mxu0  ;;  %9965 = vmatmul.mubr.f32.gmra.mxu1 %v12293_v48  ;;  %10050 = vmatmul.mubr.f32.gmra.mxu0 %v12223_v62 }
 0x38c   : > { %v7462_v44 = vadd.f32 %v7461_v5, %v7359_v6  ;;  %v7547_v47 = vadd.f32 %v7546_v51, %v7444_v61  ;;  %10055 = vmatprep.mubr.f32.mxu0 %v10789_v0  ;;  %10136 = vmatprep.mubr.f32.mxu1 %v10789_v0  ;;  %v13317_v5 = vld [vmem:[#allocation12_spill] sm:$0xff] }
 0x38d   : > { %v7463_v32 = vpop.f32.mrf.mxu1  ;;  %v7548_v15 = vpop.f32.mrf.mxu0 }
 0x38e   : > { %v7464_v46 = vadd.f32 %v7463_v32, %v7361_v2  ;;  %v7549_v23 = vadd.f32 %v7548_v15, %v7446_v37  ;;  %v13313_v2 = vld [vmem:[#allocation8_spill] sm:$0xff]  ;;  %v13319_v15 = vld [vmem:[#allocation13_spill] sm:$0xff] }
 0x38f   : > { %v7553_v17 = vpop.f32.mrf.mxu0  ;;  %v7634_v10 = vpop.f32.mrf.mxu1  ;;  %10057 = vmatmul.mubr.f32.gmra.mxu0 %v12244_v27  ;;  %10138 = vmatmul.mubr.f32.vlgmr.msra.gmra.mxu1 %v12209_v38  ;;  %v13311_v38 = vld [vmem:[#allocation7_spill] sm:$0xff] }
 0x390   : > { %v7554_v52 = vadd.f32 %v7553_v17, %v7453_v9  ;;  %v7635_v48 = vadd.f32 %v7634_v10, %v7540_v36  ;;  %10062 = vmatprep.mubr.f32.mxu0 %v10789_v0  ;;  %10143 = vmatprep.mubr.f32.mxu1 %v10789_v0  ;;  %v13321_v10 = vld [vmem:[#allocation14_spill] sm:$0xff] }
 0x391   : > { %v7555_v8 = vpop.f32.mrf.mxu0  ;;  %v7636_v1 = vpop.f32.mrf.mxu1 }
 0x392   : > { %v12672_v40 = vadd.f32 %v7635_v48, %v13309_v42  ;;  %v7556_v13 = vadd.f32 %v7555_v8, %v7455_v25  ;;  %v7637_v43 = vadd.f32 %v7636_v1, %v7542_v12  ;;  %v13323_v1 = vld [vmem:[#allocation15_spill] sm:$0xff] }
 0x393   : > { %v7560_v39 = vpop.f32.mrf.mxu0  ;;  %v7641_v7 = vpop.f32.mrf.mxu1  ;;  %10064 = vmatmul.mubr.f32.gmra.mxu0 %v12259_v58  ;;  %10145 = vmatmul.mubr.f32.gmra.mxu1 %v12223_v62 }
 0x394   : > { %13310 = vst [vmem:[#allocation6_spill] sm:$0xff] %v12672_v40  ;;  %v12677_v55 = vadd.f32 %v7637_v43, %v13311_v38  ;;  %v7561_v6 = vadd.f32 %v7560_v39, %v7462_v44  ;;  %v7642_v61 = vadd.f32 %v7641_v7, %v7547_v47  ;;  %10150 = vmatprep.mubr.f32.mxu1 %v10789_v0 }
 0x395   : > { %v7562_v19 = vpop.f32.mrf.mxu0  ;;  %v7643_v50 = vpop.f32.mrf.mxu1 }
 0x396   : > { %13312 = vst [vmem:[#allocation7_spill] sm:$0xff] %v12677_v55  ;;  %v12681_v37 = vadd.f32 %v7642_v61, %v13313_v2  ;;  %v7563_v53 = vadd.f32 %v7562_v19, %v7464_v46  ;;  %v7644_v59 = vadd.f32 %v7643_v50, %v7549_v23 }
 0x397   : > { %v7648_v9 = vpop.f32.mrf.mxu1  ;;  %v7790_v36 = vpop.f32.mrf.mxu0  ;;  %10152 = vmatmul.mubr.f32.gmra.mxu1 %v12244_v27 }
 0x398   : > { %13314 = vst [vmem:[#allocation8_spill] sm:$0xff] %v12681_v37  ;;  %v12685_v62 = vadd.f32 %v7644_v59, %v13315_v45  ;;  %v7649_v14 = vadd.f32 %v7648_v9, %v7554_v52  ;;  %10157 = vmatprep.mubr.f32.mxu1 %v10789_v0 }
 0x399   : > { %v7650_v25 = vpop.f32.mrf.mxu1  ;;  %v7792_v12 = vpop.f32.mrf.mxu0 }
 0x39a   : > { %13316 = vst [vmem:[#allocation9_spill] sm:$0xff] %v12685_v62  ;;  %v12689_v51 = vadd.f32 %v7649_v14, %v13317_v5  ;;  %v7651_v44 = vadd.f32 %v7650_v25, %v7556_v13 }
 0x39b   : > { %v7655_v47 = vpop.f32.mrf.mxu1  ;;  %v7801_v32 = vpop.f32.mrf.mxu0  ;;  %10159 = vmatmul.mubr.f32.gmra.mxu1 %v12259_v58 }
 0x39c   : > { %13318 = vst [vmem:[#allocation12_spill] sm:$0xff] %v12689_v51  ;;  %v12693_v46 = vadd.f32 %v7651_v44, %v13319_v15  ;;  %v7656_v27 = vadd.f32 %v7655_v47, %v7561_v6 }
 0x39d   : > { %v7657_v23 = vpop.f32.mrf.mxu1  ;;  %v7803_v17 = vpop.f32.mrf.mxu0 }
 0x39e   : > { %13320 = vst [vmem:[#allocation13_spill] sm:$0xff] %v12693_v46  ;;  %v12696_v52 = vadd.f32 %v7656_v27, %v13321_v10  ;;  %v7658_v0 = vadd.f32 %v7657_v23, %v7563_v53 }
 0x39f   : > { %v7812_v48 = vpop.f32.mrf.mxu0  ;;  %v7905_v8 = vpop.f32.mrf.mxu1 }
 0x3a0   : > { %13322 = vst [vmem:[#allocation14_spill] sm:$0xff] %v12696_v52  ;;  %v12699_v42 = vadd.f32 %v7658_v0, %v13323_v1  ;;  %v7906_v0 = vadd.f32 %v7905_v8, %v7790_v36 }
 0x3a1   : > { %v7814_v13 = vpop.f32.mrf.mxu0  ;;  %v7907_v43 = vpop.f32.mrf.mxu1 }
 0x3a2   : > { %13324 = vst [vmem:[#allocation15_spill] sm:$0xff] %v12699_v42  ;;  %v7908_v52 = vadd.f32 %v7907_v43, %v7792_v12 }
 0x3a3   : > { %v7823_v39 = vpop.f32.mrf.mxu0  ;;  %v7912_v7 = vpop.f32.mrf.mxu1 }
 0x3a4   : > { %v7913_v40 = vadd.f32 %v7912_v7, %v7801_v32 }
 0x3a5   : > { %v7825_v58 = vpop.f32.mrf.mxu0  ;;  %v7914_v38 = vpop.f32.mrf.mxu1 }
 0x3a6   : > { %v7915_v20 = vadd.f32 %v7914_v38, %v7803_v17 }
 0x3a7   : > { %v7919_v61 = vpop.f32.mrf.mxu1  ;;  %v8003_v19 = vpop.f32.mrf.mxu0 }
 0x3a8   : > { %v8004_v46 = vadd.f32 %v8003_v19, %v7906_v0  ;;  %v7920_v29 = vadd.f32 %v7919_v61, %v7812_v48 }
 0x3a9   : > { %v7921_v6 = vpop.f32.mrf.mxu1  ;;  %v8005_v50 = vpop.f32.mrf.mxu0 }
 0x3aa   : > { %v8006_v37 = vadd.f32 %v8005_v50, %v7908_v52  ;;  %v7922_v19 = vadd.f32 %v7921_v6, %v7814_v13 }
 0x3ab   : > { %v7926_v2 = vpop.f32.mrf.mxu1  ;;  %v8011_v59 = vpop.f32.mrf.mxu0 }
 0x3ac   : > { %v8012_v4 = vadd.f32 %v8011_v59, %v7913_v40 }
 0x3ad   : > { %v7928_v9 = vpop.f32.mrf.mxu1  ;;  %v8013_v45 = vpop.f32.mrf.mxu0 }
 0x3ae   : > { %v8014_v8 = vadd.f32 %v8013_v45, %v7915_v20  ;;  %v7929_v20 = vadd.f32 %v7928_v9, %v7825_v58 }
 0x3af   : > { %v8019_v53 = vpop.f32.mrf.mxu0  ;;  %v8103_v14 = vpop.f32.mrf.mxu1 }
 0x3b0   : > { %v8104_v55 = vadd.f32 %v8103_v14, %v8004_v46  ;;  %v8020_v0 = vadd.f32 %v8019_v53, %v7920_v29 }
 0x3b1   : > { %v8021_v25 = vpop.f32.mrf.mxu0  ;;  %v8105_v5 = vpop.f32.mrf.mxu1 }
 0x3b2   : > { %v8106_v3 = vadd.f32 %v8105_v5, %v8006_v37  ;;  %v8022_v40 = vadd.f32 %v8021_v25, %v7922_v19 }
 0x3b3   : > { %v8027_v44 = vpop.f32.mrf.mxu0  ;;  %v8112_v47 = vpop.f32.mrf.mxu1 }
 0x3b4   : > { %v8113_v22 = vadd.f32 %v8112_v47, %v8012_v4  ;;  %v7927_v4 = vadd.f32 %v7926_v2, %v7823_v39 }
 0x3b5   : > { %v8029_v15 = vpop.f32.mrf.mxu0  ;;  %v8114_v27 = vpop.f32.mrf.mxu1 }
 0x3b6   : > { %v8115_v52 = vadd.f32 %v8114_v27, %v8014_v8  ;;  %v8028_v13 = vadd.f32 %v8027_v44, %v7927_v4  ;;  %v8030_v38 = vadd.f32 %v8029_v15, %v7929_v20 }
 0x3b7   : > { %v8121_v23 = vpop.f32.mrf.mxu1  ;;  %v8208_v10 = vpop.f32.mrf.mxu0 }
 0x3b8   : > { %v8209_v28 = vadd.f32 %v8208_v10, %v8104_v55  ;;  %v8122_v7 = vadd.f32 %v8121_v23, %v8020_v0 }
 0x3b9   : > { %v8123_v1 = vpop.f32.mrf.mxu1  ;;  %v8210_v42 = vpop.f32.mrf.mxu0 }
 0x3ba   : > { %v8211_v41 = vadd.f32 %v8210_v42, %v8106_v3  ;;  %v8124_v42 = vadd.f32 %v8123_v1, %v8022_v40 }
 0x3bb   : > { %v8130_v51 = vpop.f32.mrf.mxu1  ;;  %v8215_v62 = vpop.f32.mrf.mxu0 }
 0x3bc   : > { %v8216_v37 = vadd.f32 %v8215_v62, %v8113_v22 }
 0x3bd   : > { %v8132_v26 = vpop.f32.mrf.mxu1  ;;  %v8217_v56 = vpop.f32.mrf.mxu0 }
 0x3be   : > { %v8133_v59 = vadd.f32 %v8132_v26, %v8030_v38 }
 0x3bf   : > { %v8222_v11 = vpop.f32.mrf.mxu0  ;;  %v8303_v35 = vpop.f32.mrf.mxu1 }
 0x3c0   : > { %v8304_v36 = vadd.f32 %v8303_v35, %v8209_v28  ;;  %v8218_v28 = vadd.f32 %v8217_v56, %v8115_v52 }
 0x3c1   : > { %v8224_v12 = vpop.f32.mrf.mxu0  ;;  %v8305_v43 = vpop.f32.mrf.mxu1 }
 0x3c2   : > { %v12702_v46 = vadd.f32 %v8304_v36, %v12384_v31  ;;  %v8306_v32 = vadd.f32 %v8305_v43, %v8211_v41  ;;  %v8223_v41 = vadd.f32 %v8222_v11, %v8122_v7  ;;  %v8225_v58 = vadd.f32 %v8224_v12, %v8124_v42 }
 0x3c3   : > { %v8229_v55 = vpop.f32.mrf.mxu0  ;;  %v8310_v17 = vpop.f32.mrf.mxu1  ;;  %v8131_v11 = vadd.f32 %v8130_v51, %v8028_v13 }
 0x3c4   : > { %v10229_v3 = vmul.f32 %v12702_v46, %v12702_v46  ;;  %v12707_v35 = vadd.f32 %v8306_v32, %v12389_v18  ;;  %v8311_v29 = vadd.f32 %v8310_v17, %v8216_v37 }
 0x3c5   : > { %v8231_v48 = vpop.f32.mrf.mxu0  ;;  %v8312_v31 = vpop.f32.mrf.mxu1  ;;  %v8230_v47 = vadd.f32 %v8229_v55, %v8131_v11 }
 0x3c6   : > { %v10261_v22 = vmul.f32 %v10229_v3, %v12702_v46  ;;  %v10230_v62 = vmul.f32 %v12707_v35, %v12707_v35  ;;  %v12713_v61 = vadd.f32 %v8311_v29, %v12394_v16  ;;  %v8313_v18 = vadd.f32 %v8312_v31, %v8218_v28 }
 0x3c7   : > { %v8317_v6 = vpop.f32.mrf.mxu1  ;;  %v12715_v39 = vpop.f32.mrf.mxu0  ;;  %v8232_v10 = vadd.f32 %v8231_v48, %v8133_v59 }
 0x3c8   : > { %v10293_v56 = vmul.f32 0.044715, %v10261_v22  ;;  %v10262_v50 = vmul.f32 %v10230_v62, %v12707_v35  ;;  %v8318_v2 = vadd.f32 %v8317_v6, %v8223_v41  ;;  %v10237_v9 = vmul.f32 %v12713_v61, %v12713_v61 }
 0x3c9   : > { %v12721_v45 = vadd.f32 %v8313_v18, %v12399_v57  ;;  %v8319_v53 = vpop.f32.mrf.mxu1  ;;  %v12723_v16 = vpop.f32.mrf.mxu0 }
 0x3ca   : > { %v10325_v14 = vadd.f32 %v10293_v56, %v12702_v46  ;;  %v10294_v25 = vmul.f32 0.044715, %v10262_v50  ;;  %v12727_v5 = vadd.f32 %v8318_v2, %v12405_v63  ;;  %v8320_v44 = vadd.f32 %v8319_v53, %v8225_v58 }
 0x3cb   : > { %v10269_v51 = vmul.f32 %v10237_v9, %v12713_v61  ;;  %v10238_v26 = vmul.f32 %v12721_v45, %v12721_v45  ;;  %v8324_v15 = vpop.f32.mrf.mxu1  ;;  %v12732_v27 = vpop.f32.mrf.mxu0 }
 0x3cc   : > { %v10357_v57 = vmul.f32 0.7978846, %v10325_v14  ;;  %v10326_v23 = vadd.f32 %v10294_v25, %v12707_v35  ;;  %v10245_v1 = vmul.f32 %v12727_v5, %v12727_v5  ;;  %v12739_v8 = vadd.f32 %v8320_v44, %v12413_v33 }
 0x3cd   : > { %v10301_v36 = vmul.f32 0.044715, %v10269_v51  ;;  %v10270_v63 = vmul.f32 %v10238_v26, %v12721_v45  ;;  %v8325_v12 = vadd.f32 %v8324_v15, %v8230_v47  ;;  %v8326_v43 = vpop.f32.mrf.mxu1  ;;  %v12741_v19 = vpop.f32.mrf.mxu0 }
 0x3ce   : > { %10663 = vtanh.f32 %v10357_v57  ;;  %v10358_v0 = vmul.f32 0.7978846, %v10326_v23  ;;  %v10277_v32 = vmul.f32 %v10245_v1, %v12727_v5  ;;  %v8327_v52 = vadd.f32 %v8326_v43, %v8232_v10 }
 0x3cf   : > { %v10333_v37 = vadd.f32 %v10301_v36, %v12713_v61  ;;  %v10302_v55 = vmul.f32 0.044715, %v10270_v63  ;;  %v10246_v17 = vmul.f32 %v12739_v8, %v12739_v8  ;;  %v12747_v40 = vpop.f32.mrf.mxu0  ;;  %v12749_v7 = vpop.f32.mrf.mxu1  ;;  %v12752_v3 = vadd.f32 %v8325_v12, %v12420_v60 }
 0x3d0   : > { %10665 = vtanh.f32 %v10358_v0  ;;  %v10309_v33 = vmul.f32 0.044715, %v10277_v32  ;;  %v12755_v4 = vadd.f32 %v8327_v52, %v12425_v34  ;;  %v10197_v10 = vmul.f32 0.5, %v12702_v46 }
 0x3d1   : > { %v10365_v20 = vmul.f32 0.7978846, %v10333_v37  ;;  %v10334_v28 = vadd.f32 %v10302_v55, %v12721_v45  ;;  %v10278_v29 = vmul.f32 %v10246_v17, %v12739_v8  ;;  %v12759_v48 = vpop.f32.mrf.mxu0  ;;  %v12761_v31 = vpop.f32.mrf.mxu1  ;;  %v10253_v41 = vmul.f32 %v12752_v3, %v12752_v3 }
 0x3d2   : > { %v10341_v42 = vadd.f32 %v10309_v33, %v12727_v5  ;;  %v10254_v34 = vmul.f32 %v12755_v4, %v12755_v4  ;;  %v10198_v0 = vmul.f32 0.5, %v12707_v35  ;;  %v10205_v17 = vmul.f32 0.5, %v12713_v61 }
 0x3d3   : > { %10667 = vtanh.f32 %v10365_v20  ;;  %v10366_v60 = vmul.f32 0.7978846, %v10334_v28  ;;  %v10310_v22 = vmul.f32 0.044715, %v10278_v29  ;;  %v12768_v62 = vpop.f32.mrf.mxu0  ;;  %v12770_v13 = vpop.f32.mrf.mxu1  ;;  %v10285_v18 = vmul.f32 %v10253_v41, %v12752_v3 }
 0x3d4   : > { %v10373_v38 = vmul.f32 0.7978846, %v10341_v42  ;;  %v10286_v56 = vmul.f32 %v10254_v34, %v12755_v4  ;;  %v10206_v41 = vmul.f32 0.5, %v12721_v45 }
 0x3d5   : > { %10669 = vtanh.f32 %v10366_v60  ;;  %v10342_v6 = vadd.f32 %v10310_v22, %v12739_v8  ;;  %v12775_v58 = vpop.f32.mrf.mxu0  ;;  %v12777_v50 = vpop.f32.mrf.mxu1  ;;  %v10317_v2 = vmul.f32 0.044715, %v10285_v18 }
 0x3d6   : > { %10671 = vtanh.f32 %v10373_v38  ;;  %v10318_v59 = vmul.f32 0.044715, %v10286_v56  ;;  %v10213_v38 = vmul.f32 0.5, %v12727_v5 }
 0x3d7   : > { %v10374_v11 = vmul.f32 0.7978846, %v10342_v6  ;;  %v12780_v9 = vpop.f32.mrf.mxu1  ;;  %v12782_v53 = vpop.f32.mrf.mxu0  ;;  %v10349_v14 = vadd.f32 %v10317_v2, %v12752_v3 }
 0x3d8   : > { %v10350_v25 = vadd.f32 %v10318_v59, %v12755_v4  ;;  %v10214_v59 = vmul.f32 0.5, %v12739_v8 }
 0x3d9   : > { %10673 = vtanh.f32 %v10374_v11  ;;  %v12786_v44 = vpop.f32.mrf.mxu1  ;;  %v12788_v47 = vpop.f32.mrf.mxu0  ;;  %v10381_v51 = vmul.f32 0.7978846, %v10349_v14 }
 0x3da   : > { %v10382_v15 = vmul.f32 0.7978846, %v10350_v25 }
 0x3db   : > { %v10664_v26 = vpop.eup %10663  ;;  %v12792_v57 = vpop.f32.mrf.mxu1  ;;  %10675 = vtanh.f32 %v10381_v51  ;;  %v8518_v51 = vadd.f32 %v12749_v7, %v12715_v39 }
 0x3dc   : > { %v12794_v23 = vpop.f32.mrf.mxu0  ;;  %v10421_v1 = vadd.f32 1.0, %v10664_v26  ;;  %10677 = vtanh.f32 %v10382_v15 }
 0x3dd   : > { %v10666_v36 = vpop.eup %10665  ;;  %v12797_v63 = vpop.f32.mrf.mxu1  ;;  %v8616_v8 = vadd.f32 %v12782_v53, %v8518_v51 }
 0x3de   : > { %v12799_v12 = vpop.f32.mrf.mxu0  ;;  %v10453_v43 = vmul.f32 %v10421_v1, %v10197_v10  ;;  %v10422_v32 = vadd.f32 1.0, %v10666_v36  ;;  %v10221_v36 = vmul.f32 0.5, %v12752_v3  ;;  %v8525_v3 = vadd.f32 %v12770_v13, %v12732_v27 }
 0x3df   : > { %v8715_v37 = vpop.f32.mrf.mxu1 }
 0x3e0   : > { %v12802_v52 = vpop.f32.mrf.mxu0  ;;  %v10668_v55 = vpop.eup %10667  ;;  %10485 = vst [vmem:[%s12804_s26] sm:$0xff] %v10453_v43  ;;  %v10454_v46 = vmul.f32 %v10422_v32, %v10198_v0  ;;  %v8520_v0 = vadd.f32 %v12761_v31, %v12723_v16  ;;  %v10222_v32 = vmul.f32 0.5, %v12755_v4  ;;  %v8527_v4 = vadd.f32 %v12777_v50, %v12741_v19 }
 0x3e1   : > { %v10429_v33 = vadd.f32 1.0, %v10668_v55  ;;  %v8717_v28 = vpop.f32.mrf.mxu1  ;;  %v8624_v53 = vadd.f32 %v12794_v23, %v8525_v3 }
 0x3e2   : > { %v12808_v20 = vpop.f32.mrf.mxu0  ;;  %v10670_v29 = vpop.eup %10669  ;;  %10486 = vst [vmem:[%s12804_s26 + $0x8] sm:$0xff] %v10454_v46  ;;  %v8626_v27 = vadd.f32 %v12799_v12, %v8527_v4  ;;  %v13325_v4 = vld [vmem:[#allocation16_spill] sm:$0xff] }
 0x3e3   : > { %v10672_v35 = vpop.eup %10671  ;;  %v10461_v42 = vmul.f32 %v10429_v33, %v10205_v17  ;;  %v10430_v60 = vadd.f32 1.0, %v10670_v29  ;;  %v8724_v34 = vpop.f32.mrf.mxu1  ;;  %v8618_v17 = vadd.f32 %v12788_v47, %v8520_v0  ;;  %v8716_v33 = vadd.f32 %v8715_v37, %v8616_v8 }
 0x3e4   : > { %v12812_v22 = vpop.f32.mrf.mxu0  ;;  %v10437_v18 = vadd.f32 1.0, %v10672_v35  ;;  %v8532_v47 = vadd.f32 %v12780_v9, %v12747_v40  ;;  %v8725_v13 = vadd.f32 %v8724_v34, %v8624_v53 }
 0x3e5   : > { %10493 = vst [vmem:[%s12804_s26 + $0x40] sm:$0xff] %v10461_v42  ;;  %v10462_v61 = vmul.f32 %v10430_v60, %v10206_v41  ;;  %v8726_v56 = vpop.f32.mrf.mxu1  ;;  %v8718_v16 = vadd.f32 %v8717_v28, %v8618_v17  ;;  %v8534_v28 = vadd.f32 %v12786_v44, %v12759_v48  ;;  %v8539_v48 = vadd.f32 %v12792_v57, %v12768_v62 }
 0x3e6   : > { %v12816_v6 = vpop.f32.mrf.mxu0  ;;  %v10674_v2 = vpop.eup %10673  ;;  %v10469_v11 = vmul.f32 %v10437_v18, %v10213_v38  ;;  %v8727_v23 = vadd.f32 %v8726_v56, %v8626_v27 }
 0x3e7   : > { %10494 = vst [vmem:[%s12804_s26 + $0x48] sm:$0xff] %v10462_v61  ;;  %v10438_v45 = vadd.f32 1.0, %v10674_v2  ;;  %v8733_v14 = vpop.f32.mrf.mxu1  ;;  %v8632_v2 = vadd.f32 %v12802_v52, %v8532_v47  ;;  %v8634_v9 = vadd.f32 %v12808_v20, %v8534_v28 }
 0x3e8   : > { %v8820_v25 = vpop.f32.mrf.mxu0  ;;  %10501 = vst [vmem:[%s12804_s26 + $0x80] sm:$0xff] %v10469_v11  ;;  %v10676_v5 = vpop.eup %10675 }
 0x3e9   : > { %v10470_v26 = vmul.f32 %v10438_v45, %v10214_v59  ;;  %v8735_v15 = vpop.f32.mrf.mxu1  ;;  %v10678_v1 = vpop.eup %10677  ;;  %v10445_v43 = vadd.f32 1.0, %v10676_v5  ;;  %v8821_v31 = vadd.f32 %v8820_v25, %v8716_v33  ;;  %v8734_v45 = vadd.f32 %v8733_v14, %v8632_v2 }
 0x3ea   : > { %v8822_v10 = vpop.f32.mrf.mxu0  ;;  %v10446_v55 = vadd.f32 1.0, %v10678_v1  ;;  %v8736_v51 = vadd.f32 %v8735_v15, %v8634_v9 }
 0x3eb   : > { %10502 = vst [vmem:[%s12804_s26 + $0x88] sm:$0xff] %v10470_v26  ;;  %v8742_v39 = vpop.f32.mrf.mxu1  ;;  %v10477_v46 = vmul.f32 %v10445_v43, %v10221_v36  ;;  %v8823_v37 = vadd.f32 %v8822_v10, %v8718_v16 }
 0x3ec   : > { %v8827_v7 = vpop.f32.mrf.mxu0  ;;  %v10478_v29 = vmul.f32 %v10446_v55, %v10222_v32 }
 0x3ed   : > { %v8744_v35 = vpop.f32.mrf.mxu1  ;;  %10509 = vst [vmem:[%s12804_s26 + $0xc0] sm:$0xff] %v10477_v46  ;;  %v8828_v11 = vadd.f32 %v8827_v7, %v8725_v13 }
 0x3ee   : > { %v8829_v42 = vpop.f32.mrf.mxu0  ;;  %10510 = vst [vmem:[%s12804_s26 + $0xc8] sm:$0xff] %v10478_v29 }
 0x3ef   : > { %v8915_v60 = vpop.f32.mrf.mxu1  ;;  %v8830_v44 = vadd.f32 %v8829_v42, %v8727_v23  ;;  %v13326_v23 = vld [vmem:[#allocation17_spill] sm:$0xff] }
 0x3f0   : > { %v8834_v41 = vpop.f32.mrf.mxu0  ;;  %v8916_v38 = vadd.f32 %v8915_v60, %v8821_v31 }
 0x3f1   : > { %v8917_v61 = vpop.f32.mrf.mxu1  ;;  %v8835_v5 = vadd.f32 %v8834_v41, %v8734_v45 }
 0x3f2   : > { %v8836_v18 = vpop.f32.mrf.mxu0  ;;  %v12844_v19 = vadd.f32 %v8916_v38, %v12488_v30  ;;  %v8918_v50 = vadd.f32 %v8917_v61, %v8823_v37  ;;  %v8541_v30 = vadd.f32 %v12797_v63, %v12775_v58 }
 0x3f3   : > { %v8922_v40 = vpop.f32.mrf.mxu1  ;;  %v8837_v1 = vadd.f32 %v8836_v18, %v8736_v51 }
 0x3f4   : > { %v8841_v59 = vpop.f32.mrf.mxu0  ;;  %v10231_v12 = vmul.f32 %v12844_v19, %v12844_v19  ;;  %v12850_v34 = vadd.f32 %v8918_v50, %v12493_v49  ;;  %v8923_v52 = vadd.f32 %v8922_v40, %v8828_v11  ;;  %v8640_v49 = vadd.f32 %v12812_v22, %v8539_v48 }
 0x3f5   : > { %v8924_v25 = vpop.f32.mrf.mxu1  ;;  %v8642_v26 = vadd.f32 %v12816_v6, %v8541_v30 }
 0x3f6   : > { %v8843_v56 = vpop.f32.mrf.mxu0  ;;  %v10263_v20 = vmul.f32 %v10231_v12, %v12844_v19  ;;  %v10232_v14 = vmul.f32 %v12850_v34, %v12850_v34  ;;  %v12862_v62 = vadd.f32 %v8923_v52, %v12498_v54  ;;  %v8925_v57 = vadd.f32 %v8924_v25, %v8830_v44 }
 0x3f7   : > { %v8929_v58 = vpop.f32.mrf.mxu1  ;;  %v8743_v43 = vadd.f32 %v8742_v39, %v8640_v49  ;;  %v8745_v0 = vadd.f32 %v8744_v35, %v8642_v26 }
 0x3f8   : > { %v12864_v63 = vpop.f32.mrf.mxu0  ;;  %v10295_v10 = vmul.f32 0.044715, %v10263_v20  ;;  %v10264_v15 = vmul.f32 %v10232_v14, %v12850_v34  ;;  %v8930_v36 = vadd.f32 %v8929_v58, %v8835_v5  ;;  %v10239_v8 = vmul.f32 %v12862_v62, %v12862_v62 }
 0x3f9   : > { %v12870_v22 = vadd.f32 %v8925_v57, %v12503_v21  ;;  %v8931_v6 = vpop.f32.mrf.mxu1  ;;  %v8842_v17 = vadd.f32 %v8841_v59, %v8743_v43  ;;  %v8844_v42 = vadd.f32 %v8843_v56, %v8745_v0  ;;  %v13327_v59 = vld [vmem:[#allocation18_spill] sm:$0xff] }
 0x3fa   : > { %v12872_v54 = vpop.f32.mrf.mxu0  ;;  %v10327_v32 = vadd.f32 %v10295_v10, %v12844_v19  ;;  %v10296_v55 = vmul.f32 0.044715, %v10264_v15  ;;  %v12876_v7 = vadd.f32 %v8930_v36, %v12509_v24  ;;  %v8932_v46 = vadd.f32 %v8931_v6, %v8837_v1 }
 0x3fb   : > { %v10271_v39 = vmul.f32 %v10239_v8, %v12862_v62  ;;  %v10240_v33 = vmul.f32 %v12870_v22, %v12870_v22  ;;  %v8936_v29 = vpop.f32.mrf.mxu1 }
 0x3fc   : > { %v12881_v3 = vpop.f32.mrf.mxu0  ;;  %v10359_v21 = vmul.f32 0.7978846, %v10327_v32  ;;  %v10328_v35 = vadd.f32 %v10296_v55, %v12850_v34  ;;  %v10247_v16 = vmul.f32 %v12876_v7, %v12876_v7  ;;  %v12888_v53 = vadd.f32 %v8932_v46, %v13325_v4 }
 0x3fd   : > { %v10303_v31 = vmul.f32 0.044715, %v10271_v39  ;;  %v10272_v24 = vmul.f32 %v10240_v33, %v12870_v22  ;;  %v8937_v41 = vadd.f32 %v8936_v29, %v8842_v17  ;;  %v8938_v60 = vpop.f32.mrf.mxu1  ;;  %v10200_v4 = vmul.f32 0.5, %v12850_v34 }
 0x3fe   : > { %v12890_v47 = vpop.f32.mrf.mxu0  ;;  %10679 = vtanh.f32 %v10359_v21  ;;  %v10360_v37 = vmul.f32 0.7978846, %v10328_v35  ;;  %v10279_v38 = vmul.f32 %v10247_v16, %v12876_v7  ;;  %v8939_v27 = vadd.f32 %v8938_v60, %v8844_v42 }
 0x3ff   : > { %v10335_v13 = vadd.f32 %v10303_v31, %v12862_v62  ;;  %v10304_v18 = vmul.f32 0.044715, %v10272_v24  ;;  %v10248_v61 = vmul.f32 %v12888_v53, %v12888_v53  ;;  %v12898_v2 = vpop.f32.mrf.mxu1  ;;  %v12901_v11 = vadd.f32 %v8937_v41, %v13326_v23 }
 0x400   : > { %v12896_v28 = vpop.f32.mrf.mxu0  ;;  %10681 = vtanh.f32 %v10360_v37  ;;  %v10311_v50 = vmul.f32 0.044715, %v10279_v38  ;;  %v12904_v40 = vadd.f32 %v8939_v27, %v13327_v59  ;;  %v10199_v21 = vmul.f32 0.5, %v12844_v19 }
 0x401   : > { %v10367_v9 = vmul.f32 0.7978846, %v10335_v13  ;;  %v10336_v45 = vadd.f32 %v10304_v18, %v12870_v22  ;;  %v10280_v12 = vmul.f32 %v10248_v61, %v12888_v53  ;;  %v12910_v30 = vpop.f32.mrf.mxu1  ;;  %v10255_v52 = vmul.f32 %v12901_v11, %v12901_v11 }
 0x402   : > { %v12908_v48 = vpop.f32.mrf.mxu0  ;;  %v10343_v44 = vadd.f32 %v10311_v50, %v12876_v7  ;;  %v10256_v51 = vmul.f32 %v12904_v40, %v12904_v40  ;;  %v10207_v27 = vmul.f32 0.5, %v12862_v62  ;;  %v10208_v34 = vmul.f32 0.5, %v12870_v22 }
 0x403   : > { %10683 = vtanh.f32 %v10367_v9  ;;  %v10368_v56 = vmul.f32 0.7978846, %v10336_v45  ;;  %v10312_v25 = vmul.f32 0.044715, %v10280_v12  ;;  %v12919_v20 = vpop.f32.mrf.mxu1  ;;  %v10287_v49 = vmul.f32 %v10255_v52, %v12901_v11 }
 0x404   : > { %v12917_v5 = vpop.f32.mrf.mxu0  ;;  %v10375_v14 = vmul.f32 0.7978846, %v10343_v44  ;;  %v10288_v57 = vmul.f32 %v10256_v51, %v12904_v40  ;;  %v10215_v44 = vmul.f32 0.5, %v12876_v7 }
 0x405   : > { %10685 = vtanh.f32 %v10368_v56  ;;  %v10344_v26 = vadd.f32 %v10312_v25, %v12888_v53  ;;  %v12926_v10 = vpop.f32.mrf.mxu1  ;;  %v10319_v1 = vmul.f32 0.044715, %v10287_v49  ;;  %v10216_v49 = vmul.f32 0.5, %v12888_v53 }
 0x406   : > { %v12924_v58 = vpop.f32.mrf.mxu0  ;;  %10687 = vtanh.f32 %v10375_v14  ;;  %v10320_v36 = vmul.f32 0.044715, %v10288_v57 }
 0x407   : > { %v10376_v15 = vmul.f32 0.7978846, %v10344_v26  ;;  %v12928_v43 = vpop.f32.mrf.mxu1  ;;  %v10351_v8 = vadd.f32 %v10319_v1, %v12901_v11  ;;  %v9130_v1 = vadd.f32 %v12898_v2, %v12864_v63 }
 0x408   : > { %v9227_v0 = vpop.f32.mrf.mxu0  ;;  %v10352_v6 = vadd.f32 %v10320_v36, %v12904_v40 }
 0x409   : > { %10689 = vtanh.f32 %v10376_v15  ;;  %v12932_v32 = vpop.f32.mrf.mxu1  ;;  %v10383_v46 = vmul.f32 0.7978846, %v10351_v8  ;;  %v9228_v53 = vadd.f32 %v9227_v0, %v9130_v1 }
 0x40a   : > { %v12934_v55 = vpop.f32.mrf.mxu0  ;;  %v10384_v39 = vmul.f32 0.7978846, %v10352_v6 }
 0x40b   : > { %v10680_v17 = vpop.eup %10679  ;;  %v12936_v33 = vpop.f32.mrf.mxu1  ;;  %10691 = vtanh.f32 %v10383_v46  ;;  %v10223_v46 = vmul.f32 0.5, %v12901_v11  ;;  %v9137_v11 = vadd.f32 %v12919_v20, %v12881_v3 }
 0x40c   : > { %v12938_v29 = vpop.f32.mrf.mxu0  ;;  %v10423_v35 = vadd.f32 1.0, %v10680_v17  ;;  %10693 = vtanh.f32 %v10384_v39  ;;  %v9132_v39 = vadd.f32 %v12910_v30, %v12872_v54 }
 0x40d   : > { %v10682_v42 = vpop.eup %10681  ;;  %v12941_v16 = vpop.f32.mrf.mxu1  ;;  %v9236_v0 = vadd.f32 %v12938_v29, %v9137_v11 }
 0x40e   : > { %v12943_v31 = vpop.f32.mrf.mxu0  ;;  %v10455_v24 = vmul.f32 %v10423_v35, %v10199_v21  ;;  %v10424_v41 = vadd.f32 1.0, %v10682_v42  ;;  %v10224_v21 = vmul.f32 0.5, %v12904_v40  ;;  %v9139_v40 = vadd.f32 %v12926_v10, %v12890_v47  ;;  %v13328_v47 = vld [vmem:[#allocation19_spill] sm:$0xff] }
 0x40f   : > { %v9327_v37 = vpop.f32.mrf.mxu1 }
 0x410   : > { %v12946_v60 = vpop.f32.mrf.mxu0  ;;  %v10684_v38 = vpop.eup %10683  ;;  %10487 = vst [vmem:[%s12804_s26 + $0x10] sm:$0xff] %v10455_v24  ;;  %v10456_v19 = vmul.f32 %v10424_v41, %v10200_v4  ;;  %v9230_v24 = vadd.f32 %v12934_v55, %v9132_v39  ;;  %v9328_v4 = vadd.f32 %v9327_v37, %v9228_v53  ;;  %v9144_v55 = vadd.f32 %v12928_v43, %v12896_v28 }
 0x411   : > { %v10431_v13 = vadd.f32 1.0, %v10684_v38  ;;  %v9329_v61 = vpop.f32.mrf.mxu1  ;;  %v9238_v3 = vadd.f32 %v12943_v31, %v9139_v40 }
 0x412   : > { %v12950_v18 = vpop.f32.mrf.mxu0  ;;  %v10686_v50 = vpop.eup %10685  ;;  %10488 = vst [vmem:[%s12804_s26 + $0x18] sm:$0xff] %v10456_v19  ;;  %v9330_v54 = vadd.f32 %v9329_v61, %v9230_v24  ;;  %v9146_v61 = vadd.f32 %v12932_v32, %v12908_v48  ;;  %v9151_v48 = vadd.f32 %v12936_v33, %v12917_v5  ;;  %v9153_v32 = vadd.f32 %v12941_v16, %v12924_v58  ;;  %v13332_v24 = vld [vmem:[#allocation23_spill] sm:$0xff] }
 0x413   : > { %v10688_v23 = vpop.eup %10687  ;;  %v10463_v59 = vmul.f32 %v10431_v13, %v10207_v27  ;;  %v10432_v9 = vadd.f32 1.0, %v10686_v50  ;;  %v9336_v12 = vpop.f32.mrf.mxu1 }
 0x414   : > { %v12954_v45 = vpop.f32.mrf.mxu0  ;;  %v10439_v52 = vadd.f32 1.0, %v10688_v23  ;;  %v9337_v20 = vadd.f32 %v9336_v12, %v9236_v0  ;;  %v9246_v43 = vadd.f32 %v12950_v18, %v9146_v61  ;;  %v13329_v12 = vld [vmem:[#allocation20_spill] sm:$0xff] }
 0x415   : > { %10495 = vst [vmem:[%s12804_s26 + $0x50] sm:$0xff] %v10463_v59  ;;  %v10464_v62 = vmul.f32 %v10432_v9, %v10208_v34  ;;  %v9338_v25 = vpop.f32.mrf.mxu1  ;;  %v9244_v34 = vadd.f32 %v12946_v60, %v9144_v55  ;;  %v9252_v1 = vadd.f32 %v12954_v45, %v9151_v48  ;;  %v13331_v45 = vld [vmem:[#allocation22_spill] sm:$0xff] }
 0x416   : > { %v12958_v56 = vpop.f32.mrf.mxu0  ;;  %v10690_v51 = vpop.eup %10689  ;;  %v10471_v14 = vmul.f32 %v10439_v52, %v10215_v44  ;;  %v9339_v9 = vadd.f32 %v9338_v25, %v9238_v3 }
 0x417   : > { %10496 = vst [vmem:[%s12804_s26 + $0x58] sm:$0xff] %v10464_v62  ;;  %v10440_v22 = vadd.f32 1.0, %v10690_v51  ;;  %v9345_v26 = vpop.f32.mrf.mxu1 }
 0x418   : > { %v9432_v57 = vpop.f32.mrf.mxu0  ;;  %10503 = vst [vmem:[%s12804_s26 + $0x90] sm:$0xff] %v10471_v14  ;;  %v10692_v7 = vpop.eup %10691  ;;  %v9346_v62 = vadd.f32 %v9345_v26, %v9244_v34 }
 0x419   : > { %v10472_v15 = vmul.f32 %v10440_v22, %v10216_v49  ;;  %v9347_v36 = vpop.f32.mrf.mxu1  ;;  %v10694_v6 = vpop.eup %10693  ;;  %v10447_v17 = vadd.f32 1.0, %v10692_v7  ;;  %v9433_v30 = vadd.f32 %v9432_v57, %v9328_v4  ;;  %v9254_v7 = vadd.f32 %v12958_v56, %v9153_v32 }
 0x41a   : > { %v9434_v8 = vpop.f32.mrf.mxu0  ;;  %v10448_v35 = vadd.f32 1.0, %v10694_v6  ;;  %v9348_v22 = vadd.f32 %v9347_v36, %v9246_v43  ;;  %v13334_v43 = vld [vmem:[#allocation5_spill] sm:$0xff] }
 0x41b   : > { %10504 = vst [vmem:[%s12804_s26 + $0x98] sm:$0xff] %v10472_v15  ;;  %v9354_v42 = vpop.f32.mrf.mxu1  ;;  %v10479_v2 = vmul.f32 %v10447_v17, %v10223_v46  ;;  %v9435_v37 = vadd.f32 %v9434_v8, %v9330_v54  ;;  %v13330_v15 = vld [vmem:[#allocation21_spill] sm:$0xff] }
 0x41c   : > { %v9439_v63 = vpop.f32.mrf.mxu0  ;;  %v10480_v41 = vmul.f32 %v10448_v35, %v10224_v21  ;;  %v9355_v17 = vadd.f32 %v9354_v42, %v9252_v1 }
 0x41d   : > { %v9356_v38 = vpop.f32.mrf.mxu1  ;;  %10511 = vst [vmem:[%s12804_s26 + $0xd0] sm:$0xff] %v10479_v2  ;;  %v9440_v44 = vadd.f32 %v9439_v63, %v9337_v20 }
 0x41e   : > { %v9441_v19 = vpop.f32.mrf.mxu0  ;;  %10512 = vst [vmem:[%s12804_s26 + $0xd8] sm:$0xff] %v10480_v41  ;;  %v9357_v39 = vadd.f32 %v9356_v38, %v9254_v7 }
 0x41f   : > { %v9527_v13 = vpop.f32.mrf.mxu1  ;;  %v9442_v60 = vadd.f32 %v9441_v19, %v9339_v9 }
 0x420   : > { %v9446_v27 = vpop.f32.mrf.mxu0  ;;  %v9528_v50 = vadd.f32 %v9527_v13, %v9433_v30 }
 0x421   : > { %v9529_v59 = vpop.f32.mrf.mxu1  ;;  %v9447_v57 = vadd.f32 %v9446_v27, %v9346_v62 }
 0x422   : > { %v9448_v23 = vpop.f32.mrf.mxu0  ;;  %v12985_v10 = vadd.f32 %v9528_v50, %v13328_v47  ;;  %v9530_v29 = vadd.f32 %v9529_v59, %v9435_v37  ;;  %v13333_v37 = vld [vmem:[#allocation10_spill] sm:$0xff] }
 0x423   : > { %v9534_v28 = vpop.f32.mrf.mxu1  ;;  %v9449_v6 = vadd.f32 %v9448_v23, %v9348_v22 }
 0x424   : > { %v9453_v52 = vpop.f32.mrf.mxu0  ;;  %v10233_v31 = vmul.f32 %v12985_v10, %v12985_v10  ;;  %v12991_v51 = vadd.f32 %v9530_v29, %v13329_v12  ;;  %v9535_v25 = vadd.f32 %v9534_v28, %v9440_v44 }
 0x425   : > { %v9536_v49 = vpop.f32.mrf.mxu1  ;;  %v9454_v11 = vadd.f32 %v9453_v52, %v9355_v17 }
 0x426   : > { %v9455_v14 = vpop.f32.mrf.mxu0  ;;  %v10265_v18 = vmul.f32 %v10233_v31, %v12985_v10  ;;  %v10234_v26 = vmul.f32 %v12991_v51, %v12991_v51  ;;  %v13003_v5 = vadd.f32 %v9535_v25, %v13330_v15  ;;  %v9537_v33 = vadd.f32 %v9536_v49, %v9442_v60  ;;  %v13335_v31 = vld [vmem:[#allocation11_spill] sm:$0xff] }
 0x427   : > { %v9541_v58 = vpop.f32.mrf.mxu1  ;;  %v9456_v0 = vadd.f32 %v9455_v14, %v9357_v39 }
 0x428   : > { %v13005_v16 = vpop.f32.mrf.mxu0  ;;  %v10297_v8 = vmul.f32 0.044715, %v10265_v18  ;;  %v10266_v36 = vmul.f32 %v10234_v26, %v12991_v51  ;;  %v9542_v46 = vadd.f32 %v9541_v58, %v9447_v57  ;;  %v10241_v53 = vmul.f32 %v13003_v5, %v13003_v5 }
 0x429   : > { %v13011_v21 = vadd.f32 %v9537_v33, %v13331_v45  ;;  %v9543_v56 = vpop.f32.mrf.mxu1 }
 0x42a   : > { %v13013_v35 = vpop.f32.mrf.mxu0  ;;  %v10329_v63 = vadd.f32 %v10297_v8, %v12985_v10  ;;  %v10298_v2 = vmul.f32 0.044715, %v10266_v36  ;;  %v13017_v4 = vadd.f32 %v9542_v46, %v13332_v24  ;;  %v9544_v41 = vadd.f32 %v9543_v56, %v9449_v6 }
 0x42b   : > { %v10273_v42 = vmul.f32 %v10241_v53, %v13003_v5  ;;  %v10242_v38 = vmul.f32 %v13011_v21, %v13011_v21  ;;  %v9548_v19 = vpop.f32.mrf.mxu1 }
 0x42c   : > { %v13022_v54 = vpop.f32.mrf.mxu0  ;;  %v10361_v30 = vmul.f32 0.7978846, %v10329_v63  ;;  %v10330_v40 = vadd.f32 %v10298_v2, %v12991_v51  ;;  %v10249_v27 = vmul.f32 %v13017_v4, %v13017_v4  ;;  %v13029_v50 = vadd.f32 %v9544_v41, %v13333_v37 }
 0x42d   : > { %v10305_v13 = vmul.f32 0.044715, %v10273_v42  ;;  %v10274_v55 = vmul.f32 %v10242_v38, %v13011_v21  ;;  %v9549_v3 = vadd.f32 %v9548_v19, %v9454_v11  ;;  %v9550_v20 = vpop.f32.mrf.mxu1  ;;  %v10202_v37 = vmul.f32 0.5, %v12991_v51 }
 0x42e   : > { %v13031_v23 = vpop.f32.mrf.mxu0  ;;  %10695 = vtanh.f32 %v10361_v30  ;;  %v10362_v59 = vmul.f32 0.7978846, %v10330_v40  ;;  %v10281_v61 = vmul.f32 %v10249_v27, %v13017_v4  ;;  %v9551_v34 = vadd.f32 %v9550_v20, %v9456_v0 }
 0x42f   : > { %v10337_v47 = vadd.f32 %v10305_v13, %v13003_v5  ;;  %v10306_v29 = vmul.f32 0.044715, %v10274_v55  ;;  %v10250_v9 = vmul.f32 %v13029_v50, %v13029_v50  ;;  %v13039_v52 = vpop.f32.mrf.mxu1  ;;  %v13042_v62 = vadd.f32 %v9549_v3, %v13334_v43 }
 0x430   : > { %v13037_v44 = vpop.f32.mrf.mxu0  ;;  %10697 = vtanh.f32 %v10362_v59  ;;  %v10313_v28 = vmul.f32 0.044715, %v10281_v61  ;;  %v13045_v12 = vadd.f32 %v9551_v34, %v13335_v31  ;;  %v10201_v30 = vmul.f32 0.5, %v12985_v10 }
 0x431   : > { %v10369_v48 = vmul.f32 0.7978846, %v10337_v47  ;;  %v10338_v32 = vadd.f32 %v10306_v29, %v13011_v21  ;;  %v10282_v60 = vmul.f32 %v10250_v9, %v13029_v50  ;;  %v13051_v14 = vpop.f32.mrf.mxu1  ;;  %v10257_v22 = vmul.f32 %v13042_v62, %v13042_v62 }
 0x432   : > { %v13049_v25 = vpop.f32.mrf.mxu0  ;;  %v10345_v49 = vadd.f32 %v10313_v28, %v13017_v4  ;;  %v10258_v26 = vmul.f32 %v13045_v12, %v13045_v12  ;;  %v10209_v34 = vmul.f32 0.5, %v13003_v5  ;;  %v10210_v51 = vmul.f32 0.5, %v13011_v21 }
 0x433   : > { %10699 = vtanh.f32 %v10369_v48  ;;  %v10370_v57 = vmul.f32 0.7978846, %v10338_v32  ;;  %v10314_v18 = vmul.f32 0.044715, %v10282_v60  ;;  %v13060_v7 = vpop.f32.mrf.mxu1  ;;  %v10289_v33 = vmul.f32 %v10257_v22, %v13042_v62 }
 0x434   : > { %v13058_v1 = vpop.f32.mrf.mxu0  ;;  %v10377_v15 = vmul.f32 0.7978846, %v10345_v49  ;;  %v10290_v8 = vmul.f32 %v10258_v26, %v13045_v12  ;;  %v10217_v49 = vmul.f32 0.5, %v13017_v4 }
 0x435   : > { %10701 = vtanh.f32 %v10370_v57  ;;  %v10346_v58 = vadd.f32 %v10314_v18, %v13029_v50  ;;  %v13067_v36 = vpop.f32.mrf.mxu1  ;;  %v10321_v46 = vmul.f32 0.044715, %v10289_v33  ;;  %v10218_v33 = vmul.f32 0.5, %v13029_v50 }
 0x436   : > { %v13065_v6 = vpop.f32.mrf.mxu0  ;;  %10703 = vtanh.f32 %v10377_v15  ;;  %v10322_v39 = vmul.f32 0.044715, %v10290_v8 }
 0x437   : > { %v10378_v17 = vmul.f32 0.7978846, %v10346_v58  ;;  %v13069_v53 = vpop.f32.mrf.mxu1  ;;  %v10353_v56 = vadd.f32 %v10321_v46, %v13042_v62  ;;  %v9742_v46 = vadd.f32 %v13039_v52, %v13005_v16 }
 0x438   : > { %v9839_v45 = vpop.f32.mrf.mxu0  ;;  %v10354_v63 = vadd.f32 %v10322_v39, %v13045_v12 }
 0x439   : > { %10705 = vtanh.f32 %v10378_v17  ;;  %v13073_v2 = vpop.f32.mrf.mxu1  ;;  %v10385_v41 = vmul.f32 0.7978846, %v10353_v56  ;;  %v9840_v50 = vadd.f32 %v9839_v45, %v9742_v46 }
 0x43a   : > { %v13075_v24 = vpop.f32.mrf.mxu0  ;;  %v10386_v42 = vmul.f32 0.7978846, %v10354_v63 }
 0x43b   : > { %v10696_v11 = vpop.eup %10695  ;;  %v13077_v38 = vpop.f32.mrf.mxu1  ;;  %10707 = vtanh.f32 %v10385_v41  ;;  %v10225_v41 = vmul.f32 0.5, %v13042_v62  ;;  %v9749_v62 = vadd.f32 %v13060_v7, %v13022_v54 }
 0x43c   : > { %v13079_v19 = vpop.f32.mrf.mxu0  ;;  %v10425_v40 = vadd.f32 1.0, %v10696_v11  ;;  %10709 = vtanh.f32 %v10386_v42  ;;  %v9744_v42 = vadd.f32 %v13051_v14, %v13013_v35 }
 0x43d   : > { %v10698_v0 = vpop.eup %10697  ;;  %v13082_v27 = vpop.f32.mrf.mxu1  ;;  %v9848_v45 = vadd.f32 %v13079_v19, %v9749_v62 }
 0x43e   : > { %v13084_v13 = vpop.f32.mrf.mxu0  ;;  %v10457_v55 = vmul.f32 %v10425_v40, %v10201_v30  ;;  %v10426_v3 = vadd.f32 1.0, %v10698_v0  ;;  %v10226_v30 = vmul.f32 0.5, %v13045_v12  ;;  %v9751_v12 = vadd.f32 %v13067_v36, %v13031_v23  ;;  %v13336_v23 = vld [vmem:[#allocation6_spill] sm:$0xff] }
 0x43f   : > { %v9939_v59 = vpop.f32.mrf.mxu1 }
 0x440   : > { %v13087_v20 = vpop.f32.mrf.mxu0  ;;  %v10700_v61 = vpop.eup %10699  ;;  %10489 = vst [vmem:[%s12804_s26 + $0x20] sm:$0xff] %v10457_v55  ;;  %v10458_v10 = vmul.f32 %v10426_v3, %v10202_v37  ;;  %v9842_v55 = vadd.f32 %v13075_v24, %v9744_v42  ;;  %v9940_v37 = vadd.f32 %v9939_v59, %v9840_v50  ;;  %v9756_v24 = vadd.f32 %v13069_v53, %v13037_v44  ;;  %v13339_v50 = vld [vmem:[#allocation9_spill] sm:$0xff] }
 0x441   : > { %v10433_v47 = vadd.f32 1.0, %v10700_v61  ;;  %v9941_v9 = vpop.f32.mrf.mxu1  ;;  %v9850_v54 = vadd.f32 %v13084_v13, %v9751_v12 }
 0x442   : > { %v13091_v29 = vpop.f32.mrf.mxu0  ;;  %v10702_v28 = vpop.eup %10701  ;;  %10490 = vst [vmem:[%s12804_s26 + $0x28] sm:$0xff] %v10458_v10  ;;  %v9942_v35 = vadd.f32 %v9941_v9, %v9842_v55  ;;  %v9758_v9 = vadd.f32 %v13073_v2, %v13049_v25  ;;  %v9763_v25 = vadd.f32 %v13077_v38, %v13058_v1  ;;  %v9765_v2 = vadd.f32 %v13082_v27, %v13065_v6 }
 0x443   : > { %v10704_v43 = vpop.eup %10703  ;;  %v10465_v31 = vmul.f32 %v10433_v47, %v10209_v34  ;;  %v10434_v48 = vadd.f32 1.0, %v10702_v28  ;;  %v9948_v60 = vpop.f32.mrf.mxu1 }
 0x444   : > { %v13095_v32 = vpop.f32.mrf.mxu0  ;;  %v10441_v22 = vadd.f32 1.0, %v10704_v43  ;;  %v9949_v7 = vadd.f32 %v9948_v60, %v9848_v45  ;;  %v9858_v44 = vadd.f32 %v13091_v29, %v9758_v9  ;;  %v13337_v60 = vld [vmem:[#allocation7_spill] sm:$0xff] }
 0x445   : > { %10497 = vst [vmem:[%s12804_s26 + $0x60] sm:$0xff] %v10465_v31  ;;  %v10466_v5 = vmul.f32 %v10434_v48, %v10210_v51  ;;  %v9950_v18 = vpop.f32.mrf.mxu1  ;;  %v9856_v51 = vadd.f32 %v13087_v20, %v9756_v24 }
 0x446   : > { %v13099_v57 = vpop.f32.mrf.mxu0  ;;  %v10706_v26 = vpop.eup %10705  ;;  %v10473_v15 = vmul.f32 %v10441_v22, %v10217_v49  ;;  %v9951_v48 = vadd.f32 %v9950_v18, %v9850_v54 }
 0x447   : > { %10498 = vst [vmem:[%s12804_s26 + $0x68] sm:$0xff] %v10466_v5  ;;  %v10442_v21 = vadd.f32 1.0, %v10706_v26  ;;  %v9957_v58 = vpop.f32.mrf.mxu1  ;;  %v9866_v46 = vadd.f32 %v13099_v57, %v9765_v2 }
 0x448   : > { %v10044_v8 = vpop.f32.mrf.mxu0  ;;  %10505 = vst [vmem:[%s12804_s26 + $0xa0] sm:$0xff] %v10473_v15  ;;  %v10708_v4 = vpop.eup %10707  ;;  %v9958_v53 = vadd.f32 %v9957_v58, %v9856_v51 }
 0x449   : > { %v10474_v17 = vmul.f32 %v10442_v21, %v10218_v33  ;;  %v9959_v39 = vpop.f32.mrf.mxu1  ;;  %v10710_v63 = vpop.eup %10709  ;;  %v10449_v11 = vadd.f32 1.0, %v10708_v4  ;;  %v10045_v14 = vadd.f32 %v10044_v8, %v9940_v37  ;;  %v9864_v8 = vadd.f32 %v13095_v32, %v9763_v25  ;;  %v13338_v4 = vld [vmem:[#allocation8_spill] sm:$0xff] }
 0x44a   : > { %v10046_v56 = vpop.f32.mrf.mxu0  ;;  %v10450_v40 = vadd.f32 1.0, %v10710_v63  ;;  %v9960_v33 = vadd.f32 %v9959_v39, %v9858_v44 }
 0x44b   : > { %10506 = vst [vmem:[%s12804_s26 + $0xa8] sm:$0xff] %v10474_v17  ;;  %v9966_v0 = vpop.f32.mrf.mxu1  ;;  %v10481_v52 = vmul.f32 %v10449_v11, %v10225_v41  ;;  %v10047_v59 = vadd.f32 %v10046_v56, %v9942_v35 }
 0x44c   : > { %v10051_v16 = vpop.f32.mrf.mxu0  ;;  %v10482_v3 = vmul.f32 %v10450_v40, %v10226_v30  ;;  %v9967_v63 = vadd.f32 %v9966_v0, %v9864_v8 }
 0x44d   : > { %v9968_v61 = vpop.f32.mrf.mxu1  ;;  %10513 = vst [vmem:[%s12804_s26 + $0xe0] sm:$0xff] %v10481_v52  ;;  %v10052_v49 = vadd.f32 %v10051_v16, %v9949_v7  ;;  %v13340_v16 = vld [vmem:[#allocation12_spill] sm:$0xff] }
 0x44e   : > { %v10053_v10 = vpop.f32.mrf.mxu0  ;;  %10514 = vst [vmem:[%s12804_s26 + $0xe8] sm:$0xff] %v10482_v3  ;;  %v9969_v41 = vadd.f32 %v9968_v61, %v9866_v46 }
 0x44f   : > { %v10139_v47 = vpop.f32.mrf.mxu1  ;;  %v10054_v20 = vadd.f32 %v10053_v10, %v9951_v48  ;;  %v13343_v48 = vld [vmem:[#allocation15_spill] sm:$0xff] }
 0x450   : > { %v10058_v34 = vpop.f32.mrf.mxu0  ;;  %v10140_v28 = vadd.f32 %v10139_v47, %v10045_v14 }
 0x451   : > { %v10141_v31 = vpop.f32.mrf.mxu1  ;;  %v10059_v21 = vadd.f32 %v10058_v34, %v9958_v53  ;;  %v13341_v34 = vld [vmem:[#allocation13_spill] sm:$0xff] }
 0x452   : > { %v10060_v43 = vpop.f32.mrf.mxu0  ;;  %v13126_v36 = vadd.f32 %v10140_v28, %v13336_v23  ;;  %v10142_v19 = vadd.f32 %v10141_v31, %v10047_v59  ;;  %v13342_v23 = vld [vmem:[#allocation14_spill] sm:$0xff] }
 0x453   : > { %v10146_v22 = vpop.f32.mrf.mxu1  ;;  %v10061_v17 = vadd.f32 %v10060_v43, %v9960_v33 }
 0x454   : > { %v10235_v13 = vmul.f32 %v13126_v36, %v13126_v36  ;;  %v13132_v5 = vadd.f32 %v10142_v19, %v13337_v60  ;;  %v10065_v26 = vpop.f32.mrf.mxu0  ;;  %v10147_v18 = vadd.f32 %v10146_v22, %v10052_v49 }
 0x455   : > { %v10148_v15 = vpop.f32.mrf.mxu1  ;;  %v10066_v37 = vadd.f32 %v10065_v26, %v9967_v63 }
 0x456   : > { %v10267_v29 = vmul.f32 %v10235_v13, %v13126_v36  ;;  %v10236_v58 = vmul.f32 %v13132_v5, %v13132_v5  ;;  %v13144_v1 = vadd.f32 %v10147_v18, %v13338_v4  ;;  %v10149_v38 = vadd.f32 %v10148_v15, %v10054_v20  ;;  %v10067_v42 = vpop.f32.mrf.mxu0 }
 0x457   : > { %v10153_v6 = vpop.f32.mrf.mxu1  ;;  %v10068_v35 = vadd.f32 %v10067_v42, %v9969_v41  ;;  %v10204_v63 = vmul.f32 0.5, %v13132_v5 }
 0x458   : > { %v10299_v27 = vmul.f32 0.044715, %v10267_v29  ;;  %v10268_v56 = vmul.f32 %v10236_v58, %v13132_v5  ;;  %v10154_v39 = vadd.f32 %v10153_v6, %v10059_v21  ;;  %v10243_v11 = vmul.f32 %v13144_v1, %v13144_v1 }
 0x459   : > { %v13150_v32 = vadd.f32 %v10149_v38, %v13339_v50  ;;  %v10155_v57 = vpop.f32.mrf.mxu1  ;;  %v10211_v50 = vmul.f32 0.5, %v13144_v1 }
 0x45a   : > { %v10331_v30 = vadd.f32 %v10299_v27, %v13126_v36  ;;  %v10300_v40 = vmul.f32 0.044715, %v10268_v56  ;;  %v13154_v52 = vadd.f32 %v10154_v39, %v13340_v16  ;;  %v10156_v55 = vadd.f32 %v10155_v57, %v10061_v17 }
 0x45b   : > { %v10275_v3 = vmul.f32 %v10243_v11, %v13144_v1  ;;  %v10244_v0 = vmul.f32 %v13150_v32, %v13150_v32  ;;  %v10160_v62 = vpop.f32.mrf.mxu1  ;;  %v10203_v27 = vmul.f32 0.5, %v13126_v36  ;;  %v10212_v16 = vmul.f32 0.5, %v13150_v32 }
 0x45c   : > { %v10363_v61 = vmul.f32 0.7978846, %v10331_v30  ;;  %v10332_v10 = vadd.f32 %v10300_v40, %v13132_v5  ;;  %v10251_v14 = vmul.f32 %v13154_v52, %v13154_v52  ;;  %v13164_v47 = vadd.f32 %v10156_v55, %v13341_v34 }
 0x45d   : > { %v10307_v12 = vmul.f32 0.044715, %v10275_v3  ;;  %v10276_v45 = vmul.f32 %v10244_v0, %v13150_v32  ;;  %v10161_v24 = vadd.f32 %v10160_v62, %v10066_v37  ;;  %v10162_v59 = vpop.f32.mrf.mxu1  ;;  %v10219_v5 = vmul.f32 0.5, %v13154_v52 }
 0x45e   : > { %10711 = vtanh.f32 %v10363_v61  ;;  %v10364_v28 = vmul.f32 0.7978846, %v10332_v10  ;;  %v10283_v54 = vmul.f32 %v10251_v14, %v13154_v52  ;;  %v10163_v7 = vadd.f32 %v10162_v59, %v10068_v35 }
 0x45f   : > { %v10339_v43 = vadd.f32 %v10307_v12, %v13144_v1  ;;  %v10308_v31 = vmul.f32 0.044715, %v10276_v45  ;;  %v10252_v9 = vmul.f32 %v13164_v47, %v13164_v47  ;;  %v10195_v19 = vadd.f32 %v10161_v24, %v13342_v23 }
 0x460   : > { %10713 = vtanh.f32 %v10364_v28  ;;  %v10315_v51 = vmul.f32 0.044715, %v10283_v54  ;;  %v10196_v49 = vadd.f32 %v10163_v7, %v13343_v48  ;;  %v10220_v1 = vmul.f32 0.5, %v13164_v47 }
 0x461   : > { %v10371_v22 = vmul.f32 0.7978846, %v10339_v43  ;;  %v10340_v44 = vadd.f32 %v10308_v31, %v13150_v32  ;;  %v10284_v53 = vmul.f32 %v10252_v9, %v13164_v47  ;;  %v10259_v60 = vmul.f32 %v10195_v19, %v10195_v19 }
 0x462   : > { %v10347_v13 = vadd.f32 %v10315_v51, %v13154_v52  ;;  %v10260_v20 = vmul.f32 %v10196_v49, %v10196_v49  ;;  %v10227_v52 = vmul.f32 0.5, %v10195_v19  ;;  %v10228_v12 = vmul.f32 0.5, %v10196_v49 }
 0x463   : > { %10715 = vtanh.f32 %v10371_v22  ;;  %v10372_v25 = vmul.f32 0.7978846, %v10340_v44  ;;  %v10316_v2 = vmul.f32 0.044715, %v10284_v53  ;;  %v10291_v18 = vmul.f32 %v10259_v60, %v10195_v19 }
 0x464   : > { %v10379_v26 = vmul.f32 0.7978846, %v10347_v13  ;;  %v10292_v33 = vmul.f32 %v10260_v20, %v10196_v49 }
 0x465   : > { %10717 = vtanh.f32 %v10372_v25  ;;  %v10348_v15 = vadd.f32 %v10316_v2, %v13164_v47  ;;  %v10323_v21 = vmul.f32 0.044715, %v10291_v18 }
 0x466   : > { %10719 = vtanh.f32 %v10379_v26  ;;  %v10324_v58 = vmul.f32 0.044715, %v10292_v33 }
 0x467   : > { %v10380_v29 = vmul.f32 0.7978846, %v10348_v15  ;;  %v10355_v8 = vadd.f32 %v10323_v21, %v10195_v19 }
 0x468   : > { %v10356_v46 = vadd.f32 %v10324_v58, %v10196_v49 }
 0x469   : > { %10721 = vtanh.f32 %v10380_v29  ;;  %v10387_v4 = vmul.f32 0.7978846, %v10355_v8 }
 0x46a   : > { %v10388_v6 = vmul.f32 0.7978846, %v10356_v46 }
 0x46b   : > { %v10712_v38 = vpop.eup %10711  ;;  %10723 = vtanh.f32 %v10387_v4 }
 0x46c   : > { %v10427_v17 = vadd.f32 1.0, %v10712_v38  ;;  %10725 = vtanh.f32 %v10388_v6 }
 0x46d   : > { %v10714_v56 = vpop.eup %10713 }
 0x46e   : > { %v10459_v39 = vmul.f32 %v10427_v17, %v10203_v27  ;;  %v10428_v41 = vadd.f32 1.0, %v10714_v56 }
 0x470   : > { %v10716_v11 = vpop.eup %10715  ;;  %10491 = vst [vmem:[%s12804_s26 + $0x30] sm:$0xff] %v10459_v39  ;;  %v10460_v42 = vmul.f32 %v10428_v41, %v10204_v63 }
 0x471   : > { %v10435_v57 = vadd.f32 1.0, %v10716_v11 }
 0x472   : > { %v10718_v30 = vpop.eup %10717  ;;  %10492 = vst [vmem:[%s12804_s26 + $0x38] sm:$0xff] %v10460_v42 }
 0x473   : > { %v10720_v36 = vpop.eup %10719  ;;  %v10467_v40 = vmul.f32 %v10435_v57, %v10211_v50  ;;  %v10436_v55 = vadd.f32 1.0, %v10718_v30 }
 0x474   : > { %v10443_v37 = vadd.f32 1.0, %v10720_v36 }
 0x475   : > { %10499 = vst [vmem:[%s12804_s26 + $0x70] sm:$0xff] %v10467_v40  ;;  %v10468_v3 = vmul.f32 %v10436_v55, %v10212_v16 }
 0x476   : > { %v10722_v0 = vpop.eup %10721  ;;  %v10475_v62 = vmul.f32 %v10443_v37, %v10219_v5 }
 0x477   : > { %10500 = vst [vmem:[%s12804_s26 + $0x78] sm:$0xff] %v10468_v3  ;;  %v10444_v61 = vadd.f32 1.0, %v10722_v0 }
 0x478   : > { %10507 = vst [vmem:[%s12804_s26 + $0xb0] sm:$0xff] %v10475_v62  ;;  %v10724_v10 = vpop.eup %10723 }
 0x479   : > { %v10476_v35 = vmul.f32 %v10444_v61, %v10220_v1  ;;  %v10726_v32 = vpop.eup %10725  ;;  %v10451_v14 = vadd.f32 1.0, %v10724_v10 }
 0x47a   : > { %v10452_v45 = vadd.f32 1.0, %v10726_v32 }
 0x47b   : > { %10508 = vst [vmem:[%s12804_s26 + $0xb8] sm:$0xff] %v10476_v35  ;;  %v10483_v34 = vmul.f32 %v10451_v14, %v10227_v52 }
 0x47c   : > { %v10484_v47 = vmul.f32 %v10452_v45, %v10228_v12 }
 0x47d   : > { %10515 = vst [vmem:[%s12804_s26 + $0xf0] sm:$0xff] %v10483_v34 }
 0x47e   : > { %10516 = vst [vmem:[%s12804_s26 + $0xf8] sm:$0xff] %v10484_v47 }
 0x47f   : > { %10740 = shalt.err (!%p10737_p3)
}
 0x480   : > { %s10741_s8 = scalar_lea.hbm %s13193_s3, 4096  ;;  %s10745_s17 = scalar_lea.hbm %s13243_s2, 8192 }
 0x481   : > { %p10742_p4 = scmp.ne.s32.totalorder %s13193_s3, %s10741_s8  ;;  %p10746_p9 = scmp.lt.s32.totalorder %s13193_s3, %s13243_s2 }
 0x482   : > { %p10747_p10 = scmp.lt.s32.totalorder %s10745_s17, %s10741_s8 }
 0x483   : > { %p10743_p7 = pnand %p10742_p4, %p10849_p5 }
 0x484   : > { %p10748_p11 = por %p10747_p10, %p10746_p9 }
 0x485   : > { %p10744_p8 = pneg %p10743_p7 }
 0x487   : > { %p10749_p12 = pnand %p10748_p11, %p10744_p8 }
 0x489   : > { %10752 = shalt.err (!%p10749_p12)
}
 0x48a   : > { %s10794_s23 = smov 1024   ;;  %s10795_s25 = smov 64  }
 0x48b   : > { %10618 = dma.vmem_to_hbm [thread:$0]  (%p10849_p5), %s13195_s28, 4096, %s13193_s3, %s13201_s13, %s10794_s23, %s10794_s23, %s10795_s25  }
 0x48c PF: > { %p10624_p13 = scmp.ge.s32.totalorder %s10787_s12, 2  ;;  %s10546_s24 = sand.u32 1, %s10775_s9  }
 0x48d   : > { %s10547_s26 = scalar_lea.sflag [#allocation3], %s10546_s24 }
 0x48e   : > { %p10621_p0 = pnand %p10624_p13, %p10853_p6 }
 0x490   : > { %p10622_p1 = pneg %p10621_p0 }
 0x492   : > { %10770 = dma.done.wait (%p10622_p1), %s10547_s26, 4096  }
 0x493   : > { %10772 = vsyncadd (%p10622_p1), %s10547_s26, 4294963200  ;;  %p12_p2 = scmp.ge.s32.totalorder %s10836_s15, 4   ;;  %s13344_s9 = smov %s10779_s10 }
 0x494   : > { %s13345_s10 = smov %s10783_s11  ;;  %s13346_s11 = smov %s10847_s18 }
 0x495   : > { %s13347_s12 = smov %s10836_s15  ;;  %14 = sbr.rel (!%p12_p2) target bundleno = 3 (0x3), region = 66 }
 0x49a   :  { %10552 = vsyncpa [#allocation3], 1 }
 0x49b   :  { %10554 = vsyncpa [#allocation3 + $0x1], 1 }

</bundles_post_ra>
